<compile_context>
chip_gen: v6e
topology: v6e:2x2x1
jax: 0.10.0
libtpu: 0.0.40
codegen_flags: <defaults>
</compile_context>

<pallas_src>
import jax
import jax.numpy as jnp
from jax import lax
from jax.experimental import pallas as pl
from jax.experimental.pallas import tpu as pltpu

# ---- problem sizes (small, consistent with the module's forward) -----------
B, S, T = 2, 8, 8          # batch, src length, trg length
E = 16                     # emb_size
H = 32                     # hidden_size
H2 = 2 * H                 # bidirectional encoder feature size

NEG = -1e9                 # stands in for masked_fill(-inf); avoids NaN rows


def _decoder_kernel(
    trg_ref,       # (T, B, E)     target embeddings (time-major)
    enc_ref,       # (B, S, 2H)    encoder hidden states (attention value)
    pk_ref,        # (B, S, H)     proj_key (precomputed in wrapper)
    h0_ref,        # (B, H)        initial hidden = tanh(bridge(encoder_final))
    maskb_ref,     # (B, S)        additive mask bias: 0 keep / -1e9 masked
    wq_ref,        # (H, H)        query_layer.weight, pre-transposed
    we_ref,        # (1, H)        energy_layer.weight
    wih_e_ref,     # (E, 3H)       rnn.weight_ih_l0[:, :E].T
    wih_c_ref,     # (2H, 3H)      rnn.weight_ih_l0[:, E:].T
    whh_ref,       # (H, 3H)       rnn.weight_hh_l0.T
    bih_ref,       # (1, 3H)       rnn.bias_ih_l0
    bhh_ref,       # (1, 3H)       rnn.bias_hh_l0
    wpre_e_ref,    # (E, H)        pre_output.weight[:, :E].T
    wpre_h_ref,    # (H, H)        pre_output.weight[:, E:E+H].T
    wpre_c_ref,    # (2H, H)       pre_output.weight[:, E+H:].T
    states_ref,    # out (T, B, H) decoder states
    preout_ref,    # out (T, B, H) pre-output vectors
):
    # --- hoist loop-invariant loads out of the recurrence --------------------
    enc = enc_ref[...]
    pk = pk_ref[...]
    maskb = maskb_ref[...]
    wq = wq_ref[...]
    we = we_ref[0]
    wih_e = wih_e_ref[...]
    wih_c = wih_c_ref[...]
    whh = whh_ref[...]
    bih = bih_ref[0]
    bhh = bhh_ref[0]
    wpre_e = wpre_e_ref[...]
    wpre_h = wpre_h_ref[...]
    wpre_c = wpre_c_ref[...]

    def step(t, h):
        prev = trg_ref[t]                                                  # (B, E)

        # ---- Bahdanau attention ---------------------------------------------
        q = jnp.dot(h, wq, preferred_element_type=jnp.float32)             # (B, H)
        energy = jnp.tanh(q[:, None, :] + pk)                              # (B, S, H)
        scores = jnp.sum(energy * we[None, None, :], axis=-1) + maskb      # (B, S)
        scores = scores - jnp.max(scores, axis=-1, keepdims=True)
        ex = jnp.exp(scores)
        alphas = ex / jnp.sum(ex, axis=-1, keepdims=True)                  # (B, S)
        context = jnp.sum(alphas[:, :, None] * enc, axis=1)                # (B, 2H)

        # ---- GRU cell (PyTorch gate order: r, z, n), split dots (no concat) --
        gi = (jnp.dot(prev, wih_e, preferred_element_type=jnp.float32)
              + jnp.dot(context, wih_c, preferred_element_type=jnp.float32)
              + bih)                                                        # (B, 3H)
        gh = jnp.dot(h, whh, preferred_element_type=jnp.float32) + bhh      # (B, 3H)
        r = jax.nn.sigmoid(gi[:, :H] + gh[:, :H])
        z = jax.nn.sigmoid(gi[:, H:2 * H] + gh[:, H:2 * H])
        n = jnp.tanh(gi[:, 2 * H:] + r * gh[:, 2 * H:])
        h_new = (1.0 - z) * n + z * h                                       # (B, H)

        # ---- pre-output (dropout == identity in eval mode), split dots --------
        pre = (jnp.dot(prev, wpre_e, preferred_element_type=jnp.float32)
               + jnp.dot(h_new, wpre_h, preferred_element_type=jnp.float32)
               + jnp.dot(context, wpre_c, preferred_element_type=jnp.float32))

        states_ref[t] = h_new
        preout_ref[t] = pre
        return h_new

    lax.fori_loop(0, T, step, h0_ref[...], unroll=True)


@jax.jit
def decoder_forward(trg_embed, encoder_hidden, encoder_final, src_mask, params):
    """Mirrors Decoder.forward (eval mode).

    Args:
      trg_embed:      (B, T, E)
      encoder_hidden: (B, S, 2H)
      encoder_final:  (1, B, 2H)    (num_layers = 1)
      src_mask:       (B, 1, S)     1 = keep, 0 = masked
    Returns:
      decoder_states     (B, T, H)
      hidden             (1, B, H)
      pre_output_vectors (B, T, H)
    """
    trg_t = jnp.transpose(trg_embed, (1, 0, 2)).astype(jnp.float32)      # (T, B, E)
    enc = encoder_hidden.astype(jnp.float32)                             # (B, S, 2H)
    encf = encoder_final[0].astype(jnp.float32)                          # (B, 2H)
    mask2d = src_mask.reshape(B, S).astype(jnp.float32)                  # (B, S)

    # ---- one-time work done in plain XLA (outside the recurrence) ----------
    h0 = jnp.tanh(encf @ params["wb"].T + params["bb"][0])               # (B, H)
    pk = jnp.einsum("bsd,hd->bsh", enc, params["wk"])                    # (B, S, H)
    mask_bias = (mask2d - 1.0) * 1e9                                     # 0 / -1e9

    # ---- weights pre-transposed / pre-split for the kernel ------------------
    wqT = params["wq"].T                                                 # (H, H)
    we = params["we"]                                                    # (1, H)
    wih_eT = params["wih"][:, :E].T                                      # (E, 3H)
    wih_cT = params["wih"][:, E:].T                                      # (2H, 3H)
    whhT = params["whh"].T                                               # (H, 3H)
    bih = params["bih"]                                                  # (1, 3H)
    bhh = params["bhh"]                                                  # (1, 3H)
    wpre_eT = params["wpre"][:, :E].T                                    # (E, H)
    wpre_hT = params["wpre"][:, E:E + H].T                               # (H, H)
    wpre_cT = params["wpre"][:, E + H:].T                                # (2H, H)

    n_inputs = 15
    vmem = lambda: pl.BlockSpec(memory_space=pltpu.MemorySpace.VMEM)

    states_t, preout_t = pl.pallas_call(
        _decoder_kernel,
        out_shape=[
            jax.ShapeDtypeStruct((T, B, H), jnp.float32),
            jax.ShapeDtypeStruct((T, B, H), jnp.float32),
        ],
        in_specs=[vmem() for _ in range(n_inputs)],
        out_specs=[vmem(), vmem()],
    )(
        trg_t, enc, pk, h0, mask_bias,
        wqT, we,
        wih_eT, wih_cT, whhT, bih, bhh,
        wpre_eT, wpre_hT, wpre_cT,
    )

    decoder_states = jnp.transpose(states_t, (1, 0, 2))      # (B, T, H)
    pre_output_vectors = jnp.transpose(preout_t, (1, 0, 2))  # (B, T, H)
    # num_layers == 1  ->  final hidden == last GRU output (last decoder state)
    hidden = states_t[T - 1][None]                            # (1, B, H)
    return decoder_states, hidden, pre_output_vectors


# ---- pure-JAX reference (same math, original weight layout) -----------------
def decoder_reference(trg_embed, encoder_hidden, encoder_final, src_mask, p):
    mask = src_mask.reshape(B, S).astype(jnp.float32)
    h0 = jnp.tanh(encoder_final[0] @ p["wb"].T + p["bb"][0])
    pk = jnp.einsum("bsd,hd->bsh", encoder_hidden, p["wk"])

    def step(h, prev):
        q = h @ p["wq"].T
        energy = jnp.tanh(q[:, None, :] + pk)
        scores = jnp.sum(energy * p["we"][0][None, None, :], axis=-1)
        scores = jnp.where(mask == 0.0, NEG, scores)
        scores = scores - scores.max(-1, keepdims=True)
        ex = jnp.exp(scores)
        alphas = ex / ex.sum(-1, keepdims=True)
        context = jnp.einsum("bs,bsd->bd", alphas, encoder_hidden)
        x = jnp.concatenate([prev, context], -1)
        gi = x @ p["wih"].T + p["bih"][0]
        gh = h @ p["whh"].T + p["bhh"][0]
        r = jax.nn.sigmoid(gi[:, :H] + gh[:, :H])
        z = jax.nn.sigmoid(gi[:, H:2 * H] + gh[:, H:2 * H])
        n = jnp.tanh(gi[:, 2 * H:] + r * gh[:, 2 * H:])
        h_new = (1.0 - z) * n + z * h
        pre = jnp.concatenate([prev, h_new, context], -1) @ p["wpre"].T
        return h_new, (h_new, pre)

    hT, (st, pr) = lax.scan(step, h0, jnp.transpose(trg_embed, (1, 0, 2)))
    return jnp.transpose(st, (1, 0, 2)), hT[None], jnp.transpose(pr, (1, 0, 2))


if __name__ == "__main__":
    key = jax.random.PRNGKey(0)
    ks = jax.random.split(key, 16)

    def init(k, shape, scale=0.1):
        return (scale * jax.random.normal(k, shape)).astype(jnp.float32)

    params = {
        "wq":   init(ks[0], (H, H)),
        "we":   init(ks[1], (1, H)),
        "wk":   init(ks[2], (H, H2)),
        "wb":   init(ks[3], (H, H2)),
        "bb":   init(ks[4], (1, H)),
        "wih":  init(ks[5], (3 * H, E + H2)),
        "whh":  init(ks[6], (3 * H, H)),
        "bih":  init(ks[7], (1, 3 * H)),
        "bhh":  init(ks[8], (1, 3 * H)),
        "wpre": init(ks[9], (H, E + H + H2)),
    }

    trg_embed = init(ks[10], (B, T, E), 1.0)
    encoder_hidden = init(ks[11], (B, S, H2), 1.0)
    encoder_final = init(ks[12], (1, B, H2), 1.0)
    # mask: first row fully visible, second row masks the last 3 source positions
    src_mask = jnp.ones((B, 1, S), jnp.float32)
    src_mask = src_mask.at[1, 0, S - 3:].set(0.0)

    states, hidden, pre_out = decoder_forward(
        trg_embed, encoder_hidden, encoder_final, src_mask, params)
    jax.block_until_ready((states, hidden, pre_out))

    r_states, r_hidden, r_pre = decoder_reference(
        trg_embed, encoder_hidden, encoder_final, src_mask, params)

    assert states.shape == (B, T, H) and pre_out.shape == (B, T, H)
    assert hidden.shape == (1, B, H)
    assert jnp.allclose(states, r_states, atol=1e-3, rtol=1e-3)
    assert jnp.allclose(hidden, r_hidden, atol=1e-3, rtol=1e-3)
    assert jnp.allclose(pre_out, r_pre, atol=1e-3, rtol=1e-3)

    print("KERNEL_OK")
</pallas_src>

<mosaic_0001>
module attributes {stable_mosaic.version = 11 : i64} {
  func.func @_decoder_kernel(%arg0: memref<8x2x16xf32, #tpu.memory_space<vmem>>, %arg1: memref<2x8x64xf32, #tpu.memory_space<vmem>>, %arg2: memref<2x8x32xf32, #tpu.memory_space<vmem>>, %arg3: memref<2x32xf32, #tpu.memory_space<vmem>>, %arg4: memref<2x8xf32, #tpu.memory_space<vmem>>, %arg5: memref<32x32xf32, #tpu.memory_space<vmem>>, %arg6: memref<1x32xf32, #tpu.memory_space<vmem>>, %arg7: memref<16x96xf32, #tpu.memory_space<vmem>>, %arg8: memref<64x96xf32, #tpu.memory_space<vmem>>, %arg9: memref<32x96xf32, #tpu.memory_space<vmem>>, %arg10: memref<1x96xf32, #tpu.memory_space<vmem>>, %arg11: memref<1x96xf32, #tpu.memory_space<vmem>>, %arg12: memref<16x32xf32, #tpu.memory_space<vmem>>, %arg13: memref<32x32xf32, #tpu.memory_space<vmem>>, %arg14: memref<64x32xf32, #tpu.memory_space<vmem>>, %arg15: memref<8x2x32xf32, #tpu.memory_space<vmem>>, %arg16: memref<8x2x32xf32, #tpu.memory_space<vmem>>) attributes {dimension_semantics = [], scalar_prefetch = 0 : i64, scratch_operands = 0 : i64, tpu.core_type = #tpu.core_type<tc>} {
    %c0 = arith.constant 0 : index
    %c0_0 = arith.constant 0 : index
    %c0_1 = arith.constant 0 : index
    %0 = vector.load %arg1[%c0, %c0_0, %c0_1] : memref<2x8x64xf32, #tpu.memory_space<vmem>>, vector<2x8x64xf32>
    %c0_2 = arith.constant 0 : index
    %c0_3 = arith.constant 0 : index
    %c0_4 = arith.constant 0 : index
    %1 = vector.load %arg2[%c0_2, %c0_3, %c0_4] : memref<2x8x32xf32, #tpu.memory_space<vmem>>, vector<2x8x32xf32>
    %c0_5 = arith.constant 0 : index
    %c0_6 = arith.constant 0 : index
    %2 = vector.load %arg4[%c0_5, %c0_6] : memref<2x8xf32, #tpu.memory_space<vmem>>, vector<2x8xf32>
    %c0_7 = arith.constant 0 : index
    %c0_8 = arith.constant 0 : index
    %3 = vector.load %arg5[%c0_7, %c0_8] : memref<32x32xf32, #tpu.memory_space<vmem>>, vector<32x32xf32>
    %c0_9 = arith.constant 0 : index
    %c0_10 = arith.constant 0 : index
    %4 = vector.load %arg6[%c0_9, %c0_10] : memref<1x32xf32, #tpu.memory_space<vmem>>, vector<1x32xf32>
    %5 = vector.shape_cast %4 : vector<1x32xf32> to vector<32xf32>
    %c0_11 = arith.constant 0 : index
    %c0_12 = arith.constant 0 : index
    %6 = vector.load %arg7[%c0_11, %c0_12] : memref<16x96xf32, #tpu.memory_space<vmem>>, vector<16x96xf32>
    %c0_13 = arith.constant 0 : index
    %c0_14 = arith.constant 0 : index
    %7 = vector.load %arg8[%c0_13, %c0_14] : memref<64x96xf32, #tpu.memory_space<vmem>>, vector<64x96xf32>
    %c0_15 = arith.constant 0 : index
    %c0_16 = arith.constant 0 : index
    %8 = vector.load %arg9[%c0_15, %c0_16] : memref<32x96xf32, #tpu.memory_space<vmem>>, vector<32x96xf32>
    %c0_17 = arith.constant 0 : index
    %c0_18 = arith.constant 0 : index
    %9 = vector.load %arg10[%c0_17, %c0_18] : memref<1x96xf32, #tpu.memory_space<vmem>>, vector<1x96xf32>
    %10 = vector.shape_cast %9 : vector<1x96xf32> to vector<96xf32>
    %c0_19 = arith.constant 0 : index
    %c0_20 = arith.constant 0 : index
    %11 = vector.load %arg11[%c0_19, %c0_20] : memref<1x96xf32, #tpu.memory_space<vmem>>, vector<1x96xf32>
    %12 = vector.shape_cast %11 : vector<1x96xf32> to vector<96xf32>
    %c0_21 = arith.constant 0 : index
    %c0_22 = arith.constant 0 : index
    %13 = vector.load %arg12[%c0_21, %c0_22] : memref<16x32xf32, #tpu.memory_space<vmem>>, vector<16x32xf32>
    %c0_23 = arith.constant 0 : index
    %c0_24 = arith.constant 0 : index
    %14 = vector.load %arg13[%c0_23, %c0_24] : memref<32x32xf32, #tpu.memory_space<vmem>>, vector<32x32xf32>
    %c0_25 = arith.constant 0 : index
    %c0_26 = arith.constant 0 : index
    %15 = vector.load %arg14[%c0_25, %c0_26] : memref<64x32xf32, #tpu.memory_space<vmem>>, vector<64x32xf32>
    %c0_27 = arith.constant 0 : index
    %c0_28 = arith.constant 0 : index
    %16 = vector.load %arg3[%c0_27, %c0_28] : memref<2x32xf32, #tpu.memory_space<vmem>>, vector<2x32xf32>
    %c0_i32 = arith.constant 0 : i32
    %17 = arith.index_cast %c0_i32 : i32 to index
    %c0_29 = arith.constant 0 : index
    %c0_30 = arith.constant 0 : index
    %18 = vector.load %arg0[%17, %c0_29, %c0_30] : memref<8x2x16xf32, #tpu.memory_space<vmem>>, vector<1x2x16xf32>
    %19 = vector.shape_cast %18 : vector<1x2x16xf32> to vector<2x16xf32>
    %cst = arith.constant dense<0.000000e+00> : vector<2x32xf32>
    %20 = tpu.matmul %16, %3, %cst {dimension_numbers = #tpu.dot_dimension_numbers<[1], [0], [0], [1], [0, 0, 1, 1], [], []>} : vector<2x32xf32>, vector<32x32xf32>, vector<2x32xf32> -> vector<2x32xf32>
    %21 = vector.shape_cast %20 : vector<2x32xf32> to vector<2x1x32xf32>
    %22 = vector.broadcast %21 : vector<2x1x32xf32> to vector<2x8x32xf32>
    %23 = arith.addf %22, %1 : vector<2x8x32xf32>
    %24 = math.tanh %23 : vector<2x8x32xf32>
    %25 = vector.shape_cast %5 : vector<32xf32> to vector<1x1x32xf32>
    %26 = vector.broadcast %25 : vector<1x1x32xf32> to vector<2x8x32xf32>
    %27 = arith.mulf %24, %26 : vector<2x8x32xf32>
    %cst_31 = arith.constant dense<0.000000e+00> : vector<2x8xf32>
    %28 = vector.multi_reduction <add>, %27, %cst_31 [2] : vector<2x8x32xf32> to vector<2x8xf32>
    %29 = arith.addf %28, %2 : vector<2x8xf32>
    %cst_32 = arith.constant dense<0xFF800000> : vector<2xf32>
    %30 = vector.multi_reduction <maximumf>, %29, %cst_32 [1] : vector<2x8xf32> to vector<2xf32>
    %31 = vector.shape_cast %30 : vector<2xf32> to vector<2x1xf32>
    %32 = vector.broadcast %31 : vector<2x1xf32> to vector<2x8xf32>
    %33 = arith.subf %29, %32 : vector<2x8xf32>
    %34 = math.exp %33 : vector<2x8xf32>
    %cst_33 = arith.constant dense<0.000000e+00> : vector<2xf32>
    %35 = vector.multi_reduction <add>, %34, %cst_33 [1] : vector<2x8xf32> to vector<2xf32>
    %36 = vector.shape_cast %35 : vector<2xf32> to vector<2x1xf32>
    %37 = vector.broadcast %36 : vector<2x1xf32> to vector<2x8xf32>
    %38 = arith.divf %34, %37 : vector<2x8xf32>
    %39 = vector.shape_cast %38 : vector<2x8xf32> to vector<2x8x1xf32>
    %40 = vector.broadcast %39 : vector<2x8x1xf32> to vector<2x8x64xf32>
    %41 = arith.mulf %40, %0 : vector<2x8x64xf32>
    %cst_34 = arith.constant dense<0.000000e+00> : vector<2x64xf32>
    %42 = vector.multi_reduction <add>, %41, %cst_34 [1] : vector<2x8x64xf32> to vector<2x64xf32>
    %cst_35 = arith.constant dense<0.000000e+00> : vector<2x96xf32>
    %43 = tpu.matmul %19, %6, %cst_35 {dimension_numbers = #tpu.dot_dimension_numbers<[1], [0], [0], [1], [0, 0, 1, 1], [], []>} : vector<2x16xf32>, vector<16x96xf32>, vector<2x96xf32> -> vector<2x96xf32>
    %cst_36 = arith.constant dense<0.000000e+00> : vector<2x96xf32>
    %44 = tpu.matmul %42, %7, %cst_36 {dimension_numbers = #tpu.dot_dimension_numbers<[1], [0], [0], [1], [0, 0, 1, 1], [], []>} : vector<2x64xf32>, vector<64x96xf32>, vector<2x96xf32> -> vector<2x96xf32>
    %45 = arith.addf %43, %44 : vector<2x96xf32>
    %46 = vector.shape_cast %10 : vector<96xf32> to vector<1x96xf32>
    %47 = vector.broadcast %46 : vector<1x96xf32> to vector<2x96xf32>
    %48 = arith.addf %45, %47 : vector<2x96xf32>
    %cst_37 = arith.constant dense<0.000000e+00> : vector<2x96xf32>
    %49 = tpu.matmul %16, %8, %cst_37 {dimension_numbers = #tpu.dot_dimension_numbers<[1], [0], [0], [1], [0, 0, 1, 1], [], []>} : vector<2x32xf32>, vector<32x96xf32>, vector<2x96xf32> -> vector<2x96xf32>
    %50 = vector.shape_cast %12 : vector<96xf32> to vector<1x96xf32>
    %51 = vector.broadcast %50 : vector<1x96xf32> to vector<2x96xf32>
    %52 = arith.addf %49, %51 : vector<2x96xf32>
    %53 = vector.extract_strided_slice %48 {offsets = [0, 0], sizes = [2, 32], strides = [1, 1]} : vector<2x96xf32> to vector<2x32xf32>
    %54 = vector.extract_strided_slice %52 {offsets = [0, 0], sizes = [2, 32], strides = [1, 1]} : vector<2x96xf32> to vector<2x32xf32>
    %55 = arith.addf %53, %54 : vector<2x32xf32>
    %56 = arith.negf %55 : vector<2x32xf32>
    %57 = math.exp %56 : vector<2x32xf32>
    %cst_38 = arith.constant 1.000000e+00 : f32
    %58 = vector.broadcast %cst_38 : f32 to vector<2x32xf32>
    %59 = arith.addf %58, %57 : vector<2x32xf32>
    %60 = arith.divf %58, %59 : vector<2x32xf32>
    %61 = vector.extract_strided_slice %48 {offsets = [0, 32], sizes = [2, 32], strides = [1, 1]} : vector<2x96xf32> to vector<2x32xf32>
    %62 = vector.extract_strided_slice %52 {offsets = [0, 32], sizes = [2, 32], strides = [1, 1]} : vector<2x96xf32> to vector<2x32xf32>
    %63 = arith.addf %61, %62 : vector<2x32xf32>
    %64 = arith.negf %63 : vector<2x32xf32>
    %65 = math.exp %64 : vector<2x32xf32>
    %cst_39 = arith.constant 1.000000e+00 : f32
    %66 = vector.broadcast %cst_39 : f32 to vector<2x32xf32>
    %67 = arith.addf %66, %65 : vector<2x32xf32>
    %68 = arith.divf %66, %67 : vector<2x32xf32>
    %69 = vector.extract_strided_slice %48 {offsets = [0, 64], sizes = [2, 32], strides = [1, 1]} : vector<2x96xf32> to vector<2x32xf32>
    %70 = vector.extract_strided_slice %52 {offsets = [0, 64], sizes = [2, 32], strides = [1, 1]} : vector<2x96xf32> to vector<2x32xf32>
    %71 = arith.mulf %60, %70 : vector<2x32xf32>
    %72 = arith.addf %69, %71 : vector<2x32xf32>
    %73 = math.tanh %72 : vector<2x32xf32>
    %cst_40 = arith.constant 1.000000e+00 : f32
    %74 = vector.broadcast %cst_40 : f32 to vector<2x32xf32>
    %75 = arith.subf %74, %68 : vector<2x32xf32>
    %76 = arith.mulf %75, %73 : vector<2x32xf32>
    %77 = arith.mulf %68, %16 : vector<2x32xf32>
    %78 = arith.addf %76, %77 : vector<2x32xf32>
    %cst_41 = arith.constant dense<0.000000e+00> : vector<2x32xf32>
    %79 = tpu.matmul %19, %13, %cst_41 {dimension_numbers = #tpu.dot_dimension_numbers<[1], [0], [0], [1], [0, 0, 1, 1], [], []>} : vector<2x16xf32>, vector<16x32xf32>, vector<2x32xf32> -> vector<2x32xf32>
    %cst_42 = arith.constant dense<0.000000e+00> : vector<2x32xf32>
    %80 = tpu.matmul %78, %14, %cst_42 {dimension_numbers = #tpu.dot_dimension_numbers<[1], [0], [0], [1], [0, 0, 1, 1], [], []>} : vector<2x32xf32>, vector<32x32xf32>, vector<2x32xf32> -> vector<2x32xf32>
    %81 = arith.addf %79, %80 : vector<2x32xf32>
    %cst_43 = arith.constant dense<0.000000e+00> : vector<2x32xf32>
    %82 = tpu.matmul %42, %15, %cst_43 {dimension_numbers = #tpu.dot_dimension_numbers<[1], [0], [0], [1], [0, 0, 1, 1], [], []>} : vector<2x64xf32>, vector<64x32xf32>, vector<2x32xf32> -> vector<2x32xf32>
    %83 = arith.addf %81, %82 : vector<2x32xf32>
    %84 = arith.index_cast %c0_i32 : i32 to index
    %c0_44 = arith.constant 0 : index
    %c0_45 = arith.constant 0 : index
    %85 = vector.load %arg15[%84, %c0_44, %c0_45] : memref<8x2x32xf32, #tpu.memory_space<vmem>>, vector<1x2x32xf32>
    %86 = vector.shape_cast %85 : vector<1x2x32xf32> to vector<2x32xf32>
    %87 = vector.shape_cast %78 : vector<2x32xf32> to vector<1x2x32xf32>
    tpu.vector_store %arg15[%84, %c0_44, %c0_45], %87 {strides = array<i32>} : memref<8x2x32xf32, #tpu.memory_space<vmem>>, vector<1x2x32xf32>,
    %88 = arith.index_cast %c0_i32 : i32 to index
    %c0_46 = arith.constant 0 : index
    %c0_47 = arith.constant 0 : index
    %89 = vector.load %arg16[%88, %c0_46, %c0_47] : memref<8x2x32xf32, #tpu.memory_space<vmem>>, vector<1x2x32xf32>
    %90 = vector.shape_cast %89 : vector<1x2x32xf32> to vector<2x32xf32>
    %91 = vector.shape_cast %83 : vector<2x32xf32> to vector<1x2x32xf32>
    tpu.vector_store %arg16[%88, %c0_46, %c0_47], %91 {strides = array<i32>} : memref<8x2x32xf32, #tpu.memory_space<vmem>>, vector<1x2x32xf32>,
    %c1_i32 = arith.constant 1 : i32
    %92 = arith.index_cast %c1_i32 : i32 to index
    %c0_48 = arith.constant 0 : index
    %c0_49 = arith.constant 0 : index
    %93 = vector.load %arg0[%92, %c0_48, %c0_49] : memref<8x2x16xf32, #tpu.memory_space<vmem>>, vector<1x2x16xf32>
    %94 = vector.shape_cast %93 : vector<1x2x16xf32> to vector<2x16xf32>
    %cst_50 = arith.constant dense<0.000000e+00> : vector<2x32xf32>
    %95 = tpu.matmul %78, %3, %cst_50 {dimension_numbers = #tpu.dot_dimension_numbers<[1], [0], [0], [1], [0, 0, 1, 1], [], []>} : vector<2x32xf32>, vector<32x32xf32>, vector<2x32xf32> -> vector<2x32xf32>
    %96 = vector.shape_cast %95 : vector<2x32xf32> to vector<2x1x32xf32>
    %97 = vector.broadcast %96 : vector<2x1x32xf32> to vector<2x8x32xf32>
    %98 = arith.addf %97, %1 : vector<2x8x32xf32>
    %99 = math.tanh %98 : vector<2x8x32xf32>
    %100 = vector.shape_cast %5 : vector<32xf32> to vector<1x1x32xf32>
    %101 = vector.broadcast %100 : vector<1x1x32xf32> to vector<2x8x32xf32>
    %102 = arith.mulf %99, %101 : vector<2x8x32xf32>
    %cst_51 = arith.constant dense<0.000000e+00> : vector<2x8xf32>
    %103 = vector.multi_reduction <add>, %102, %cst_51 [2] : vector<2x8x32xf32> to vector<2x8xf32>
    %104 = arith.addf %103, %2 : vector<2x8xf32>
    %cst_52 = arith.constant dense<0xFF800000> : vector<2xf32>
    %105 = vector.multi_reduction <maximumf>, %104, %cst_52 [1] : vector<2x8xf32> to vector<2xf32>
    %106 = vector.shape_cast %105 : vector<2xf32> to vector<2x1xf32>
    %107 = vector.broadcast %106 : vector<2x1xf32> to vector<2x8xf32>
    %108 = arith.subf %104, %107 : vector<2x8xf32>
    %109 = math.exp %108 : vector<2x8xf32>
    %cst_53 = arith.constant dense<0.000000e+00> : vector<2xf32>
    %110 = vector.multi_reduction <add>, %109, %cst_53 [1] : vector<2x8xf32> to vector<2xf32>
    %111 = vector.shape_cast %110 : vector<2xf32> to vector<2x1xf32>
    %112 = vector.broadcast %111 : vector<2x1xf32> to vector<2x8xf32>
    %113 = arith.divf %109, %112 : vector<2x8xf32>
    %114 = vector.shape_cast %113 : vector<2x8xf32> to vector<2x8x1xf32>
    %115 = vector.broadcast %114 : vector<2x8x1xf32> to vector<2x8x64xf32>
    %116 = arith.mulf %115, %0 : vector<2x8x64xf32>
    %cst_54 = arith.constant dense<0.000000e+00> : vector<2x64xf32>
    %117 = vector.multi_reduction <add>, %116, %cst_54 [1] : vector<2x8x64xf32> to vector<2x64xf32>
    %cst_55 = arith.constant dense<0.000000e+00> : vector<2x96xf32>
    %118 = tpu.matmul %94, %6, %cst_55 {dimension_numbers = #tpu.dot_dimension_numbers<[1], [0], [0], [1], [0, 0, 1, 1], [], []>} : vector<2x16xf32>, vector<16x96xf32>, vector<2x96xf32> -> vector<2x96xf32>
    %cst_56 = arith.constant dense<0.000000e+00> : vector<2x96xf32>
    %119 = tpu.matmul %117, %7, %cst_56 {dimension_numbers = #tpu.dot_dimension_numbers<[1], [0], [0], [1], [0, 0, 1, 1], [], []>} : vector<2x64xf32>, vector<64x96xf32>, vector<2x96xf32> -> vector<2x96xf32>
    %120 = arith.addf %118, %119 : vector<2x96xf32>
    %121 = vector.shape_cast %10 : vector<96xf32> to vector<1x96xf32>
    %122 = vector.broadcast %121 : vector<1x96xf32> to vector<2x96xf32>
    %123 = arith.addf %120, %122 : vector<2x96xf32>
    %cst_57 = arith.constant dense<0.000000e+00> : vector<2x96xf32>
    %124 = tpu.matmul %78, %8, %cst_57 {dimension_numbers = #tpu.dot_dimension_numbers<[1], [0], [0], [1], [0, 0, 1, 1], [], []>} : vector<2x32xf32>, vector<32x96xf32>, vector<2x96xf32> -> vector<2x96xf32>
    %125 = vector.shape_cast %12 : vector<96xf32> to vector<1x96xf32>
    %126 = vector.broadcast %125 : vector<1x96xf32> to vector<2x96xf32>
    %127 = arith.addf %124, %126 : vector<2x96xf32>
    %128 = vector.extract_strided_slice %123 {offsets = [0, 0], sizes = [2, 32], strides = [1, 1]} : vector<2x96xf32> to vector<2x32xf32>
    %129 = vector.extract_strided_slice %127 {offsets = [0, 0], sizes = [2, 32], strides = [1, 1]} : vector<2x96xf32> to vector<2x32xf32>
    %130 = arith.addf %128, %129 : vector<2x32xf32>
    %131 = arith.negf %130 : vector<2x32xf32>
    %132 = math.exp %131 : vector<2x32xf32>
    %cst_58 = arith.constant 1.000000e+00 : f32
    %133 = vector.broadcast %cst_58 : f32 to vector<2x32xf32>
    %134 = arith.addf %133, %132 : vector<2x32xf32>
    %135 = arith.divf %133, %134 : vector<2x32xf32>
    %136 = vector.extract_strided_slice %123 {offsets = [0, 32], sizes = [2, 32], strides = [1, 1]} : vector<2x96xf32> to vector<2x32xf32>
    %137 = vector.extract_strided_slice %127 {offsets = [0, 32], sizes = [2, 32], strides = [1, 1]} : vector<2x96xf32> to vector<2x32xf32>
    %138 = arith.addf %136, %137 : vector<2x32xf32>
    %139 = arith.negf %138 : vector<2x32xf32>
    %140 = math.exp %139 : vector<2x32xf32>
    %cst_59 = arith.constant 1.000000e+00 : f32
    %141 = vector.broadcast %cst_59 : f32 to vector<2x32xf32>
    %142 = arith.addf %141, %140 : vector<2x32xf32>
    %143 = arith.divf %141, %142 : vector<2x32xf32>
    %144 = vector.extract_strided_slice %123 {offsets = [0, 64], sizes = [2, 32], strides = [1, 1]} : vector<2x96xf32> to vector<2x32xf32>
    %145 = vector.extract_strided_slice %127 {offsets = [0, 64], sizes = [2, 32], strides = [1, 1]} : vector<2x96xf32> to vector<2x32xf32>
    %146 = arith.mulf %135, %145 : vector<2x32xf32>
    %147 = arith.addf %144, %146 : vector<2x32xf32>
    %148 = math.tanh %147 : vector<2x32xf32>
    %cst_60 = arith.constant 1.000000e+00 : f32
    %149 = vector.broadcast %cst_60 : f32 to vector<2x32xf32>
    %150 = arith.subf %149, %143 : vector<2x32xf32>
    %151 = arith.mulf %150, %148 : vector<2x32xf32>
    %152 = arith.mulf %143, %78 : vector<2x32xf32>
    %153 = arith.addf %151, %152 : vector<2x32xf32>
    %cst_61 = arith.constant dense<0.000000e+00> : vector<2x32xf32>
    %154 = tpu.matmul %94, %13, %cst_61 {dimension_numbers = #tpu.dot_dimension_numbers<[1], [0], [0], [1], [0, 0, 1, 1], [], []>} : vector<2x16xf32>, vector<16x32xf32>, vector<2x32xf32> -> vector<2x32xf32>
    %cst_62 = arith.constant dense<0.000000e+00> : vector<2x32xf32>
    %155 = tpu.matmul %153, %14, %cst_62 {dimension_numbers = #tpu.dot_dimension_numbers<[1], [0], [0], [1], [0, 0, 1, 1], [], []>} : vector<2x32xf32>, vector<32x32xf32>, vector<2x32xf32> -> vector<2x32xf32>
    %156 = arith.addf %154, %155 : vector<2x32xf32>
    %cst_63 = arith.constant dense<0.000000e+00> : vector<2x32xf32>
    %157 = tpu.matmul %117, %15, %cst_63 {dimension_numbers = #tpu.dot_dimension_numbers<[1], [0], [0], [1], [0, 0, 1, 1], [], []>} : vector<2x64xf32>, vector<64x32xf32>, vector<2x32xf32> -> vector<2x32xf32>
    %158 = arith.addf %156, %157 : vector<2x32xf32>
    %159 = arith.index_cast %c1_i32 : i32 to index
    %c0_64 = arith.constant 0 : index
    %c0_65 = arith.constant 0 : index
    %160 = vector.load %arg15[%159, %c0_64, %c0_65] : memref<8x2x32xf32, #tpu.memory_space<vmem>>, vector<1x2x32xf32>
    %161 = vector.shape_cast %160 : vector<1x2x32xf32> to vector<2x32xf32>
    %162 = vector.shape_cast %153 : vector<2x32xf32> to vector<1x2x32xf32>
    tpu.vector_store %arg15[%159, %c0_64, %c0_65], %162 {strides = array<i32>} : memref<8x2x32xf32, #tpu.memory_space<vmem>>, vector<1x2x32xf32>,
    %163 = arith.index_cast %c1_i32 : i32 to index
    %c0_66 = arith.constant 0 : index
    %c0_67 = arith.constant 0 : index
    %164 = vector.load %arg16[%163, %c0_66, %c0_67] : memref<8x2x32xf32, #tpu.memory_space<vmem>>, vector<1x2x32xf32>
    %165 = vector.shape_cast %164 : vector<1x2x32xf32> to vector<2x32xf32>
    %166 = vector.shape_cast %158 : vector<2x32xf32> to vector<1x2x32xf32>
    tpu.vector_store %arg16[%163, %c0_66, %c0_67], %166 {strides = array<i32>} : memref<8x2x32xf32, #tpu.memory_space<vmem>>, vector<1x2x32xf32>,
    %c2_i32 = arith.constant 2 : i32
    %167 = arith.index_cast %c2_i32 : i32 to index
    %c0_68 = arith.constant 0 : index
    %c0_69 = arith.constant 0 : index
    %168 = vector.load %arg0[%167, %c0_68, %c0_69] : memref<8x2x16xf32, #tpu.memory_space<vmem>>, vector<1x2x16xf32>
    %169 = vector.shape_cast %168 : vector<1x2x16xf32> to vector<2x16xf32>
    %cst_70 = arith.constant dense<0.000000e+00> : vector<2x32xf32>
    %170 = tpu.matmul %153, %3, %cst_70 {dimension_numbers = #tpu.dot_dimension_numbers<[1], [0], [0], [1], [0, 0, 1, 1], [], []>} : vector<2x32xf32>, vector<32x32xf32>, vector<2x32xf32> -> vector<2x32xf32>
    %171 = vector.shape_cast %170 : vector<2x32xf32> to vector<2x1x32xf32>
    %172 = vector.broadcast %171 : vector<2x1x32xf32> to vector<2x8x32xf32>
    %173 = arith.addf %172, %1 : vector<2x8x32xf32>
    %174 = math.tanh %173 : vector<2x8x32xf32>
    %175 = vector.shape_cast %5 : vector<32xf32> to vector<1x1x32xf32>
    %176 = vector.broadcast %175 : vector<1x1x32xf32> to vector<2x8x32xf32>
    %177 = arith.mulf %174, %176 : vector<2x8x32xf32>
    %cst_71 = arith.constant dense<0.000000e+00> : vector<2x8xf32>
    %178 = vector.multi_reduction <add>, %177, %cst_71 [2] : vector<2x8x32xf32> to vector<2x8xf32>
    %179 = arith.addf %178, %2 : vector<2x8xf32>
    %cst_72 = arith.constant dense<0xFF800000> : vector<2xf32>
    %180 = vector.multi_reduction <maximumf>, %179, %cst_72 [1] : vector<2x8xf32> to vector<2xf32>
    %181 = vector.shape_cast %180 : vector<2xf32> to vector<2x1xf32>
    %182 = vector.broadcast %181 : vector<2x1xf32> to vector<2x8xf32>
    %183 = arith.subf %179, %182 : vector<2x8xf32>
    %184 = math.exp %183 : vector<2x8xf32>
    %cst_73 = arith.constant dense<0.000000e+00> : vector<2xf32>
    %185 = vector.multi_reduction <add>, %184, %cst_73 [1] : vector<2x8xf32> to vector<2xf32>
    %186 = vector.shape_cast %185 : vector<2xf32> to vector<2x1xf32>
    %187 = vector.broadcast %186 : vector<2x1xf32> to vector<2x8xf32>
    %188 = arith.divf %184, %187 : vector<2x8xf32>
    %189 = vector.shape_cast %188 : vector<2x8xf32> to vector<2x8x1xf32>
    %190 = vector.broadcast %189 : vector<2x8x1xf32> to vector<2x8x64xf32>
    %191 = arith.mulf %190, %0 : vector<2x8x64xf32>
    %cst_74 = arith.constant dense<0.000000e+00> : vector<2x64xf32>
    %192 = vector.multi_reduction <add>, %191, %cst_74 [1] : vector<2x8x64xf32> to vector<2x64xf32>
    %cst_75 = arith.constant dense<0.000000e+00> : vector<2x96xf32>
    %193 = tpu.matmul %169, %6, %cst_75 {dimension_numbers = #tpu.dot_dimension_numbers<[1], [0], [0], [1], [0, 0, 1, 1], [], []>} : vector<2x16xf32>, vector<16x96xf32>, vector<2x96xf32> -> vector<2x96xf32>
    %cst_76 = arith.constant dense<0.000000e+00> : vector<2x96xf32>
    %194 = tpu.matmul %192, %7, %cst_76 {dimension_numbers = #tpu.dot_dimension_numbers<[1], [0], [0], [1], [0, 0, 1, 1], [], []>} : vector<2x64xf32>, vector<64x96xf32>, vector<2x96xf32> -> vector<2x96xf32>
    %195 = arith.addf %193, %194 : vector<2x96xf32>
    %196 = vector.shape_cast %10 : vector<96xf32> to vector<1x96xf32>
    %197 = vector.broadcast %196 : vector<1x96xf32> to vector<2x96xf32>
    %198 = arith.addf %195, %197 : vector<2x96xf32>
    %cst_77 = arith.constant dense<0.000000e+00> : vector<2x96xf32>
    %199 = tpu.matmul %153, %8, %cst_77 {dimension_numbers = #tpu.dot_dimension_numbers<[1], [0], [0], [1], [0, 0, 1, 1], [], []>} : vector<2x32xf32>, vector<32x96xf32>, vector<2x96xf32> -> vector<2x96xf32>
    %200 = vector.shape_cast %12 : vector<96xf32> to vector<1x96xf32>
    %201 = vector.broadcast %200 : vector<1x96xf32> to vector<2x96xf32>
    %202 = arith.addf %199, %201 : vector<2x96xf32>
    %203 = vector.extract_strided_slice %198 {offsets = [0, 0], sizes = [2, 32], strides = [1, 1]} : vector<2x96xf32> to vector<2x32xf32>
    %204 = vector.extract_strided_slice %202 {offsets = [0, 0], sizes = [2, 32], strides = [1, 1]} : vector<2x96xf32> to vector<2x32xf32>
    %205 = arith.addf %203, %204 : vector<2x32xf32>
    %206 = arith.negf %205 : vector<2x32xf32>
    %207 = math.exp %206 : vector<2x32xf32>
    %cst_78 = arith.constant 1.000000e+00 : f32
    %208 = vector.broadcast %cst_78 : f32 to vector<2x32xf32>
    %209 = arith.addf %208, %207 : vector<2x32xf32>
    %210 = arith.divf %208, %209 : vector<2x32xf32>
    %211 = vector.extract_strided_slice %198 {offsets = [0, 32], sizes = [2, 32], strides = [1, 1]} : vector<2x96xf32> to vector<2x32xf32>
    %212 = vector.extract_strided_slice %202 {offsets = [0, 32], sizes = [2, 32], strides = [1, 1]} : vector<2x96xf32> to vector<2x32xf32>
    %213 = arith.addf %211, %212 : vector<2x32xf32>
    %214 = arith.negf %213 : vector<2x32xf32>
    %215 = math.exp %214 : vector<2x32xf32>
    %cst_79 = arith.constant 1.000000e+00 : f32
    %216 = vector.broadcast %cst_79 : f32 to vector<2x32xf32>
    %217 = arith.addf %216, %215 : vector<2x32xf32>
    %218 = arith.divf %216, %217 : vector<2x32xf32>
    %219 = vector.extract_strided_slice %198 {offsets = [0, 64], sizes = [2, 32], strides = [1, 1]} : vector<2x96xf32> to vector<2x32xf32>
    %220 = vector.extract_strided_slice %202 {offsets = [0, 64], sizes = [2, 32], strides = [1, 1]} : vector<2x96xf32> to vector<2x32xf32>
    %221 = arith.mulf %210, %220 : vector<2x32xf32>
    %222 = arith.addf %219, %221 : vector<2x32xf32>
    %223 = math.tanh %222 : vector<2x32xf32>
    %cst_80 = arith.constant 1.000000e+00 : f32
    %224 = vector.broadcast %cst_80 : f32 to vector<2x32xf32>
    %225 = arith.subf %224, %218 : vector<2x32xf32>
    %226 = arith.mulf %225, %223 : vector<2x32xf32>
    %227 = arith.mulf %218, %153 : vector<2x32xf32>
    %228 = arith.addf %226, %227 : vector<2x32xf32>
    %cst_81 = arith.constant dense<0.000000e+00> : vector<2x32xf32>
    %229 = tpu.matmul %169, %13, %cst_81 {dimension_numbers = #tpu.dot_dimension_numbers<[1], [0], [0], [1], [0, 0, 1, 1], [], []>} : vector<2x16xf32>, vector<16x32xf32>, vector<2x32xf32> -> vector<2x32xf32>
    %cst_82 = arith.constant dense<0.000000e+00> : vector<2x32xf32>
    %230 = tpu.matmul %228, %14, %cst_82 {dimension_numbers = #tpu.dot_dimension_numbers<[1], [0], [0], [1], [0, 0, 1, 1], [], []>} : vector<2x32xf32>, vector<32x32xf32>, vector<2x32xf32> -> vector<2x32xf32>
    %231 = arith.addf %229, %230 : vector<2x32xf32>
    %cst_83 = arith.constant dense<0.000000e+00> : vector<2x32xf32>
    %232 = tpu.matmul %192, %15, %cst_83 {dimension_numbers = #tpu.dot_dimension_numbers<[1], [0], [0], [1], [0, 0, 1, 1], [], []>} : vector<2x64xf32>, vector<64x32xf32>, vector<2x32xf32> -> vector<2x32xf32>
    %233 = arith.addf %231, %232 : vector<2x32xf32>
    %234 = arith.index_cast %c2_i32 : i32 to index
    %c0_84 = arith.constant 0 : index
    %c0_85 = arith.constant 0 : index
    %235 = vector.load %arg15[%234, %c0_84, %c0_85] : memref<8x2x32xf32, #tpu.memory_space<vmem>>, vector<1x2x32xf32>
    %236 = vector.shape_cast %235 : vector<1x2x32xf32> to vector<2x32xf32>
    %237 = vector.shape_cast %228 : vector<2x32xf32> to vector<1x2x32xf32>
    tpu.vector_store %arg15[%234, %c0_84, %c0_85], %237 {strides = array<i32>} : memref<8x2x32xf32, #tpu.memory_space<vmem>>, vector<1x2x32xf32>,
    %238 = arith.index_cast %c2_i32 : i32 to index
    %c0_86 = arith.constant 0 : index
    %c0_87 = arith.constant 0 : index
    %239 = vector.load %arg16[%238, %c0_86, %c0_87] : memref<8x2x32xf32, #tpu.memory_space<vmem>>, vector<1x2x32xf32>
    %240 = vector.shape_cast %239 : vector<1x2x32xf32> to vector<2x32xf32>
    %241 = vector.shape_cast %233 : vector<2x32xf32> to vector<1x2x32xf32>
    tpu.vector_store %arg16[%238, %c0_86, %c0_87], %241 {strides = array<i32>} : memref<8x2x32xf32, #tpu.memory_space<vmem>>, vector<1x2x32xf32>,
    %c3_i32 = arith.constant 3 : i32
    %242 = arith.index_cast %c3_i32 : i32 to index
    %c0_88 = arith.constant 0 : index
    %c0_89 = arith.constant 0 : index
    %243 = vector.load %arg0[%242, %c0_88, %c0_89] : memref<8x2x16xf32, #tpu.memory_space<vmem>>, vector<1x2x16xf32>
    %244 = vector.shape_cast %243 : vector<1x2x16xf32> to vector<2x16xf32>
    %cst_90 = arith.constant dense<0.000000e+00> : vector<2x32xf32>
    %245 = tpu.matmul %228, %3, %cst_90 {dimension_numbers = #tpu.dot_dimension_numbers<[1], [0], [0], [1], [0, 0, 1, 1], [], []>} : vector<2x32xf32>, vector<32x32xf32>, vector<2x32xf32> -> vector<2x32xf32>
    %246 = vector.shape_cast %245 : vector<2x32xf32> to vector<2x1x32xf32>
    %247 = vector.broadcast %246 : vector<2x1x32xf32> to vector<2x8x32xf32>
    %248 = arith.addf %247, %1 : vector<2x8x32xf32>
    %249 = math.tanh %248 : vector<2x8x32xf32>
    %250 = vector.shape_cast %5 : vector<32xf32> to vector<1x1x32xf32>
    %251 = vector.broadcast %250 : vector<1x1x32xf32> to vector<2x8x32xf32>
    %252 = arith.mulf %249, %251 : vector<2x8x32xf32>
    %cst_91 = arith.constant dense<0.000000e+00> : vector<2x8xf32>
    %253 = vector.multi_reduction <add>, %252, %cst_91 [2] : vector<2x8x32xf32> to vector<2x8xf32>
    %254 = arith.addf %253, %2 : vector<2x8xf32>
    %cst_92 = arith.constant dense<0xFF800000> : vector<2xf32>
    %255 = vector.multi_reduction <maximumf>, %254, %cst_92 [1] : vector<2x8xf32> to vector<2xf32>
    %256 = vector.shape_cast %255 : vector<2xf32> to vector<2x1xf32>
    %257 = vector.broadcast %256 : vector<2x1xf32> to vector<2x8xf32>
    %258 = arith.subf %254, %257 : vector<2x8xf32>
    %259 = math.exp %258 : vector<2x8xf32>
    %cst_93 = arith.constant dense<0.000000e+00> : vector<2xf32>
    %260 = vector.multi_reduction <add>, %259, %cst_93 [1] : vector<2x8xf32> to vector<2xf32>
    %261 = vector.shape_cast %260 : vector<2xf32> to vector<2x1xf32>
    %262 = vector.broadcast %261 : vector<2x1xf32> to vector<2x8xf32>
    %263 = arith.divf %259, %262 : vector<2x8xf32>
    %264 = vector.shape_cast %263 : vector<2x8xf32> to vector<2x8x1xf32>
    %265 = vector.broadcast %264 : vector<2x8x1xf32> to vector<2x8x64xf32>
    %266 = arith.mulf %265, %0 : vector<2x8x64xf32>
    %cst_94 = arith.constant dense<0.000000e+00> : vector<2x64xf32>
    %267 = vector.multi_reduction <add>, %266, %cst_94 [1] : vector<2x8x64xf32> to vector<2x64xf32>
    %cst_95 = arith.constant dense<0.000000e+00> : vector<2x96xf32>
    %268 = tpu.matmul %244, %6, %cst_95 {dimension_numbers = #tpu.dot_dimension_numbers<[1], [0], [0], [1], [0, 0, 1, 1], [], []>} : vector<2x16xf32>, vector<16x96xf32>, vector<2x96xf32> -> vector<2x96xf32>
    %cst_96 = arith.constant dense<0.000000e+00> : vector<2x96xf32>
    %269 = tpu.matmul %267, %7, %cst_96 {dimension_numbers = #tpu.dot_dimension_numbers<[1], [0], [0], [1], [0, 0, 1, 1], [], []>} : vector<2x64xf32>, vector<64x96xf32>, vector<2x96xf32> -> vector<2x96xf32>
    %270 = arith.addf %268, %269 : vector<2x96xf32>
    %271 = vector.shape_cast %10 : vector<96xf32> to vector<1x96xf32>
    %272 = vector.broadcast %271 : vector<1x96xf32> to vector<2x96xf32>
    %273 = arith.addf %270, %272 : vector<2x96xf32>
    %cst_97 = arith.constant dense<0.000000e+00> : vector<2x96xf32>
    %274 = tpu.matmul %228, %8, %cst_97 {dimension_numbers = #tpu.dot_dimension_numbers<[1], [0], [0], [1], [0, 0, 1, 1], [], []>} : vector<2x32xf32>, vector<32x96xf32>, vector<2x96xf32> -> vector<2x96xf32>
    %275 = vector.shape_cast %12 : vector<96xf32> to vector<1x96xf32>
    %276 = vector.broadcast %275 : vector<1x96xf32> to vector<2x96xf32>
    %277 = arith.addf %274, %276 : vector<2x96xf32>
    %278 = vector.extract_strided_slice %273 {offsets = [0, 0], sizes = [2, 32], strides = [1, 1]} : vector<2x96xf32> to vector<2x32xf32>
    %279 = vector.extract_strided_slice %277 {offsets = [0, 0], sizes = [2, 32], strides = [1, 1]} : vector<2x96xf32> to vector<2x32xf32>
    %280 = arith.addf %278, %279 : vector<2x32xf32>
    %281 = arith.negf %280 : vector<2x32xf32>
    %282 = math.exp %281 : vector<2x32xf32>
    %cst_98 = arith.constant 1.000000e+00 : f32
    %283 = vector.broadcast %cst_98 : f32 to vector<2x32xf32>
    %284 = arith.addf %283, %282 : vector<2x32xf32>
    %285 = arith.divf %283, %284 : vector<2x32xf32>
    %286 = vector.extract_strided_slice %273 {offsets = [0, 32], sizes = [2, 32], strides = [1, 1]} : vector<2x96xf32> to vector<2x32xf32>
    %287 = vector.extract_strided_slice %277 {offsets = [0, 32], sizes = [2, 32], strides = [1, 1]} : vector<2x96xf32> to vector<2x32xf32>
    %288 = arith.addf %286, %287 : vector<2x32xf32>
    %289 = arith.negf %288 : vector<2x32xf32>
    %290 = math.exp %289 : vector<2x32xf32>
    %cst_99 = arith.constant 1.000000e+00 : f32
    %291 = vector.broadcast %cst_99 : f32 to vector<2x32xf32>
    %292 = arith.addf %291, %290 : vector<2x32xf32>
    %293 = arith.divf %291, %292 : vector<2x32xf32>
    %294 = vector.extract_strided_slice %273 {offsets = [0, 64], sizes = [2, 32], strides = [1, 1]} : vector<2x96xf32> to vector<2x32xf32>
    %295 = vector.extract_strided_slice %277 {offsets = [0, 64], sizes = [2, 32], strides = [1, 1]} : vector<2x96xf32> to vector<2x32xf32>
    %296 = arith.mulf %285, %295 : vector<2x32xf32>
    %297 = arith.addf %294, %296 : vector<2x32xf32>
    %298 = math.tanh %297 : vector<2x32xf32>
    %cst_100 = arith.constant 1.000000e+00 : f32
    %299 = vector.broadcast %cst_100 : f32 to vector<2x32xf32>
    %300 = arith.subf %299, %293 : vector<2x32xf32>
    %301 = arith.mulf %300, %298 : vector<2x32xf32>
    %302 = arith.mulf %293, %228 : vector<2x32xf32>
    %303 = arith.addf %301, %302 : vector<2x32xf32>
    %cst_101 = arith.constant dense<0.000000e+00> : vector<2x32xf32>
    %304 = tpu.matmul %244, %13, %cst_101 {dimension_numbers = #tpu.dot_dimension_numbers<[1], [0], [0], [1], [0, 0, 1, 1], [], []>} : vector<2x16xf32>, vector<16x32xf32>, vector<2x32xf32> -> vector<2x32xf32>
    %cst_102 = arith.constant dense<0.000000e+00> : vector<2x32xf32>
    %305 = tpu.matmul %303, %14, %cst_102 {dimension_numbers = #tpu.dot_dimension_numbers<[1], [0], [0], [1], [0, 0, 1, 1], [], []>} : vector<2x32xf32>, vector<32x32xf32>, vector<2x32xf32> -> vector<2x32xf32>
    %306 = arith.addf %304, %305 : vector<2x32xf32>
    %cst_103 = arith.constant dense<0.000000e+00> : vector<2x32xf32>
    %307 = tpu.matmul %267, %15, %cst_103 {dimension_numbers = #tpu.dot_dimension_numbers<[1], [0], [0], [1], [0, 0, 1, 1], [], []>} : vector<2x64xf32>, vector<64x32xf32>, vector<2x32xf32> -> vector<2x32xf32>
    %308 = arith.addf %306, %307 : vector<2x32xf32>
    %309 = arith.index_cast %c3_i32 : i32 to index
    %c0_104 = arith.constant 0 : index
    %c0_105 = arith.constant 0 : index
    %310 = vector.load %arg15[%309, %c0_104, %c0_105] : memref<8x2x32xf32, #tpu.memory_space<vmem>>, vector<1x2x32xf32>
    %311 = vector.shape_cast %310 : vector<1x2x32xf32> to vector<2x32xf32>
    %312 = vector.shape_cast %303 : vector<2x32xf32> to vector<1x2x32xf32>
    tpu.vector_store %arg15[%309, %c0_104, %c0_105], %312 {strides = array<i32>} : memref<8x2x32xf32, #tpu.memory_space<vmem>>, vector<1x2x32xf32>,
    %313 = arith.index_cast %c3_i32 : i32 to index
    %c0_106 = arith.constant 0 : index
    %c0_107 = arith.constant 0 : index
    %314 = vector.load %arg16[%313, %c0_106, %c0_107] : memref<8x2x32xf32, #tpu.memory_space<vmem>>, vector<1x2x32xf32>
    %315 = vector.shape_cast %314 : vector<1x2x32xf32> to vector<2x32xf32>
    %316 = vector.shape_cast %308 : vector<2x32xf32> to vector<1x2x32xf32>
    tpu.vector_store %arg16[%313, %c0_106, %c0_107], %316 {strides = array<i32>} : memref<8x2x32xf32, #tpu.memory_space<vmem>>, vector<1x2x32xf32>,
    %c4_i32 = arith.constant 4 : i32
    %317 = arith.index_cast %c4_i32 : i32 to index
    %c0_108 = arith.constant 0 : index
    %c0_109 = arith.constant 0 : index
    %318 = vector.load %arg0[%317, %c0_108, %c0_109] : memref<8x2x16xf32, #tpu.memory_space<vmem>>, vector<1x2x16xf32>
    %319 = vector.shape_cast %318 : vector<1x2x16xf32> to vector<2x16xf32>
    %cst_110 = arith.constant dense<0.000000e+00> : vector<2x32xf32>
    %320 = tpu.matmul %303, %3, %cst_110 {dimension_numbers = #tpu.dot_dimension_numbers<[1], [0], [0], [1], [0, 0, 1, 1], [], []>} : vector<2x32xf32>, vector<32x32xf32>, vector<2x32xf32> -> vector<2x32xf32>
    %321 = vector.shape_cast %320 : vector<2x32xf32> to vector<2x1x32xf32>
    %322 = vector.broadcast %321 : vector<2x1x32xf32> to vector<2x8x32xf32>
    %323 = arith.addf %322, %1 : vector<2x8x32xf32>
    %324 = math.tanh %323 : vector<2x8x32xf32>
    %325 = vector.shape_cast %5 : vector<32xf32> to vector<1x1x32xf32>
    %326 = vector.broadcast %325 : vector<1x1x32xf32> to vector<2x8x32xf32>
    %327 = arith.mulf %324, %326 : vector<2x8x32xf32>
    %cst_111 = arith.constant dense<0.000000e+00> : vector<2x8xf32>
    %328 = vector.multi_reduction <add>, %327, %cst_111 [2] : vector<2x8x32xf32> to vector<2x8xf32>
    %329 = arith.addf %328, %2 : vector<2x8xf32>
    %cst_112 = arith.constant dense<0xFF800000> : vector<2xf32>
    %330 = vector.multi_reduction <maximumf>, %329, %cst_112 [1] : vector<2x8xf32> to vector<2xf32>
    %331 = vector.shape_cast %330 : vector<2xf32> to vector<2x1xf32>
    %332 = vector.broadcast %331 : vector<2x1xf32> to vector<2x8xf32>
    %333 = arith.subf %329, %332 : vector<2x8xf32>
    %334 = math.exp %333 : vector<2x8xf32>
    %cst_113 = arith.constant dense<0.000000e+00> : vector<2xf32>
    %335 = vector.multi_reduction <add>, %334, %cst_113 [1] : vector<2x8xf32> to vector<2xf32>
    %336 = vector.shape_cast %335 : vector<2xf32> to vector<2x1xf32>
    %337 = vector.broadcast %336 : vector<2x1xf32> to vector<2x8xf32>
    %338 = arith.divf %334, %337 : vector<2x8xf32>
    %339 = vector.shape_cast %338 : vector<2x8xf32> to vector<2x8x1xf32>
    %340 = vector.broadcast %339 : vector<2x8x1xf32> to vector<2x8x64xf32>
    %341 = arith.mulf %340, %0 : vector<2x8x64xf32>
    %cst_114 = arith.constant dense<0.000000e+00> : vector<2x64xf32>
    %342 = vector.multi_reduction <add>, %341, %cst_114 [1] : vector<2x8x64xf32> to vector<2x64xf32>
    %cst_115 = arith.constant dense<0.000000e+00> : vector<2x96xf32>
    %343 = tpu.matmul %319, %6, %cst_115 {dimension_numbers = #tpu.dot_dimension_numbers<[1], [0], [0], [1], [0, 0, 1, 1], [], []>} : vector<2x16xf32>, vector<16x96xf32>, vector<2x96xf32> -> vector<2x96xf32>
    %cst_116 = arith.constant dense<0.000000e+00> : vector<2x96xf32>
    %344 = tpu.matmul %342, %7, %cst_116 {dimension_numbers = #tpu.dot_dimension_numbers<[1], [0], [0], [1], [0, 0, 1, 1], [], []>} : vector<2x64xf32>, vector<64x96xf32>, vector<2x96xf32> -> vector<2x96xf32>
    %345 = arith.addf %343, %344 : vector<2x96xf32>
    %346 = vector.shape_cast %10 : vector<96xf32> to vector<1x96xf32>
    %347 = vector.broadcast %346 : vector<1x96xf32> to vector<2x96xf32>
    %348 = arith.addf %345, %347 : vector<2x96xf32>
    %cst_117 = arith.constant dense<0.000000e+00> : vector<2x96xf32>
    %349 = tpu.matmul %303, %8, %cst_117 {dimension_numbers = #tpu.dot_dimension_numbers<[1], [0], [0], [1], [0, 0, 1, 1], [], []>} : vector<2x32xf32>, vector<32x96xf32>, vector<2x96xf32> -> vector<2x96xf32>
    %350 = vector.shape_cast %12 : vector<96xf32> to vector<1x96xf32>
    %351 = vector.broadcast %350 : vector<1x96xf32> to vector<2x96xf32>
    %352 = arith.addf %349, %351 : vector<2x96xf32>
    %353 = vector.extract_strided_slice %348 {offsets = [0, 0], sizes = [2, 32], strides = [1, 1]} : vector<2x96xf32> to vector<2x32xf32>
    %354 = vector.extract_strided_slice %352 {offsets = [0, 0], sizes = [2, 32], strides = [1, 1]} : vector<2x96xf32> to vector<2x32xf32>
    %355 = arith.addf %353, %354 : vector<2x32xf32>
    %356 = arith.negf %355 : vector<2x32xf32>
    %357 = math.exp %356 : vector<2x32xf32>
    %cst_118 = arith.constant 1.000000e+00 : f32
    %358 = vector.broadcast %cst_118 : f32 to vector<2x32xf32>
    %359 = arith.addf %358, %357 : vector<2x32xf32>
    %360 = arith.divf %358, %359 : vector<2x32xf32>
    %361 = vector.extract_strided_slice %348 {offsets = [0, 32], sizes = [2, 32], strides = [1, 1]} : vector<2x96xf32> to vector<2x32xf32>
    %362 = vector.extract_strided_slice %352 {offsets = [0, 32], sizes = [2, 32], strides = [1, 1]} : vector<2x96xf32> to vector<2x32xf32>
    %363 = arith.addf %361, %362 : vector<2x32xf32>
    %364 = arith.negf %363 : vector<2x32xf32>
    %365 = math.exp %364 : vector<2x32xf32>
    %cst_119 = arith.constant 1.000000e+00 : f32
    %366 = vector.broadcast %cst_119 : f32 to vector<2x32xf32>
    %367 = arith.addf %366, %365 : vector<2x32xf32>
    %368 = arith.divf %366, %367 : vector<2x32xf32>
    %369 = vector.extract_strided_slice %348 {offsets = [0, 64], sizes = [2, 32], strides = [1, 1]} : vector<2x96xf32> to vector<2x32xf32>
    %370 = vector.extract_strided_slice %352 {offsets = [0, 64], sizes = [2, 32], strides = [1, 1]} : vector<2x96xf32> to vector<2x32xf32>
    %371 = arith.mulf %360, %370 : vector<2x32xf32>
    %372 = arith.addf %369, %371 : vector<2x32xf32>
    %373 = math.tanh %372 : vector<2x32xf32>
    %cst_120 = arith.constant 1.000000e+00 : f32
    %374 = vector.broadcast %cst_120 : f32 to vector<2x32xf32>
    %375 = arith.subf %374, %368 : vector<2x32xf32>
    %376 = arith.mulf %375, %373 : vector<2x32xf32>
    %377 = arith.mulf %368, %303 : vector<2x32xf32>
    %378 = arith.addf %376, %377 : vector<2x32xf32>
    %cst_121 = arith.constant dense<0.000000e+00> : vector<2x32xf32>
    %379 = tpu.matmul %319, %13, %cst_121 {dimension_numbers = #tpu.dot_dimension_numbers<[1], [0], [0], [1], [0, 0, 1, 1], [], []>} : vector<2x16xf32>, vector<16x32xf32>, vector<2x32xf32> -> vector<2x32xf32>
    %cst_122 = arith.constant dense<0.000000e+00> : vector<2x32xf32>
    %380 = tpu.matmul %378, %14, %cst_122 {dimension_numbers = #tpu.dot_dimension_numbers<[1], [0], [0], [1], [0, 0, 1, 1], [], []>} : vector<2x32xf32>, vector<32x32xf32>, vector<2x32xf32> -> vector<2x32xf32>
    %381 = arith.addf %379, %380 : vector<2x32xf32>
    %cst_123 = arith.constant dense<0.000000e+00> : vector<2x32xf32>
    %382 = tpu.matmul %342, %15, %cst_123 {dimension_numbers = #tpu.dot_dimension_numbers<[1], [0], [0], [1], [0, 0, 1, 1], [], []>} : vector<2x64xf32>, vector<64x32xf32>, vector<2x32xf32> -> vector<2x32xf32>
    %383 = arith.addf %381, %382 : vector<2x32xf32>
    %384 = arith.index_cast %c4_i32 : i32 to index
    %c0_124 = arith.constant 0 : index
    %c0_125 = arith.constant 0 : index
    %385 = vector.load %arg15[%384, %c0_124, %c0_125] : memref<8x2x32xf32, #tpu.memory_space<vmem>>, vector<1x2x32xf32>
    %386 = vector.shape_cast %385 : vector<1x2x32xf32> to vector<2x32xf32>
    %387 = vector.shape_cast %378 : vector<2x32xf32> to vector<1x2x32xf32>
    tpu.vector_store %arg15[%384, %c0_124, %c0_125], %387 {strides = array<i32>} : memref<8x2x32xf32, #tpu.memory_space<vmem>>, vector<1x2x32xf32>,
    %388 = arith.index_cast %c4_i32 : i32 to index
    %c0_126 = arith.constant 0 : index
    %c0_127 = arith.constant 0 : index
    %389 = vector.load %arg16[%388, %c0_126, %c0_127] : memref<8x2x32xf32, #tpu.memory_space<vmem>>, vector<1x2x32xf32>
    %390 = vector.shape_cast %389 : vector<1x2x32xf32> to vector<2x32xf32>
    %391 = vector.shape_cast %383 : vector<2x32xf32> to vector<1x2x32xf32>
    tpu.vector_store %arg16[%388, %c0_126, %c0_127], %391 {strides = array<i32>} : memref<8x2x32xf32, #tpu.memory_space<vmem>>, vector<1x2x32xf32>,
    %c5_i32 = arith.constant 5 : i32
    %392 = arith.index_cast %c5_i32 : i32 to index
    %c0_128 = arith.constant 0 : index
    %c0_129 = arith.constant 0 : index
    %393 = vector.load %arg0[%392, %c0_128, %c0_129] : memref<8x2x16xf32, #tpu.memory_space<vmem>>, vector<1x2x16xf32>
    %394 = vector.shape_cast %393 : vector<1x2x16xf32> to vector<2x16xf32>
    %cst_130 = arith.constant dense<0.000000e+00> : vector<2x32xf32>
    %395 = tpu.matmul %378, %3, %cst_130 {dimension_numbers = #tpu.dot_dimension_numbers<[1], [0], [0], [1], [0, 0, 1, 1], [], []>} : vector<2x32xf32>, vector<32x32xf32>, vector<2x32xf32> -> vector<2x32xf32>
    %396 = vector.shape_cast %395 : vector<2x32xf32> to vector<2x1x32xf32>
    %397 = vector.broadcast %396 : vector<2x1x32xf32> to vector<2x8x32xf32>
    %398 = arith.addf %397, %1 : vector<2x8x32xf32>
    %399 = math.tanh %398 : vector<2x8x32xf32>
    %400 = vector.shape_cast %5 : vector<32xf32> to vector<1x1x32xf32>
    %401 = vector.broadcast %400 : vector<1x1x32xf32> to vector<2x8x32xf32>
    %402 = arith.mulf %399, %401 : vector<2x8x32xf32>
    %cst_131 = arith.constant dense<0.000000e+00> : vector<2x8xf32>
    %403 = vector.multi_reduction <add>, %402, %cst_131 [2] : vector<2x8x32xf32> to vector<2x8xf32>
    %404 = arith.addf %403, %2 : vector<2x8xf32>
    %cst_132 = arith.constant dense<0xFF800000> : vector<2xf32>
    %405 = vector.multi_reduction <maximumf>, %404, %cst_132 [1] : vector<2x8xf32> to vector<2xf32>
    %406 = vector.shape_cast %405 : vector<2xf32> to vector<2x1xf32>
    %407 = vector.broadcast %406 : vector<2x1xf32> to vector<2x8xf32>
    %408 = arith.subf %404, %407 : vector<2x8xf32>
    %409 = math.exp %408 : vector<2x8xf32>
    %cst_133 = arith.constant dense<0.000000e+00> : vector<2xf32>
    %410 = vector.multi_reduction <add>, %409, %cst_133 [1] : vector<2x8xf32> to vector<2xf32>
    %411 = vector.shape_cast %410 : vector<2xf32> to vector<2x1xf32>
    %412 = vector.broadcast %411 : vector<2x1xf32> to vector<2x8xf32>
    %413 = arith.divf %409, %412 : vector<2x8xf32>
    %414 = vector.shape_cast %413 : vector<2x8xf32> to vector<2x8x1xf32>
    %415 = vector.broadcast %414 : vector<2x8x1xf32> to vector<2x8x64xf32>
    %416 = arith.mulf %415, %0 : vector<2x8x64xf32>
    %cst_134 = arith.constant dense<0.000000e+00> : vector<2x64xf32>
    %417 = vector.multi_reduction <add>, %416, %cst_134 [1] : vector<2x8x64xf32> to vector<2x64xf32>
    %cst_135 = arith.constant dense<0.000000e+00> : vector<2x96xf32>
    %418 = tpu.matmul %394, %6, %cst_135 {dimension_numbers = #tpu.dot_dimension_numbers<[1], [0], [0], [1], [0, 0, 1, 1], [], []>} : vector<2x16xf32>, vector<16x96xf32>, vector<2x96xf32> -> vector<2x96xf32>
    %cst_136 = arith.constant dense<0.000000e+00> : vector<2x96xf32>
    %419 = tpu.matmul %417, %7, %cst_136 {dimension_numbers = #tpu.dot_dimension_numbers<[1], [0], [0], [1], [0, 0, 1, 1], [], []>} : vector<2x64xf32>, vector<64x96xf32>, vector<2x96xf32> -> vector<2x96xf32>
    %420 = arith.addf %418, %419 : vector<2x96xf32>
    %421 = vector.shape_cast %10 : vector<96xf32> to vector<1x96xf32>
    %422 = vector.broadcast %421 : vector<1x96xf32> to vector<2x96xf32>
    %423 = arith.addf %420, %422 : vector<2x96xf32>
    %cst_137 = arith.constant dense<0.000000e+00> : vector<2x96xf32>
    %424 = tpu.matmul %378, %8, %cst_137 {dimension_numbers = #tpu.dot_dimension_numbers<[1], [0], [0], [1], [0, 0, 1, 1], [], []>} : vector<2x32xf32>, vector<32x96xf32>, vector<2x96xf32> -> vector<2x96xf32>
    %425 = vector.shape_cast %12 : vector<96xf32> to vector<1x96xf32>
    %426 = vector.broadcast %425 : vector<1x96xf32> to vector<2x96xf32>
    %427 = arith.addf %424, %426 : vector<2x96xf32>
    %428 = vector.extract_strided_slice %423 {offsets = [0, 0], sizes = [2, 32], strides = [1, 1]} : vector<2x96xf32> to vector<2x32xf32>
    %429 = vector.extract_strided_slice %427 {offsets = [0, 0], sizes = [2, 32], strides = [1, 1]} : vector<2x96xf32> to vector<2x32xf32>
    %430 = arith.addf %428, %429 : vector<2x32xf32>
    %431 = arith.negf %430 : vector<2x32xf32>
    %432 = math.exp %431 : vector<2x32xf32>
    %cst_138 = arith.constant 1.000000e+00 : f32
    %433 = vector.broadcast %cst_138 : f32 to vector<2x32xf32>
    %434 = arith.addf %433, %432 : vector<2x32xf32>
    %435 = arith.divf %433, %434 : vector<2x32xf32>
    %436 = vector.extract_strided_slice %423 {offsets = [0, 32], sizes = [2, 32], strides = [1, 1]} : vector<2x96xf32> to vector<2x32xf32>
    %437 = vector.extract_strided_slice %427 {offsets = [0, 32], sizes = [2, 32], strides = [1, 1]} : vector<2x96xf32> to vector<2x32xf32>
    %438 = arith.addf %436, %437 : vector<2x32xf32>
    %439 = arith.negf %438 : vector<2x32xf32>
    %440 = math.exp %439 : vector<2x32xf32>
    %cst_139 = arith.constant 1.000000e+00 : f32
    %441 = vector.broadcast %cst_139 : f32 to vector<2x32xf32>
    %442 = arith.addf %441, %440 : vector<2x32xf32>
    %443 = arith.divf %441, %442 : vector<2x32xf32>
    %444 = vector.extract_strided_slice %423 {offsets = [0, 64], sizes = [2, 32], strides = [1, 1]} : vector<2x96xf32> to vector<2x32xf32>
    %445 = vector.extract_strided_slice %427 {offsets = [0, 64], sizes = [2, 32], strides = [1, 1]} : vector<2x96xf32> to vector<2x32xf32>
    %446 = arith.mulf %435, %445 : vector<2x32xf32>
    %447 = arith.addf %444, %446 : vector<2x32xf32>
    %448 = math.tanh %447 : vector<2x32xf32>
    %cst_140 = arith.constant 1.000000e+00 : f32
    %449 = vector.broadcast %cst_140 : f32 to vector<2x32xf32>
    %450 = arith.subf %449, %443 : vector<2x32xf32>
    %451 = arith.mulf %450, %448 : vector<2x32xf32>
    %452 = arith.mulf %443, %378 : vector<2x32xf32>
    %453 = arith.addf %451, %452 : vector<2x32xf32>
    %cst_141 = arith.constant dense<0.000000e+00> : vector<2x32xf32>
    %454 = tpu.matmul %394, %13, %cst_141 {dimension_numbers = #tpu.dot_dimension_numbers<[1], [0], [0], [1], [0, 0, 1, 1], [], []>} : vector<2x16xf32>, vector<16x32xf32>, vector<2x32xf32> -> vector<2x32xf32>
    %cst_142 = arith.constant dense<0.000000e+00> : vector<2x32xf32>
    %455 = tpu.matmul %453, %14, %cst_142 {dimension_numbers = #tpu.dot_dimension_numbers<[1], [0], [0], [1], [0, 0, 1, 1], [], []>} : vector<2x32xf32>, vector<32x32xf32>, vector<2x32xf32> -> vector<2x32xf32>
    %456 = arith.addf %454, %455 : vector<2x32xf32>
    %cst_143 = arith.constant dense<0.000000e+00> : vector<2x32xf32>
    %457 = tpu.matmul %417, %15, %cst_143 {dimension_numbers = #tpu.dot_dimension_numbers<[1], [0], [0], [1], [0, 0, 1, 1], [], []>} : vector<2x64xf32>, vector<64x32xf32>, vector<2x32xf32> -> vector<2x32xf32>
    %458 = arith.addf %456, %457 : vector<2x32xf32>
    %459 = arith.index_cast %c5_i32 : i32 to index
    %c0_144 = arith.constant 0 : index
    %c0_145 = arith.constant 0 : index
    %460 = vector.load %arg15[%459, %c0_144, %c0_145] : memref<8x2x32xf32, #tpu.memory_space<vmem>>, vector<1x2x32xf32>
    %461 = vector.shape_cast %460 : vector<1x2x32xf32> to vector<2x32xf32>
    %462 = vector.shape_cast %453 : vector<2x32xf32> to vector<1x2x32xf32>
    tpu.vector_store %arg15[%459, %c0_144, %c0_145], %462 {strides = array<i32>} : memref<8x2x32xf32, #tpu.memory_space<vmem>>, vector<1x2x32xf32>,
    %463 = arith.index_cast %c5_i32 : i32 to index
    %c0_146 = arith.constant 0 : index
    %c0_147 = arith.constant 0 : index
    %464 = vector.load %arg16[%463, %c0_146, %c0_147] : memref<8x2x32xf32, #tpu.memory_space<vmem>>, vector<1x2x32xf32>
    %465 = vector.shape_cast %464 : vector<1x2x32xf32> to vector<2x32xf32>
    %466 = vector.shape_cast %458 : vector<2x32xf32> to vector<1x2x32xf32>
    tpu.vector_store %arg16[%463, %c0_146, %c0_147], %466 {strides = array<i32>} : memref<8x2x32xf32, #tpu.memory_space<vmem>>, vector<1x2x32xf32>,
    %c6_i32 = arith.constant 6 : i32
    %467 = arith.index_cast %c6_i32 : i32 to index
    %c0_148 = arith.constant 0 : index
    %c0_149 = arith.constant 0 : index
    %468 = vector.load %arg0[%467, %c0_148, %c0_149] : memref<8x2x16xf32, #tpu.memory_space<vmem>>, vector<1x2x16xf32>
    %469 = vector.shape_cast %468 : vector<1x2x16xf32> to vector<2x16xf32>
    %cst_150 = arith.constant dense<0.000000e+00> : vector<2x32xf32>
    %470 = tpu.matmul %453, %3, %cst_150 {dimension_numbers = #tpu.dot_dimension_numbers<[1], [0], [0], [1], [0, 0, 1, 1], [], []>} : vector<2x32xf32>, vector<32x32xf32>, vector<2x32xf32> -> vector<2x32xf32>
    %471 = vector.shape_cast %470 : vector<2x32xf32> to vector<2x1x32xf32>
    %472 = vector.broadcast %471 : vector<2x1x32xf32> to vector<2x8x32xf32>
    %473 = arith.addf %472, %1 : vector<2x8x32xf32>
    %474 = math.tanh %473 : vector<2x8x32xf32>
    %475 = vector.shape_cast %5 : vector<32xf32> to vector<1x1x32xf32>
    %476 = vector.broadcast %475 : vector<1x1x32xf32> to vector<2x8x32xf32>
    %477 = arith.mulf %474, %476 : vector<2x8x32xf32>
    %cst_151 = arith.constant dense<0.000000e+00> : vector<2x8xf32>
    %478 = vector.multi_reduction <add>, %477, %cst_151 [2] : vector<2x8x32xf32> to vector<2x8xf32>
    %479 = arith.addf %478, %2 : vector<2x8xf32>
    %cst_152 = arith.constant dense<0xFF800000> : vector<2xf32>
    %480 = vector.multi_reduction <maximumf>, %479, %cst_152 [1] : vector<2x8xf32> to vector<2xf32>
    %481 = vector.shape_cast %480 : vector<2xf32> to vector<2x1xf32>
    %482 = vector.broadcast %481 : vector<2x1xf32> to vector<2x8xf32>
    %483 = arith.subf %479, %482 : vector<2x8xf32>
    %484 = math.exp %483 : vector<2x8xf32>
    %cst_153 = arith.constant dense<0.000000e+00> : vector<2xf32>
    %485 = vector.multi_reduction <add>, %484, %cst_153 [1] : vector<2x8xf32> to vector<2xf32>
    %486 = vector.shape_cast %485 : vector<2xf32> to vector<2x1xf32>
    %487 = vector.broadcast %486 : vector<2x1xf32> to vector<2x8xf32>
    %488 = arith.divf %484, %487 : vector<2x8xf32>
    %489 = vector.shape_cast %488 : vector<2x8xf32> to vector<2x8x1xf32>
    %490 = vector.broadcast %489 : vector<2x8x1xf32> to vector<2x8x64xf32>
    %491 = arith.mulf %490, %0 : vector<2x8x64xf32>
    %cst_154 = arith.constant dense<0.000000e+00> : vector<2x64xf32>
    %492 = vector.multi_reduction <add>, %491, %cst_154 [1] : vector<2x8x64xf32> to vector<2x64xf32>
    %cst_155 = arith.constant dense<0.000000e+00> : vector<2x96xf32>
    %493 = tpu.matmul %469, %6, %cst_155 {dimension_numbers = #tpu.dot_dimension_numbers<[1], [0], [0], [1], [0, 0, 1, 1], [], []>} : vector<2x16xf32>, vector<16x96xf32>, vector<2x96xf32> -> vector<2x96xf32>
    %cst_156 = arith.constant dense<0.000000e+00> : vector<2x96xf32>
    %494 = tpu.matmul %492, %7, %cst_156 {dimension_numbers = #tpu.dot_dimension_numbers<[1], [0], [0], [1], [0, 0, 1, 1], [], []>} : vector<2x64xf32>, vector<64x96xf32>, vector<2x96xf32> -> vector<2x96xf32>
    %495 = arith.addf %493, %494 : vector<2x96xf32>
    %496 = vector.shape_cast %10 : vector<96xf32> to vector<1x96xf32>
    %497 = vector.broadcast %496 : vector<1x96xf32> to vector<2x96xf32>
    %498 = arith.addf %495, %497 : vector<2x96xf32>
    %cst_157 = arith.constant dense<0.000000e+00> : vector<2x96xf32>
    %499 = tpu.matmul %453, %8, %cst_157 {dimension_numbers = #tpu.dot_dimension_numbers<[1], [0], [0], [1], [0, 0, 1, 1], [], []>} : vector<2x32xf32>, vector<32x96xf32>, vector<2x96xf32> -> vector<2x96xf32>
    %500 = vector.shape_cast %12 : vector<96xf32> to vector<1x96xf32>
    %501 = vector.broadcast %500 : vector<1x96xf32> to vector<2x96xf32>
    %502 = arith.addf %499, %501 : vector<2x96xf32>
    %503 = vector.extract_strided_slice %498 {offsets = [0, 0], sizes = [2, 32], strides = [1, 1]} : vector<2x96xf32> to vector<2x32xf32>
    %504 = vector.extract_strided_slice %502 {offsets = [0, 0], sizes = [2, 32], strides = [1, 1]} : vector<2x96xf32> to vector<2x32xf32>
    %505 = arith.addf %503, %504 : vector<2x32xf32>
    %506 = arith.negf %505 : vector<2x32xf32>
    %507 = math.exp %506 : vector<2x32xf32>
    %cst_158 = arith.constant 1.000000e+00 : f32
    %508 = vector.broadcast %cst_158 : f32 to vector<2x32xf32>
    %509 = arith.addf %508, %507 : vector<2x32xf32>
    %510 = arith.divf %508, %509 : vector<2x32xf32>
    %511 = vector.extract_strided_slice %498 {offsets = [0, 32], sizes = [2, 32], strides = [1, 1]} : vector<2x96xf32> to vector<2x32xf32>
    %512 = vector.extract_strided_slice %502 {offsets = [0, 32], sizes = [2, 32], strides = [1, 1]} : vector<2x96xf32> to vector<2x32xf32>
    %513 = arith.addf %511, %512 : vector<2x32xf32>
    %514 = arith.negf %513 : vector<2x32xf32>
    %515 = math.exp %514 : vector<2x32xf32>
    %cst_159 = arith.constant 1.000000e+00 : f32
    %516 = vector.broadcast %cst_159 : f32 to vector<2x32xf32>
    %517 = arith.addf %516, %515 : vector<2x32xf32>
    %518 = arith.divf %516, %517 : vector<2x32xf32>
    %519 = vector.extract_strided_slice %498 {offsets = [0, 64], sizes = [2, 32], strides = [1, 1]} : vector<2x96xf32> to vector<2x32xf32>
    %520 = vector.extract_strided_slice %502 {offsets = [0, 64], sizes = [2, 32], strides = [1, 1]} : vector<2x96xf32> to vector<2x32xf32>
    %521 = arith.mulf %510, %520 : vector<2x32xf32>
    %522 = arith.addf %519, %521 : vector<2x32xf32>
    %523 = math.tanh %522 : vector<2x32xf32>
    %cst_160 = arith.constant 1.000000e+00 : f32
    %524 = vector.broadcast %cst_160 : f32 to vector<2x32xf32>
    %525 = arith.subf %524, %518 : vector<2x32xf32>
    %526 = arith.mulf %525, %523 : vector<2x32xf32>
    %527 = arith.mulf %518, %453 : vector<2x32xf32>
    %528 = arith.addf %526, %527 : vector<2x32xf32>
    %cst_161 = arith.constant dense<0.000000e+00> : vector<2x32xf32>
    %529 = tpu.matmul %469, %13, %cst_161 {dimension_numbers = #tpu.dot_dimension_numbers<[1], [0], [0], [1], [0, 0, 1, 1], [], []>} : vector<2x16xf32>, vector<16x32xf32>, vector<2x32xf32> -> vector<2x32xf32>
    %cst_162 = arith.constant dense<0.000000e+00> : vector<2x32xf32>
    %530 = tpu.matmul %528, %14, %cst_162 {dimension_numbers = #tpu.dot_dimension_numbers<[1], [0], [0], [1], [0, 0, 1, 1], [], []>} : vector<2x32xf32>, vector<32x32xf32>, vector<2x32xf32> -> vector<2x32xf32>
    %531 = arith.addf %529, %530 : vector<2x32xf32>
    %cst_163 = arith.constant dense<0.000000e+00> : vector<2x32xf32>
    %532 = tpu.matmul %492, %15, %cst_163 {dimension_numbers = #tpu.dot_dimension_numbers<[1], [0], [0], [1], [0, 0, 1, 1], [], []>} : vector<2x64xf32>, vector<64x32xf32>, vector<2x32xf32> -> vector<2x32xf32>
    %533 = arith.addf %531, %532 : vector<2x32xf32>
    %534 = arith.index_cast %c6_i32 : i32 to index
    %c0_164 = arith.constant 0 : index
    %c0_165 = arith.constant 0 : index
    %535 = vector.load %arg15[%534, %c0_164, %c0_165] : memref<8x2x32xf32, #tpu.memory_space<vmem>>, vector<1x2x32xf32>
    %536 = vector.shape_cast %535 : vector<1x2x32xf32> to vector<2x32xf32>
    %537 = vector.shape_cast %528 : vector<2x32xf32> to vector<1x2x32xf32>
    tpu.vector_store %arg15[%534, %c0_164, %c0_165], %537 {strides = array<i32>} : memref<8x2x32xf32, #tpu.memory_space<vmem>>, vector<1x2x32xf32>,
    %538 = arith.index_cast %c6_i32 : i32 to index
    %c0_166 = arith.constant 0 : index
    %c0_167 = arith.constant 0 : index
    %539 = vector.load %arg16[%538, %c0_166, %c0_167] : memref<8x2x32xf32, #tpu.memory_space<vmem>>, vector<1x2x32xf32>
    %540 = vector.shape_cast %539 : vector<1x2x32xf32> to vector<2x32xf32>
    %541 = vector.shape_cast %533 : vector<2x32xf32> to vector<1x2x32xf32>
    tpu.vector_store %arg16[%538, %c0_166, %c0_167], %541 {strides = array<i32>} : memref<8x2x32xf32, #tpu.memory_space<vmem>>, vector<1x2x32xf32>,
    %c7_i32 = arith.constant 7 : i32
    %542 = arith.index_cast %c7_i32 : i32 to index
    %c0_168 = arith.constant 0 : index
    %c0_169 = arith.constant 0 : index
    %543 = vector.load %arg0[%542, %c0_168, %c0_169] : memref<8x2x16xf32, #tpu.memory_space<vmem>>, vector<1x2x16xf32>
    %544 = vector.shape_cast %543 : vector<1x2x16xf32> to vector<2x16xf32>
    %cst_170 = arith.constant dense<0.000000e+00> : vector<2x32xf32>
    %545 = tpu.matmul %528, %3, %cst_170 {dimension_numbers = #tpu.dot_dimension_numbers<[1], [0], [0], [1], [0, 0, 1, 1], [], []>} : vector<2x32xf32>, vector<32x32xf32>, vector<2x32xf32> -> vector<2x32xf32>
    %546 = vector.shape_cast %545 : vector<2x32xf32> to vector<2x1x32xf32>
    %547 = vector.broadcast %546 : vector<2x1x32xf32> to vector<2x8x32xf32>
    %548 = arith.addf %547, %1 : vector<2x8x32xf32>
    %549 = math.tanh %548 : vector<2x8x32xf32>
    %550 = vector.shape_cast %5 : vector<32xf32> to vector<1x1x32xf32>
    %551 = vector.broadcast %550 : vector<1x1x32xf32> to vector<2x8x32xf32>
    %552 = arith.mulf %549, %551 : vector<2x8x32xf32>
    %cst_171 = arith.constant dense<0.000000e+00> : vector<2x8xf32>
    %553 = vector.multi_reduction <add>, %552, %cst_171 [2] : vector<2x8x32xf32> to vector<2x8xf32>
    %554 = arith.addf %553, %2 : vector<2x8xf32>
    %cst_172 = arith.constant dense<0xFF800000> : vector<2xf32>
    %555 = vector.multi_reduction <maximumf>, %554, %cst_172 [1] : vector<2x8xf32> to vector<2xf32>
    %556 = vector.shape_cast %555 : vector<2xf32> to vector<2x1xf32>
    %557 = vector.broadcast %556 : vector<2x1xf32> to vector<2x8xf32>
    %558 = arith.subf %554, %557 : vector<2x8xf32>
    %559 = math.exp %558 : vector<2x8xf32>
    %cst_173 = arith.constant dense<0.000000e+00> : vector<2xf32>
    %560 = vector.multi_reduction <add>, %559, %cst_173 [1] : vector<2x8xf32> to vector<2xf32>
    %561 = vector.shape_cast %560 : vector<2xf32> to vector<2x1xf32>
    %562 = vector.broadcast %561 : vector<2x1xf32> to vector<2x8xf32>
    %563 = arith.divf %559, %562 : vector<2x8xf32>
    %564 = vector.shape_cast %563 : vector<2x8xf32> to vector<2x8x1xf32>
    %565 = vector.broadcast %564 : vector<2x8x1xf32> to vector<2x8x64xf32>
    %566 = arith.mulf %565, %0 : vector<2x8x64xf32>
    %cst_174 = arith.constant dense<0.000000e+00> : vector<2x64xf32>
    %567 = vector.multi_reduction <add>, %566, %cst_174 [1] : vector<2x8x64xf32> to vector<2x64xf32>
    %cst_175 = arith.constant dense<0.000000e+00> : vector<2x96xf32>
    %568 = tpu.matmul %544, %6, %cst_175 {dimension_numbers = #tpu.dot_dimension_numbers<[1], [0], [0], [1], [0, 0, 1, 1], [], []>} : vector<2x16xf32>, vector<16x96xf32>, vector<2x96xf32> -> vector<2x96xf32>
    %cst_176 = arith.constant dense<0.000000e+00> : vector<2x96xf32>
    %569 = tpu.matmul %567, %7, %cst_176 {dimension_numbers = #tpu.dot_dimension_numbers<[1], [0], [0], [1], [0, 0, 1, 1], [], []>} : vector<2x64xf32>, vector<64x96xf32>, vector<2x96xf32> -> vector<2x96xf32>
    %570 = arith.addf %568, %569 : vector<2x96xf32>
    %571 = vector.shape_cast %10 : vector<96xf32> to vector<1x96xf32>
    %572 = vector.broadcast %571 : vector<1x96xf32> to vector<2x96xf32>
    %573 = arith.addf %570, %572 : vector<2x96xf32>
    %cst_177 = arith.constant dense<0.000000e+00> : vector<2x96xf32>
    %574 = tpu.matmul %528, %8, %cst_177 {dimension_numbers = #tpu.dot_dimension_numbers<[1], [0], [0], [1], [0, 0, 1, 1], [], []>} : vector<2x32xf32>, vector<32x96xf32>, vector<2x96xf32> -> vector<2x96xf32>
    %575 = vector.shape_cast %12 : vector<96xf32> to vector<1x96xf32>
    %576 = vector.broadcast %575 : vector<1x96xf32> to vector<2x96xf32>
    %577 = arith.addf %574, %576 : vector<2x96xf32>
    %578 = vector.extract_strided_slice %573 {offsets = [0, 0], sizes = [2, 32], strides = [1, 1]} : vector<2x96xf32> to vector<2x32xf32>
    %579 = vector.extract_strided_slice %577 {offsets = [0, 0], sizes = [2, 32], strides = [1, 1]} : vector<2x96xf32> to vector<2x32xf32>
    %580 = arith.addf %578, %579 : vector<2x32xf32>
    %581 = arith.negf %580 : vector<2x32xf32>
    %582 = math.exp %581 : vector<2x32xf32>
    %cst_178 = arith.constant 1.000000e+00 : f32
    %583 = vector.broadcast %cst_178 : f32 to vector<2x32xf32>
    %584 = arith.addf %583, %582 : vector<2x32xf32>
    %585 = arith.divf %583, %584 : vector<2x32xf32>
    %586 = vector.extract_strided_slice %573 {offsets = [0, 32], sizes = [2, 32], strides = [1, 1]} : vector<2x96xf32> to vector<2x32xf32>
    %587 = vector.extract_strided_slice %577 {offsets = [0, 32], sizes = [2, 32], strides = [1, 1]} : vector<2x96xf32> to vector<2x32xf32>
    %588 = arith.addf %586, %587 : vector<2x32xf32>
    %589 = arith.negf %588 : vector<2x32xf32>
    %590 = math.exp %589 : vector<2x32xf32>
    %cst_179 = arith.constant 1.000000e+00 : f32
    %591 = vector.broadcast %cst_179 : f32 to vector<2x32xf32>
    %592 = arith.addf %591, %590 : vector<2x32xf32>
    %593 = arith.divf %591, %592 : vector<2x32xf32>
    %594 = vector.extract_strided_slice %573 {offsets = [0, 64], sizes = [2, 32], strides = [1, 1]} : vector<2x96xf32> to vector<2x32xf32>
    %595 = vector.extract_strided_slice %577 {offsets = [0, 64], sizes = [2, 32], strides = [1, 1]} : vector<2x96xf32> to vector<2x32xf32>
    %596 = arith.mulf %585, %595 : vector<2x32xf32>
    %597 = arith.addf %594, %596 : vector<2x32xf32>
    %598 = math.tanh %597 : vector<2x32xf32>
    %cst_180 = arith.constant 1.000000e+00 : f32
    %599 = vector.broadcast %cst_180 : f32 to vector<2x32xf32>
    %600 = arith.subf %599, %593 : vector<2x32xf32>
    %601 = arith.mulf %600, %598 : vector<2x32xf32>
    %602 = arith.mulf %593, %528 : vector<2x32xf32>
    %603 = arith.addf %601, %602 : vector<2x32xf32>
    %cst_181 = arith.constant dense<0.000000e+00> : vector<2x32xf32>
    %604 = tpu.matmul %544, %13, %cst_181 {dimension_numbers = #tpu.dot_dimension_numbers<[1], [0], [0], [1], [0, 0, 1, 1], [], []>} : vector<2x16xf32>, vector<16x32xf32>, vector<2x32xf32> -> vector<2x32xf32>
    %cst_182 = arith.constant dense<0.000000e+00> : vector<2x32xf32>
    %605 = tpu.matmul %603, %14, %cst_182 {dimension_numbers = #tpu.dot_dimension_numbers<[1], [0], [0], [1], [0, 0, 1, 1], [], []>} : vector<2x32xf32>, vector<32x32xf32>, vector<2x32xf32> -> vector<2x32xf32>
    %606 = arith.addf %604, %605 : vector<2x32xf32>
    %cst_183 = arith.constant dense<0.000000e+00> : vector<2x32xf32>
    %607 = tpu.matmul %567, %15, %cst_183 {dimension_numbers = #tpu.dot_dimension_numbers<[1], [0], [0], [1], [0, 0, 1, 1], [], []>} : vector<2x64xf32>, vector<64x32xf32>, vector<2x32xf32> -> vector<2x32xf32>
    %608 = arith.addf %606, %607 : vector<2x32xf32>
    %609 = arith.index_cast %c7_i32 : i32 to index
    %c0_184 = arith.constant 0 : index
    %c0_185 = arith.constant 0 : index
    %610 = vector.load %arg15[%609, %c0_184, %c0_185] : memref<8x2x32xf32, #tpu.memory_space<vmem>>, vector<1x2x32xf32>
    %611 = vector.shape_cast %610 : vector<1x2x32xf32> to vector<2x32xf32>
    %612 = vector.shape_cast %603 : vector<2x32xf32> to vector<1x2x32xf32>
    tpu.vector_store %arg15[%609, %c0_184, %c0_185], %612 {strides = array<i32>} : memref<8x2x32xf32, #tpu.memory_space<vmem>>, vector<1x2x32xf32>,
    %613 = arith.index_cast %c7_i32 : i32 to index
    %c0_186 = arith.constant 0 : index
    %c0_187 = arith.constant 0 : index
    %614 = vector.load %arg16[%613, %c0_186, %c0_187] : memref<8x2x32xf32, #tpu.memory_space<vmem>>, vector<1x2x32xf32>
    %615 = vector.shape_cast %614 : vector<1x2x32xf32> to vector<2x32xf32>
    %616 = vector.shape_cast %608 : vector<2x32xf32> to vector<1x2x32xf32>
    tpu.vector_store %arg16[%613, %c0_186, %c0_187], %616 {strides = array<i32>} : memref<8x2x32xf32, #tpu.memory_space<vmem>>, vector<1x2x32xf32>,
    %c8_i32 = arith.constant 8 : i32
    return
  }
}

</mosaic_0001>

<bundles_post_ra>
// kernel: decoder_forward.1
= control target key start
LH: loop header
LB: loop body
LE: loop exit
PB: predicated region body
PF: predicated region fallthrough
CT: control target
= control target key end

     0   :  { %v6938_v0 = vmov 0.0   ;;  %vm6939_vm0 = vmmov 0   ;;  %vm94_vm1 = vcmask 261120   ;;  %v172_v6 = vlaneseq  ;;  %s6942_s28 = smov 64   ;;  %s6943_s27 = smov 96   ;;  %s8808_s5 = inlined_call_operand.vmem [shape: f32[32,32], index: 5, kind: input, shape index: {}]   ;;  %s8809_s3 = inlined_call_operand.vmem [shape: f32[2,32], index: 3, kind: input, shape index: {}]   ;;  %s8810_s4 = inlined_call_operand.vmem [shape: f32[2,8], index: 4, kind: input, shape index: {}]   ;;  %s8811_s2 = inlined_call_operand.vmem [shape: f32[2,8,32], index: 2, kind: input, shape index: {}]   ;;  %s8812_s6 = inlined_call_operand.vmem [shape: f32[1,32], index: 6, kind: input, shape index: {}]   ;;  %s8813_s7 = inlined_call_operand.vmem [shape: f32[16,96], index: 7, kind: input, shape index: {}]   ;;  %s8814_s0 = inlined_call_operand.vmem [shape: f32[8,2,16], index: 0, kind: input, shape index: {}]   ;;  %s8815_s9 = inlined_call_operand.vmem [shape: f32[32,96], index: 9, kind: input, shape index: {}]   ;;  %s8816_s12 = inlined_call_operand.vmem [shape: f32[16,32], index: 12, kind: input, shape index: {}]   ;;  %s8817_s8 = inlined_call_operand.vmem [shape: f32[64,96], index: 8, kind: input, shape index: {}]   ;;  %s8818_s14 = inlined_call_operand.vmem [shape: f32[64,32], index: 14, kind: input, shape index: {}]   ;;  %s8819_s11 = inlined_call_operand.vmem [shape: f32[1,96], index: 11, kind: input, shape index: {}]   ;;  %s8820_s1 = inlined_call_operand.vmem [shape: f32[2,8,64], index: 1, kind: input, shape index: {}]   ;;  %s8821_s10 = inlined_call_operand.vmem [shape: f32[1,96], index: 10, kind: input, shape index: {}]   ;;  %s8822_s13 = inlined_call_operand.vmem [shape: f32[32,32], index: 13, kind: input, shape index: {}]   ;;  %s8823_s15 = inlined_call_operand.vmem [shape: f32[8,2,32], index: 15, kind: output, shape index: {0}]   ;;  %s8824_s16 = inlined_call_operand.vmem [shape: f32[8,2,32], index: 16, kind: output, shape index: {1}]  }
   0x1   :  { %8826 = sst [smem:[#allocation2_spill]] %s8808_s5  ;;  %6027 = vmatprep.subr.mxu1 %v6938_v0  ;;  %6035 = vmatprep.mubr.msk.f32.mxu1 %vm6939_vm0, %v6938_v0  ;;  %v7064_v5 = vld [vmem:[%s8809_s3] sm:$0x3]  ;;  %v6940_v15 = vmov 1966171168   ;;  %v7098_v27 = vld [vmem:[%s8811_s2 + $0x8] sm:$0xff] }
   0x2   :  { %s8827_s23 = sld [smem:[#allocation2_spill]]  ;;  %6057 = vmatprep.subr.mxu0 %v6938_v0  ;;  %6061 = vmatprep.mubr.msk.f32.mxu0 %vm6939_vm0, %v6938_v0  ;;  %v173_v7 = vshrl.u32 %v172_v6, 7  ;;  %v247_v8 = vand.u32 127, %v172_v6  ;;  %v56_v12 = vld [vmem:[%s8810_s4] sm:$0x3]  ;;  %v170_v16 = vunpack.c.l.s4 %v6940_v15  ;;  %v6941_v38 = vmov 0  }
   0x3   :  { %v7091_v24 = vld [vmem:[%s8811_s2] sm:$0xff]  ;;  %6714 = vset.pattern.permute.xlu0 %v6941_v38  ;;  %6715 = vset.pattern.permute.xlu1 %v6941_v38  ;;  %vm256_vm2 = vcmask 1041409   ;;  %vm259_vm3 = vcmask 58368   ;;  %vm418_vm4 = vcmask 130048   ;;  %v7154_v15 = vld [vmem:[%s8815_s9 + $0x10] sm:$0xff]  ;;  %vm328_vm5 = vcmask 523264  }
   0x4   :  { %v7073_v9 = vsub.s32 %v247_v8, %v173_v7  ;;  %v7075_v10 = vsub.s32 0, %v173_v7  ;;  %v7077_v11 = vsub.s32 1, %v173_v7  ;;  %v171_v17 = vunpack.c.0.s8 %v170_v16  ;;  %v7106_v31 = vld [vmem:[%s8812_s6] ss:$0 sm:$0xff]  ;;  %v7131_v8 = vld [vmem:[%s8813_s7 + $0x8] sm:$0xff]  ;;  %s6944_s5 = smov 32  }
   0x5   :  { %6058 = vmatpush3.msra.mxu0 %v7131_v8  ;;  %v7163_v16 = vld [vmem:[%s8815_s9 + $0x8] sm:$0xff]  ;;  %v7246_v38 = vld [vmem:[%s8818_s14 + $0x20] sm:$0xff]  ;;  %vm821_vm6 = vcmask 254976  }
   0x6   :  { %v223_v13 = vrot.slane %v56_v12, %v7075_v10  ;;  %v230_v14 = vrot.slane %v56_v12, %v7077_v11  ;;  %v7084_v18 = vsub.s32 %v171_v17, %v173_v7  ;;  %v7136_v12 = vld [vmem:[%s8813_s7] sm:$0xff]  ;;  %6059 = vmatprep.subr.mxu0 %v6938_v0 }
   0x7   :  { %6060 = vmatpush3.msra.mxu0 %v7136_v12  ;;  %v7170_v17 = vld [vmem:[%s8815_s9] sm:$0xff] }
   0x8   :  { %v7034_v1 = vld [vmem:[%s8827_s23 + $0x18] sm:$0xff]  ;;  %v7039_v2 = vld [vmem:[%s8827_s23 + $0x10] sm:$0xff]  ;;  %v7049_v3 = vld [vmem:[%s8827_s23 + $0x8] sm:$0xff]  ;;  %225 = vbcast.lane.b32.xlu1 %v223_v13, 256  ;;  %6064 = vmatprep.subr.mxu0 %v6938_v0 }
   0x9   :  { %6028 = vmatpush3.msra.mxu1 %v7034_v1  ;;  %v7058_v4 = vld [vmem:[%s8827_s23] sm:$0xff] }
   0xa   :  { %6029 = vmatprep.subr.mxu1 %v6938_v0  ;;  %v93_v13 = vld [vmem:[%s8814_s0] sm:$0x3] }
   0xb   :  { %6030 = vmatpush3.msra.mxu1 %v7039_v2  ;;  %6062 = vmatmul.mubr.msk.f32.vlgmr.msra.gmra.mxu0 %vm418_vm4, %v93_v13 }
   0xc   :  { %6031 = vmatprep.subr.mxu1 %v6938_v0  ;;  %232 = vbcast.lane.b32.xlu1 %v230_v14, 256  ;;  %v7146_v14 = vld [vmem:[%s8815_s9 + $0x18] sm:$0xff] }
   0xd   :  { %6032 = vmatpush3.msra.mxu1 %v7049_v3  ;;  %6065 = vmatpush3.msra.mxu0 %v7146_v14 }
   0xe   :  { %6033 = vmatprep.subr.mxu1 %v6938_v0  ;;  %6072 = vmatprep.mubr.msk.f32.mxu0 %vm6939_vm0, %v6938_v0 }
   0xf   :  { %6034 = vmatpush3.msra.mxu1 %v7058_v4  ;;  %6066 = vmatprep.subr.mxu0 %v6938_v0 }
  0x10   :  { %6036 = vmatmul.mubr.msk.f32.vlgmr.msra.gmra.mxu1 %vm94_vm1, %v7064_v5  ;;  %6038 = vmatprep.subr.mxu1 %v6938_v0 }
  0x11   :  { %6054 = vmatprep.mubr.msk.f32.mxu1 %vm6939_vm0, %v6938_v0  ;;  %6067 = vmatpush3.msra.mxu0 %v7154_v15 }
  0x12   :  { %6068 = vmatprep.subr.mxu0 %v6938_v0 }
  0x13   :  { %6069 = vmatpush3.msra.mxu0 %v7163_v16 }
  0x14   :  { %6070 = vmatprep.subr.mxu0 %v6938_v0 }
  0x15   :  { %6071 = vmatpush3.msra.mxu0 %v7170_v17 }
  0x16   :  { %6073 = vmatmul.mubr.msk.f32.vlgmr.msra.gmra.mxu0 %vm94_vm1, %v7064_v5  ;;  %6086 = vmatprep.subr.mxu0 %v6938_v0 }
  0x17   :  { %6090 = vmatprep.mubr.msk.f32.mxu0 %vm6939_vm0, %v6938_v0 }
  0x7a   :  { %v7112_v39 = vpop.permute.xlu1 %225 }
  0x7e   :  { %v7115_v42 = vpop.permute.xlu1 %232 }
  0xd0   :  { %v164_v19 = vpop.f32.mrf.mxu1 }
  0xd1   :  { %v175_v20 = vrot.slane %v164_v19, %v7084_v18 }
  0xd2   :  { %v6037_v21 = vpop.f32.mrf.mxu1 }
  0xd3   :  { %v176_v22 = vcombine.high %v175_v20, %v175_v20  ;;  %v183_v23 = vrot.slane %v175_v20, %v7084_v18 }
  0xd5   :  { %v190_v25 = vrot.slane %v176_v22, %v7084_v18  ;;  %v194_v26 = vrot.slane %v183_v23, %v7075_v10  ;;  %v7185_v23 = vld [vmem:[%s8816_s12 + $0x8] sm:$0xff] }
  0xd6   :  { %6087 = vmatpush3.msra.mxu0 %v7185_v23 }
  0xd7   :  { %v198_v28 = vrot.slane %v190_v25, %v7075_v10  ;;  %v201_v29 = vadd.f32 %v194_v26, %v7091_v24  ;;  %6088 = vmatprep.subr.mxu0 %v6938_v0 }
  0xd9   :  { %v202_v30 = vadd.f32 %v198_v28, %v7098_v27  ;;  %6716 = vtanh.f32 %v201_v29  ;;  %v7192_v28 = vld [vmem:[%s8816_s12] sm:$0xff]  ;;  %v7199_v29 = vld [vmem:[%s8817_s8 + $0x38] sm:$0xff] }
  0xda   :  { %6089 = vmatpush3.msra.mxu0 %v7192_v28  ;;  %6039 = vmatpush3.msra.mxu1 %v7199_v29 }
  0xdb   :  { %6718 = vtanh.f32 %v202_v30  ;;  %6093 = vmatprep.subr.mxu0 %v6938_v0  ;;  %6091 = vmatmul.mubr.msk.f32.vlgmr.msra.gmra.mxu0 %vm418_vm4, %v93_v13  ;;  %v7205_v30 = vld [vmem:[%s8818_s14 + $0x38] sm:$0xff] }
  0xdc   :  { %6094 = vmatpush3.msra.mxu0 %v7205_v30  ;;  %6040 = vmatprep.subr.mxu1 %v6938_v0 }
  0xdd   :  { %6095 = vmatprep.subr.mxu0 %v6938_v0  ;;  %6109 = vmatprep.mubr.msk.f32.mxu0 %vm6939_vm0, %v6938_v0 }
  0xe6   :  { %v6717_v32 = vpop.eup %6716 }
  0xe7   :  { %v211_v33 = vmul.f32 %v6717_v32, %v7106_v31 }
  0xe8   :  { %v6719_v34 = vpop.eup %6718 }
  0xe9   :  { %v213_v35 = vsel %vm94_vm1, %v211_v33, 0.0  ;;  %v212_v36 = vmul.f32 %v6719_v34, %v7106_v31  ;;  %v7214_v33 = vld [vmem:[%s8817_s8 + $0x30] sm:$0xff] }
  0xea   :  { %214 = vadd.xlane.f32.xlu0 %v213_v35  ;;  %v7219_v34 = vld [vmem:[%s8818_s14 + $0x30] sm:$0xff]  ;;  %6041 = vmatpush3.msra.mxu1 %v7214_v33  ;;  %v7227_v35 = vld [vmem:[%s8817_s8 + $0x28] sm:$0xff] }
  0xeb   :  { %v216_v37 = vsel %vm94_vm1, %v212_v36, 0.0  ;;  %6096 = vmatpush3.msra.mxu0 %v7219_v34  ;;  %6042 = vmatprep.subr.mxu1 %v6938_v0  ;;  %v7232_v36 = vld [vmem:[%s8818_s14 + $0x28] sm:$0xff] }
  0xec   :  { %6097 = vmatprep.subr.mxu0 %v6938_v0  ;;  %6043 = vmatpush3.msra.mxu1 %v7227_v35 }
  0xed   :  { %6098 = vmatpush3.msra.mxu0 %v7232_v36  ;;  %6044 = vmatprep.subr.mxu1 %v6938_v0 }
  0xee   :  { %217 = vadd.xlane.f32.xlu0 %v216_v37  ;;  %v7241_v37 = vld [vmem:[%s8817_s8 + $0x20] sm:$0xff]  ;;  %6099 = vmatprep.subr.mxu0 %v6938_v0 }
  0xef   :  { %6045 = vmatpush3.msra.mxu1 %v7241_v37  ;;  %6100 = vmatpush3.msra.mxu0 %v7246_v38 }
  0xf0   :  { %6046 = vmatprep.subr.mxu1 %v6938_v0  ;;  %6101 = vmatprep.subr.mxu0 %v6938_v0 }
 0x173   :  { %v215_v40 = vpop.xlane.xlu0 %214 }
 0x174   :  { %v236_v41 = vadd.f32 %v7112_v39, %v215_v40  ;;  %v7255_v40 = vld [vmem:[%s8817_s8 + $0x18] sm:$0xff] }
 0x175   :  { %6047 = vmatpush3.msra.mxu1 %v7255_v40 }
 0x176   :  { %241 = vperm.xlu0 %6714, %v236_v41   ;;  %6048 = vmatprep.subr.mxu1 %v6938_v0 }
 0x177   :  { %v218_v43 = vpop.xlane.xlu0 %217 }
 0x178   :  { %v237_v44 = vadd.f32 %v7115_v42, %v218_v43  ;;  %v7269_v43 = vld [vmem:[%s8817_s8 + $0x10] sm:$0xff] }
 0x179   :  { %6049 = vmatpush3.msra.mxu1 %v7269_v43 }
 0x17a   :  { %244 = vperm.xlu1 %6715, %v237_v44   ;;  %6050 = vmatprep.subr.mxu1 %v6938_v0 }
 0x1f1   :  { %v242_v45 = vpop.permute.xlu0 %241 }
 0x1f2   :  { %v251_v47 = vrot.slane %v242_v45, %v7073_v9  ;;  %v7283_v45 = vld [vmem:[%s8817_s8 + $0x8] sm:$0xff] }
 0x1f3   :  { %6051 = vmatpush3.msra.mxu1 %v7283_v45 }
 0x1f4   :  { %6052 = vmatprep.subr.mxu1 %v6938_v0 }
 0x1f5   :  { %v245_v46 = vpop.permute.xlu1 %244 }
 0x1f6   :  { %v255_v48 = vrot.slane %v245_v46, %v7073_v9  ;;  %v7288_v46 = vld [vmem:[%s8818_s14 + $0x8] sm:$0xff] }
 0x1f8   :  { %v257_v49 = vsel %vm256_vm2, %v255_v48, %v251_v47  ;;  %v7293_v47 = vld [vmem:[%s8817_s8] sm:$0xff] }
 0x1f9   :  { %v260_v50 = vsel %vm259_vm3, %v257_v49, -inf  ;;  %v7300_v48 = vld [vmem:[%s8818_s14] sm:$0xff]  ;;  %6053 = vmatpush3.msra.mxu1 %v7293_v47  ;;  %v488_v49 = vpop.f32.mrf.mxu0 }
 0x1fa   :  { %261 = vmax.xlane.f32.xlu1 %v260_v50  ;;  %6075 = vmatprep.subr.mxu1 %v6938_v0 }
 0x1fb   :  { %v6063_v50 = vpop.f32.mrf.mxu0 }
 0x283   :  { %v262_v51 = vpop.xlane.xlu1 %261 }
 0x284   :  { %v267_v52 = vrot.slane %v262_v51, %v7075_v10  ;;  %v271_v53 = vrot.slane %v262_v51, %v7077_v11  ;;  %v7314_v51 = vld [vmem:[%s8819_s11] ss:$0 sm:$0xff] }
 0x286   :  { %v274_v54 = vsub.f32 %v236_v41, %v267_v52  ;;  %v275_v55 = vsub.f32 %v237_v44, %v271_v53  ;;  %v7260_v41 = vld [vmem:[%s8818_s14 + $0x18] sm:$0xff]  ;;  %v7274_v44 = vld [vmem:[%s8818_s14 + $0x10] sm:$0xff]  ;;  %v571_v52 = vpop.f32.mrf.mxu0 }
 0x287   :  { %6102 = vmatpush3.msra.mxu0 %v7260_v41  ;;  %v572_v53 = vadd.f32 %v7314_v51, %v571_v52 }
 0x288   :  { %v276_v56 = vmul.f32 1.442695, %v274_v54  ;;  %v278_v57 = vmul.f32 1.442695, %v275_v55  ;;  %6103 = vmatprep.subr.mxu0 %v6938_v0  ;;  %v6074_v54 = vpop.f32.mrf.mxu0  ;;  %v7321_v55 = vld [vmem:[%s8820_s1] sm:$0xff] }
 0x289   :  { %6104 = vmatpush3.msra.mxu0 %v7274_v44 }
 0x28a   :  { %6720 = vpow2.f32 %v276_v56  ;;  %6105 = vmatprep.subr.mxu0 %v6938_v0  ;;  %v7343_v54 = vpop.f32.mrf.mxu0 }
 0x28b   :  { %6722 = vpow2.f32 %v278_v57  ;;  %6106 = vmatpush3.msra.mxu0 %v7288_v46 }
 0x28c   :  { %6107 = vmatprep.subr.mxu0 %v6938_v0 }
 0x28d   :  { %6108 = vmatpush3.msra.mxu0 %v7300_v48 }
 0x28e   :  { %6142 = vmatprep.subr.mxu0 %v6938_v0 }
 0x297   :  { %v6721_v58 = vpop.eup %6720 }
 0x298   :  { %v6723_v59 = vpop.eup %6722  ;;  %283 = vperm.xlu1 %6715, %v6721_v58  }
 0x299   :  { %286 = vperm.xlu0 %6714, %v6723_v59  }
 0x313   :  { %v284_v60 = vpop.permute.xlu1 %283 }
 0x314   :  { %v287_v61 = vpop.permute.xlu0 %286  ;;  %v291_v62 = vrot.slane %v284_v60, %v7073_v9 }
 0x315   :  { %v295_v63 = vrot.slane %v287_v61, %v7073_v9 }
 0x317   :  { %v296_v6 = vsel %vm256_vm2, %v295_v63, %v291_v62 }
 0x318   :  { %v298_v7 = vsel %vm259_vm3, %v296_v6, 0.0 }
 0x319   :  { %299 = vadd.xlane.f32.xlu0 %v298_v7 }
 0x3a2   :  { %v300_v19 = vpop.xlane.xlu0 %299 }
 0x3a3   :  { %v305_v20 = vrot.slane %v300_v19, %v7075_v10  ;;  %v309_v21 = vrot.slane %v300_v19, %v7077_v11 }
 0x3a5   :  { %6724 = vrcp.f32 %v305_v20 }
 0x3a6   :  { %6726 = vrcp.f32 %v309_v21 }
 0x3b2   :  { %v6725_v22 = vpop.eup %6724 }
 0x3b3   :  { %v313_v25 = vmul.f32 %v6725_v22, %v6721_v58  ;;  %v6727_v26 = vpop.eup %6726  ;;  %v7327_v58 = vld [vmem:[%s8820_s1 + $0x8] sm:$0xff] }
 0x3b4   :  { %v315_v32 = vmul.f32 %v6727_v26, %v6723_v59 }
 0x3b5   :  { %318 = vperm.xlu1 %6715, %v313_v25  }
 0x3b9   :  { %323 = vperm.xlu1 %6715, %v315_v32  }
 0x3bd   :  { %583 = vrot.lane.b32.xlu1 %v572_v53, %s6942_s28 }
 0x430   :  { %v319_v56 = vpop.permute.xlu1 %318 }
 0x431   :  { %v326_v57 = vmul.f32 %v319_v56, %v7321_v55  ;;  %v6092_v56 = vpop.f32.mrf.mxu0 }
 0x433   :  { %v329_v59 = vsel %vm328_vm5, %v326_v57, 0.0  ;;  %v7348_v57 = vld [vmem:[%s8821_s10] ss:$0 sm:$0xff] }
 0x434   :  { %v330_v60 = vrot.slane %v329_v59, 4  ;;  %v324_v61 = vpop.permute.xlu1 %323 }
 0x435   :  { %v327_v62 = vmul.f32 %v324_v61, %v7327_v58 }
 0x436   :  { %v331_v63 = vadd.f32 %v330_v60, %v329_v59 }
 0x437   :  { %v336_v6 = vsel %vm328_vm5, %v327_v62, 0.0 }
 0x438   :  { %v332_v7 = vrot.slane %v331_v63, 2  ;;  %v337_v13 = vrot.slane %v336_v6, 4 }
 0x43a   :  { %v333_v19 = vadd.f32 %v332_v7, %v331_v63  ;;  %v338_v20 = vadd.f32 %v337_v13, %v336_v6 }
 0x43c   :  { %v339_v21 = vrot.slane %v338_v20, 2  ;;  %v334_v22 = vrot.slane %v333_v19, 1 }
 0x43e   :  { %v340_v25 = vadd.f32 %v339_v21, %v338_v20  ;;  %v335_v32 = vadd.f32 %v334_v22, %v333_v19  ;;  %v584_v21 = vpop.permute.xlu1 %583 }
 0x440   :  { %v341_v26 = vrot.slane %v340_v25, 1 }
 0x442   :  { %v342_v50 = vadd.f32 %v341_v26, %v340_v25 }
 0x444   :  { %v345_v52 = vsel %vm256_vm2, %v342_v50, %v335_v32  ;;  %v7366_v50 = vld [vmem:[%s8822_s13 + $0x10] sm:$0xff] }
 0x445   :  { %6055 = vmatmul.mubr.msk.f32.vlgmr.msra.gmra.mxu1 %vm328_vm5, %v345_v52  ;;  %6110 = vmatmul.mubr.msk.f32.vlgmr.msra.gmra.mxu0 %vm328_vm5, %v345_v52  ;;  %v7375_v52 = vld [vmem:[%s8822_s13 + $0x8] sm:$0xff] }
 0x446   :  { %6143 = vmatpush3.msra.mxu0 %v7131_v8  ;;  %6146 = vmatprep.mubr.msk.f32.mxu0 %vm6939_vm0, %v6938_v0 }
 0x447   :  { %6144 = vmatprep.subr.mxu0 %v6938_v0  ;;  %6083 = vmatprep.mubr.msk.f32.mxu1 %vm6939_vm0, %v6938_v0 }
 0x448   :  { %6145 = vmatpush3.msra.mxu0 %v7136_v12 }
 0x449   :  { %6149 = vmatprep.subr.mxu0 %v6938_v0 }
 0x505   :  { %v414_v59 = vpop.f32.mrf.mxu1  ;;  %v7350_v60 = vpop.f32.mrf.mxu0 }
 0x506   :  { %v489_v61 = vadd.f32 %v488_v49, %v414_v59  ;;  %v5638_v49 = vld [vmem:[%s8814_s0 + $0x2] sm:$0x3] }
 0x507   :  { %v6056_v62 = vpop.f32.mrf.mxu1  ;;  %v6111_v63 = vpop.f32.mrf.mxu0  ;;  %6147 = vmatmul.mubr.msk.f32.vlgmr.msra.gmra.mxu0 %vm418_vm4, %v5638_v49  ;;  %v7384_v59 = vld [vmem:[%s8822_s13] sm:$0xff] }
 0x508   :  { %v498_v6 = vadd.f32 %v7348_v57, %v489_v61  ;;  %6150 = vmatpush3.msra.mxu0 %v7146_v14  ;;  %6157 = vmatprep.mubr.msk.f32.mxu0 %vm6939_vm0, %v6938_v0 }
 0x509   :  { %6151 = vmatprep.subr.mxu0 %v6938_v0 }
 0x50a   :  { %v575_v7 = vadd.f32 %v572_v53, %v498_v6  ;;  %v7360_v53 = vld [vmem:[%s8822_s13 + $0x18] sm:$0xff]  ;;  %6152 = vmatpush3.msra.mxu0 %v7154_v15 }
 0x50b   :  { %6076 = vmatpush3.msra.mxu1 %v7360_v53  ;;  %6153 = vmatprep.subr.mxu0 %v6938_v0 }
 0x50c   :  { %v5634_v13 = vmul.f32 -1.442695, %v575_v7  ;;  %6077 = vmatprep.subr.mxu1 %v6938_v0  ;;  %6154 = vmatpush3.msra.mxu0 %v7163_v16 }
 0x50d   :  { %6078 = vmatpush3.msra.mxu1 %v7366_v50  ;;  %6155 = vmatprep.subr.mxu0 %v6938_v0 }
 0x50e   :  { %6728 = vpow2.f32 %v5634_v13  ;;  %6079 = vmatprep.subr.mxu1 %v6938_v0  ;;  %6156 = vmatpush3.msra.mxu0 %v7170_v17 }
 0x50f   :  { %6080 = vmatpush3.msra.mxu1 %v7375_v52  ;;  %6171 = vmatprep.subr.mxu0 %v6938_v0 }
 0x510   :  { %6081 = vmatprep.subr.mxu1 %v6938_v0 }
 0x511   :  { %6082 = vmatpush3.msra.mxu1 %v7384_v59 }
 0x512   :  { %6112 = vmatprep.subr.mxu1 %v6938_v0 }
 0x51b   :  { %v6729_v19 = vpop.eup %6728 }
 0x51c   :  { %v579_v20 = vadd.f32 1.0, %v6729_v19 }
 0x51e   :  { %6730 = vrcp.f32 %v579_v20 }
 0x52b   :  { %v6731_v22 = vpop.eup %6730 }
 0x52c   :  { %v586_v25 = vmul.f32 %v6731_v22, %v584_v21  ;;  %v593_v62 = vsub.f32 1.0, %v6731_v22 }
 0x52e   :  { %588 = vrot.lane.b32.xlu1 %v586_v25, %s6942_s28 }
 0x5a0   :  { %v589_v26 = vpop.permute.xlu1 %588 }
 0x5a1   :  { %v591_v32 = vadd.f32 %v589_v26, %v498_v6 }
 0x5a3   :  { %6732 = vtanh.f32 %v591_v32 }
 0x5b0   :  { %v6733_v56 = vpop.eup %6732 }
 0x5b1   :  { %595 = vrot.lane.b32.xlu1 %v6733_v56, %s6943_s27 }
 0x5b5   :  { %599 = vrot.lane.b32.xlu1 %v7064_v5, %s6944_s5 }
 0x5c7   :  { %v7402_v5 = vpop.f32.mrf.mxu0 }
 0x5c9   :  { %v6148_v19 = vpop.f32.mrf.mxu0 }
 0x623   :  { %v596_v61 = vpop.permute.xlu1 %595 }
 0x624   :  { %v598_v6 = vmul.f32 %v596_v61, %v593_v62 }
 0x627   :  { %v600_v63 = vpop.permute.xlu1 %599 }
 0x628   :  { %v602_v7 = vmul.f32 %v6731_v22, %v600_v63 }
 0x62a   :  { %v7398_v13 = vadd.f32 %v602_v7, %v598_v6 }
 0x62c   :  { %605 = vrot.lane.b32.xlu0 %v7398_v13, %s6943_s27 }
 0x69e   :  { %v606_v20 = vpop.permute.xlu0 %605 }
 0x69f   :  { %822 = vst.msk [vmem:[%s8823_s15] sm:$0x3] %vm821_vm6, %v606_v20  ;;  %6084 = vmatmul.mubr.msk.f32.vlgmr.msra.gmra.mxu1 %vm94_vm1, %v606_v20  ;;  %6158 = vmatmul.mubr.msk.f32.vlgmr.msra.gmra.mxu0 %vm94_vm1, %v606_v20 }
 0x6a0   :  { %6113 = vmatpush3.msra.mxu1 %v7034_v1  ;;  %6120 = vmatprep.mubr.msk.f32.mxu1 %vm6939_vm0, %v6938_v0 }
 0x6a1   :  { %6114 = vmatprep.subr.mxu1 %v6938_v0  ;;  %6172 = vmatpush3.msra.mxu0 %v7185_v23 }
 0x6a2   :  { %6115 = vmatpush3.msra.mxu1 %v7039_v2  ;;  %6173 = vmatprep.subr.mxu0 %v6938_v0 }
 0x6a3   :  { %6116 = vmatprep.subr.mxu1 %v6938_v0  ;;  %6174 = vmatpush3.msra.mxu0 %v7192_v28 }
 0x6a4   :  { %6117 = vmatpush3.msra.mxu1 %v7049_v3  ;;  %6175 = vmatprep.mubr.msk.f32.mxu0 %vm6939_vm0, %v6938_v0 }
 0x6a5   :  { %6118 = vmatprep.subr.mxu1 %v6938_v0  ;;  %6178 = vmatprep.subr.mxu0 %v6938_v0 }
 0x6a6   :  { %6119 = vmatpush3.msra.mxu1 %v7058_v4  ;;  %6176 = vmatmul.mubr.msk.f32.vlgmr.msra.gmra.mxu0 %vm418_vm4, %v5638_v49 }
 0x6a7   :  { %6121 = vmatmul.mubr.msk.f32.vlgmr.msra.gmra.mxu1 %vm94_vm1, %v606_v20  ;;  %6123 = vmatprep.subr.mxu1 %v6938_v0 }
 0x6a8   :  { %6124 = vmatpush3.msra.mxu1 %v7199_v29  ;;  %6179 = vmatpush3.msra.mxu0 %v7205_v30 }
 0x6a9   :  { %6125 = vmatprep.subr.mxu1 %v6938_v0  ;;  %6180 = vmatprep.subr.mxu0 %v6938_v0 }
 0x6aa   :  { %6126 = vmatpush3.msra.mxu1 %v7214_v33  ;;  %6181 = vmatpush3.msra.mxu0 %v7219_v34 }
 0x6ab   :  { %6127 = vmatprep.subr.mxu1 %v6938_v0  ;;  %6182 = vmatprep.subr.mxu0 %v6938_v0 }
 0x6ac   :  { %6128 = vmatpush3.msra.mxu1 %v7227_v35  ;;  %6183 = vmatpush3.msra.mxu0 %v7232_v36 }
 0x6ad   :  { %6129 = vmatprep.subr.mxu1 %v6938_v0  ;;  %6184 = vmatprep.subr.mxu0 %v6938_v0 }
 0x6ae   :  { %6130 = vmatpush3.msra.mxu1 %v7241_v37  ;;  %6185 = vmatpush3.msra.mxu0 %v7246_v38 }
 0x6af   :  { %6131 = vmatprep.subr.mxu1 %v6938_v0  ;;  %6186 = vmatprep.subr.mxu0 %v6938_v0 }
 0x6b0   :  { %6132 = vmatpush3.msra.mxu1 %v7255_v40  ;;  %6187 = vmatpush3.msra.mxu0 %v7260_v41 }
 0x6b1   :  { %6133 = vmatprep.subr.mxu1 %v6938_v0  ;;  %6188 = vmatprep.subr.mxu0 %v6938_v0 }
 0x6b2   :  { %6134 = vmatpush3.msra.mxu1 %v7269_v43  ;;  %6189 = vmatpush3.msra.mxu0 %v7274_v44 }
 0x6b3   :  { %6135 = vmatprep.subr.mxu1 %v6938_v0  ;;  %6190 = vmatprep.subr.mxu0 %v6938_v0 }
 0x6b4   :  { %6136 = vmatpush3.msra.mxu1 %v7283_v45  ;;  %6191 = vmatpush3.msra.mxu0 %v7288_v46 }
 0x6b5   :  { %6137 = vmatprep.subr.mxu1 %v6938_v0  ;;  %6192 = vmatprep.subr.mxu0 %v6938_v0 }
 0x6b6   :  { %6138 = vmatpush3.msra.mxu1 %v7293_v47  ;;  %6139 = vmatprep.mubr.msk.f32.mxu1 %vm6939_vm0, %v6938_v0 }
 0x6b7   :  { %6193 = vmatpush3.msra.mxu0 %v7300_v48  ;;  %6194 = vmatprep.mubr.msk.f32.mxu0 %vm6939_vm0, %v6938_v0 }
 0x6b8   :  { %6227 = vmatprep.subr.mxu0 %v6938_v0  ;;  %6160 = vmatprep.subr.mxu1 %v6938_v0 }
 0x75f   :  { %v675_v2 = vpop.f32.mrf.mxu1  ;;  %v7464_v3 = vpop.f32.mrf.mxu0 }
 0x760   :  { %v746_v21 = vadd.f32 %v7343_v54, %v675_v2 }
 0x761   :  { %v6085_v22 = vpop.f32.mrf.mxu1  ;;  %v6159_v25 = vpop.f32.mrf.mxu0 }
 0x762   :  { %v819_v26 = vadd.f32 %v7350_v60, %v746_v21 }
 0x764   :  { %823 = vst.msk [vmem:[%s8824_s16] sm:$0x3] %vm821_vm6, %v819_v26 }
 0x767   :  { %v892_v32 = vpop.f32.mrf.mxu1 }
 0x768   :  { %v903_v49 = vrot.slane %v892_v32, %v7084_v18 }
 0x769   :  { %v6122_v56 = vpop.f32.mrf.mxu1 }
 0x76a   :  { %v904_v61 = vcombine.high %v903_v49, %v903_v49  ;;  %v911_v62 = vrot.slane %v903_v49, %v7084_v18 }
 0x76c   :  { %v918_v63 = vrot.slane %v904_v61, %v7084_v18  ;;  %v922_v54 = vrot.slane %v911_v62, %v7075_v10 }
 0x76e   :  { %v926_v6 = vrot.slane %v918_v63, %v7075_v10  ;;  %v929_v60 = vadd.f32 %v922_v54, %v7091_v24 }
 0x770   :  { %v930_v7 = vadd.f32 %v926_v6, %v7098_v27  ;;  %6734 = vtanh.f32 %v929_v60 }
 0x772   :  { %6736 = vtanh.f32 %v930_v7 }
 0x77d   :  { %v6735_v19 = vpop.eup %6734 }
 0x77e   :  { %v933_v20 = vmul.f32 %v6735_v19, %v7106_v31 }
 0x77f   :  { %v6737_v2 = vpop.eup %6736 }
 0x780   :  { %v935_v21 = vsel %vm94_vm1, %v933_v20, 0.0  ;;  %v934_v22 = vmul.f32 %v6737_v2, %v7106_v31 }
 0x781   :  { %936 = vadd.xlane.f32.xlu1 %v935_v21 }
 0x782   :  { %v938_v25 = vsel %vm94_vm1, %v934_v22, 0.0 }
 0x783   :  { %939 = vadd.xlane.f32.xlu0 %v938_v25 }
 0x80a   :  { %v937_v26 = vpop.xlane.xlu1 %936 }
 0x80b   :  { %v941_v32 = vadd.f32 %v937_v26, %v7112_v39 }
 0x80c   :  { %v940_v24 = vpop.xlane.xlu0 %939 }
 0x80d   :  { %v942_v27 = vadd.f32 %v940_v24, %v7115_v42  ;;  %946 = vperm.xlu1 %6715, %v941_v32  }
 0x80f   :  { %949 = vperm.xlu0 %6714, %v942_v27  }
 0x888   :  { %v947_v49 = vpop.permute.xlu1 %946 }
 0x889   :  { %v954_v61 = vrot.slane %v947_v49, %v7073_v9 }
 0x88a   :  { %v950_v56 = vpop.permute.xlu0 %949 }
 0x88b   :  { %v958_v62 = vrot.slane %v950_v56, %v7073_v9 }
 0x88d   :  { %v959_v31 = vsel %vm256_vm2, %v958_v62, %v954_v61 }
 0x88e   :  { %v961_v63 = vsel %vm259_vm3, %v959_v31, -inf }
 0x88f   :  { %962 = vmax.xlane.f32.xlu1 %v961_v63 }
 0x918   :  { %v963_v54 = vpop.xlane.xlu1 %962 }
 0x919   :  { %v968_v6 = vrot.slane %v963_v54, %v7075_v10  ;;  %v972_v60 = vrot.slane %v963_v54, %v7077_v11 }
 0x91b   :  { %v975_v7 = vsub.f32 %v941_v32, %v968_v6  ;;  %v976_v19 = vsub.f32 %v942_v27, %v972_v60  ;;  %v1259_v60 = vadd.f32 %v7314_v51, %v7464_v3 }
 0x91d   :  { %v977_v20 = vmul.f32 1.442695, %v975_v7  ;;  %v979_v2 = vmul.f32 1.442695, %v976_v19  ;;  %v7500_v7 = vpop.f32.mrf.mxu0 }
 0x91f   :  { %6738 = vpow2.f32 %v977_v20  ;;  %v6177_v19 = vpop.f32.mrf.mxu0 }
 0x920   :  { %6740 = vpow2.f32 %v979_v2 }
 0x92c   :  { %v6739_v21 = vpop.eup %6738 }
 0x92d   :  { %984 = vperm.xlu0 %6714, %v6739_v21   ;;  %v6741_v22 = vpop.eup %6740 }
 0x931   :  { %987 = vperm.xlu0 %6714, %v6741_v22  }
 0x9a8   :  { %v985_v25 = vpop.permute.xlu0 %984 }
 0x9a9   :  { %v992_v24 = vrot.slane %v985_v25, %v7073_v9 }
 0x9ac   :  { %v988_v26 = vpop.permute.xlu0 %987 }
 0x9ad   :  { %v996_v49 = vrot.slane %v988_v26, %v7073_v9 }
 0x9af   :  { %v997_v56 = vsel %vm256_vm2, %v996_v49, %v992_v24 }
 0x9b0   :  { %v999_v61 = vsel %vm259_vm3, %v997_v56, 0.0 }
 0x9b1   :  { %1000 = vadd.xlane.f32.xlu0 %v999_v61 }
 0xa3a   :  { %v1001_v32 = vpop.xlane.xlu0 %1000 }
 0xa3b   :  { %v1006_v27 = vrot.slane %v1001_v32, %v7075_v10  ;;  %v1010_v62 = vrot.slane %v1001_v32, %v7077_v11 }
 0xa3d   :  { %6742 = vrcp.f32 %v1006_v27 }
 0xa3e   :  { %6744 = vrcp.f32 %v1010_v62 }
 0xa4a   :  { %v6743_v31 = vpop.eup %6742 }
 0xa4b   :  { %v1014_v63 = vmul.f32 %v6743_v31, %v6739_v21  ;;  %v6745_v54 = vpop.eup %6744 }
 0xa4c   :  { %v1016_v6 = vmul.f32 %v6745_v54, %v6741_v22 }
 0xa4d   :  { %1019 = vperm.xlu1 %6715, %v1014_v63  }
 0xa51   :  { %1024 = vperm.xlu1 %6715, %v1016_v6  }
 0xa55   :  { %1270 = vrot.lane.b32.xlu1 %v1259_v60, %s6942_s28 }
 0xac8   :  { %v1020_v20 = vpop.permute.xlu1 %1019 }
 0xac9   :  { %v1027_v2 = vmul.f32 %v1020_v20, %v7321_v55 }
 0xacb   :  { %v1029_v25 = vsel %vm328_vm5, %v1027_v2, 0.0 }
 0xacc   :  { %v1030_v26 = vrot.slane %v1029_v25, 4  ;;  %v1025_v24 = vpop.permute.xlu1 %1024 }
 0xacd   :  { %v1028_v21 = vmul.f32 %v1025_v24, %v7327_v58 }
 0xace   :  { %v1031_v49 = vadd.f32 %v1030_v26, %v1029_v25 }
 0xacf   :  { %v1036_v22 = vsel %vm328_vm5, %v1028_v21, 0.0 }
 0xad0   :  { %v1032_v56 = vrot.slane %v1031_v49, 2  ;;  %v1037_v61 = vrot.slane %v1036_v22, 4 }
 0xad2   :  { %v1033_v3 = vadd.f32 %v1032_v56, %v1031_v49  ;;  %v1038_v32 = vadd.f32 %v1037_v61, %v1036_v22  ;;  %v1271_v61 = vpop.permute.xlu1 %1270 }
 0xad4   :  { %v1039_v27 = vrot.slane %v1038_v32, 2  ;;  %v1034_v62 = vrot.slane %v1033_v3, 1 }
 0xad6   :  { %v1040_v31 = vadd.f32 %v1039_v27, %v1038_v32  ;;  %v1035_v54 = vadd.f32 %v1034_v62, %v1033_v3 }
 0xad8   :  { %v1041_v63 = vrot.slane %v1040_v31, 1 }
 0xada   :  { %v1042_v6 = vadd.f32 %v1041_v63, %v1040_v31 }
 0xadc   :  { %v1045_v19 = vsel %vm256_vm2, %v1042_v6, %v1035_v54 }
 0xadd   :  { %6140 = vmatmul.mubr.msk.f32.vlgmr.msra.gmra.mxu1 %vm328_vm5, %v1045_v19  ;;  %6195 = vmatmul.mubr.msk.f32.vlgmr.msra.gmra.mxu0 %vm328_vm5, %v1045_v19 }
 0xade   :  { %6228 = vmatpush3.msra.mxu0 %v7131_v8  ;;  %6161 = vmatpush3.msra.mxu1 %v7360_v53 }
 0xadf   :  { %6229 = vmatprep.subr.mxu0 %v6938_v0  ;;  %6231 = vmatprep.mubr.msk.f32.mxu0 %vm6939_vm0, %v6938_v0 }
 0xae0   :  { %6230 = vmatpush3.msra.mxu0 %v7136_v12  ;;  %6162 = vmatprep.subr.mxu1 %v6938_v0 }
 0xae1   :  { %6234 = vmatprep.subr.mxu0 %v6938_v0  ;;  %6163 = vmatpush3.msra.mxu1 %v7366_v50 }
 0xae2   :  { %6164 = vmatprep.subr.mxu1 %v6938_v0  ;;  %6168 = vmatprep.mubr.msk.f32.mxu1 %vm6939_vm0, %v6938_v0 }
 0xae3   :  { %6165 = vmatpush3.msra.mxu1 %v7375_v52 }
 0xae4   :  { %6166 = vmatprep.subr.mxu1 %v6938_v0 }
 0xae5   :  { %6167 = vmatpush3.msra.mxu1 %v7384_v59 }
 0xae6   :  { %6197 = vmatprep.subr.mxu1 %v6938_v0 }
 0xb9d   :  { %v1114_v8 = vpop.f32.mrf.mxu1  ;;  %v7525_v12 = vpop.f32.mrf.mxu0 }
 0xb9e   :  { %v1188_v20 = vadd.f32 %v7402_v5, %v1114_v8  ;;  %v5649_v5 = vld [vmem:[%s8814_s0 + $0x4] sm:$0x3] }
 0xb9f   :  { %v6141_v2 = vpop.f32.mrf.mxu1  ;;  %v6196_v25 = vpop.f32.mrf.mxu0  ;;  %6232 = vmatmul.mubr.msk.f32.vlgmr.msra.gmra.mxu0 %vm418_vm4, %v5649_v5 }
 0xba0   :  { %v1191_v26 = vadd.f32 %v7348_v57, %v1188_v20  ;;  %6235 = vmatpush3.msra.mxu0 %v7146_v14  ;;  %6242 = vmatprep.mubr.msk.f32.mxu0 %vm6939_vm0, %v6938_v0 }
 0xba1   :  { %6236 = vmatprep.subr.mxu0 %v6938_v0 }
 0xba2   :  { %v1262_v24 = vadd.f32 %v1259_v60, %v1191_v26  ;;  %6237 = vmatpush3.msra.mxu0 %v7154_v15 }
 0xba3   :  { %6238 = vmatprep.subr.mxu0 %v6938_v0 }
 0xba4   :  { %v5643_v21 = vmul.f32 -1.442695, %v1262_v24  ;;  %6239 = vmatpush3.msra.mxu0 %v7163_v16 }
 0xba5   :  { %6240 = vmatprep.subr.mxu0 %v6938_v0 }
 0xba6   :  { %6746 = vpow2.f32 %v5643_v21  ;;  %6241 = vmatpush3.msra.mxu0 %v7170_v17  ;;  %v7566_v17 = vld [vmem:[%s8827_s23 + $0x10] sm:$0xff] }
 0xba7   :  { %6256 = vmatprep.subr.mxu0 %v6938_v0 }
 0xbb3   :  { %v6747_v49 = vpop.eup %6746 }
 0xbb4   :  { %v1266_v22 = vadd.f32 1.0, %v6747_v49 }
 0xbb6   :  { %6748 = vrcp.f32 %v1266_v22 }
 0xbc3   :  { %v6749_v56 = vpop.eup %6748 }
 0xbc4   :  { %v1273_v3 = vmul.f32 %v6749_v56, %v1271_v61  ;;  %v1280_v14 = vsub.f32 1.0, %v6749_v56  ;;  %v1286_v31 = vmul.f32 %v6749_v56, %v7398_v13  ;;  %v7650_v13 = vld [vmem:[%s8812_s6] ss:$0 sm:$0xff] }
 0xbc6   :  { %1275 = vrot.lane.b32.xlu0 %v1273_v3, %s6942_s28 }
 0xc38   :  { %v1276_v32 = vpop.permute.xlu0 %1275 }
 0xc39   :  { %v1278_v27 = vadd.f32 %v1276_v32, %v1191_v26 }
 0xc3b   :  { %6750 = vtanh.f32 %v1278_v27 }
 0xc48   :  { %v6751_v60 = vpop.eup %6750 }
 0xc49   :  { %1282 = vrot.lane.b32.xlu1 %v6751_v60, %s6943_s27 }
 0xc5f   :  { %v7550_v15 = vpop.f32.mrf.mxu0 }
 0xc61   :  { %v6233_v16 = vpop.f32.mrf.mxu0 }
 0xcbb   :  { %v1283_v62 = vpop.permute.xlu1 %1282 }
 0xcbc   :  { %v1285_v63 = vmul.f32 %v1283_v62, %v1280_v14 }
 0xcbe   :  { %v7546_v54 = vadd.f32 %v1286_v31, %v1285_v63 }
 0xcc0   :  { %1289 = vrot.lane.b32.xlu1 %v7546_v54, %s6943_s27 }
 0xd32   :  { %v1290_v6 = vpop.permute.xlu1 %1289 }
 0xd33   :  { %5647 = vst.msk [vmem:[%s8823_s15 + $0x2] sm:$0x3] %vm821_vm6, %v1290_v6  ;;  %6169 = vmatmul.mubr.msk.f32.vlgmr.msra.gmra.mxu1 %vm94_vm1, %v1290_v6  ;;  %6243 = vmatmul.mubr.msk.f32.vlgmr.msra.gmra.mxu0 %vm94_vm1, %v1290_v6 }
 0xd34   :  { %6198 = vmatpush3.msra.mxu1 %v7034_v1  ;;  %6205 = vmatprep.mubr.msk.f32.mxu1 %vm6939_vm0, %v6938_v0  ;;  %v7575_v1 = vld [vmem:[%s8827_s23 + $0x8] sm:$0xff] }
 0xd35   :  { %6199 = vmatprep.subr.mxu1 %v6938_v0  ;;  %6257 = vmatpush3.msra.mxu0 %v7185_v23 }
 0xd36   :  { %6200 = vmatpush3.msra.mxu1 %v7566_v17  ;;  %6258 = vmatprep.subr.mxu0 %v6938_v0 }
 0xd37   :  { %6201 = vmatprep.subr.mxu1 %v6938_v0  ;;  %6259 = vmatpush3.msra.mxu0 %v7192_v28 }
 0xd38   :  { %6202 = vmatpush3.msra.mxu1 %v7575_v1  ;;  %6260 = vmatprep.mubr.msk.f32.mxu0 %vm6939_vm0, %v6938_v0 }
 0xd39   :  { %6203 = vmatprep.subr.mxu1 %v6938_v0  ;;  %6263 = vmatprep.subr.mxu0 %v6938_v0 }
 0xd3a   :  { %6204 = vmatpush3.msra.mxu1 %v7058_v4  ;;  %6261 = vmatmul.mubr.msk.f32.vlgmr.msra.gmra.mxu0 %vm418_vm4, %v5649_v5 }
 0xd3b   :  { %6206 = vmatmul.mubr.msk.f32.vlgmr.msra.gmra.mxu1 %vm94_vm1, %v1290_v6  ;;  %6208 = vmatprep.subr.mxu1 %v6938_v0 }
 0xd3c   :  { %6209 = vmatpush3.msra.mxu1 %v7199_v29  ;;  %6264 = vmatpush3.msra.mxu0 %v7205_v30 }
 0xd3d   :  { %6210 = vmatprep.subr.mxu1 %v6938_v0  ;;  %6265 = vmatprep.subr.mxu0 %v6938_v0 }
 0xd3e   :  { %6211 = vmatpush3.msra.mxu1 %v7214_v33  ;;  %6266 = vmatpush3.msra.mxu0 %v7219_v34 }
 0xd3f   :  { %6212 = vmatprep.subr.mxu1 %v6938_v0  ;;  %6267 = vmatprep.subr.mxu0 %v6938_v0 }
 0xd40   :  { %6213 = vmatpush3.msra.mxu1 %v7227_v35  ;;  %6268 = vmatpush3.msra.mxu0 %v7232_v36 }
 0xd41   :  { %6214 = vmatprep.subr.mxu1 %v6938_v0  ;;  %6269 = vmatprep.subr.mxu0 %v6938_v0 }
 0xd42   :  { %6215 = vmatpush3.msra.mxu1 %v7241_v37  ;;  %6270 = vmatpush3.msra.mxu0 %v7246_v38 }
 0xd43   :  { %6216 = vmatprep.subr.mxu1 %v6938_v0  ;;  %6271 = vmatprep.subr.mxu0 %v6938_v0 }
 0xd44   :  { %6217 = vmatpush3.msra.mxu1 %v7255_v40  ;;  %6272 = vmatpush3.msra.mxu0 %v7260_v41 }
 0xd45   :  { %6218 = vmatprep.subr.mxu1 %v6938_v0  ;;  %6273 = vmatprep.subr.mxu0 %v6938_v0 }
 0xd46   :  { %6219 = vmatpush3.msra.mxu1 %v7269_v43  ;;  %6274 = vmatpush3.msra.mxu0 %v7274_v44  ;;  %v7638_v44 = vld [vmem:[%s8811_s2] sm:$0xff] }
 0xd47   :  { %6220 = vmatprep.subr.mxu1 %v6938_v0  ;;  %6275 = vmatprep.subr.mxu0 %v6938_v0 }
 0xd48   :  { %6221 = vmatpush3.msra.mxu1 %v7283_v45  ;;  %6276 = vmatpush3.msra.mxu0 %v7288_v46  ;;  %v7644_v46 = vld [vmem:[%s8811_s2 + $0x8] sm:$0xff] }
 0xd49   :  { %6222 = vmatprep.subr.mxu1 %v6938_v0  ;;  %6277 = vmatprep.subr.mxu0 %v6938_v0 }
 0xd4a   :  { %6223 = vmatpush3.msra.mxu1 %v7293_v47  ;;  %6224 = vmatprep.mubr.msk.f32.mxu1 %vm6939_vm0, %v6938_v0 }
 0xd4b   :  { %6278 = vmatpush3.msra.mxu0 %v7300_v48  ;;  %6279 = vmatprep.mubr.msk.f32.mxu0 %vm6939_vm0, %v6938_v0 }
 0xd4c   :  { %6312 = vmatprep.subr.mxu0 %v6938_v0  ;;  %6245 = vmatprep.subr.mxu1 %v6938_v0 }
 0xdf3   :  { %v1359_v4 = vpop.f32.mrf.mxu1  ;;  %v7622_v23 = vpop.f32.mrf.mxu0 }
 0xdf4   :  { %v1430_v28 = vadd.f32 %v7500_v7, %v1359_v4 }
 0xdf5   :  { %v6170_v29 = vpop.f32.mrf.mxu1  ;;  %v6244_v30 = vpop.f32.mrf.mxu0 }
 0xdf6   :  { %v1503_v33 = vadd.f32 %v7525_v12, %v1430_v28 }
 0xdf8   :  { %5648 = vst.msk [vmem:[%s8824_s16 + $0x2] sm:$0x3] %vm821_vm6, %v1503_v33 }
 0xdfb   :  { %v1577_v34 = vpop.f32.mrf.mxu1 }
 0xdfc   :  { %v1588_v35 = vrot.slane %v1577_v34, %v7084_v18 }
 0xdfd   :  { %v6207_v36 = vpop.f32.mrf.mxu1 }
 0xdfe   :  { %v1589_v37 = vcombine.high %v1588_v35, %v1588_v35  ;;  %v1596_v38 = vrot.slane %v1588_v35, %v7084_v18 }
 0xe00   :  { %v1603_v40 = vrot.slane %v1589_v37, %v7084_v18  ;;  %v1607_v41 = vrot.slane %v1596_v38, %v7075_v10 }
 0xe02   :  { %v1611_v43 = vrot.slane %v1603_v40, %v7075_v10  ;;  %v1614_v45 = vadd.f32 %v7638_v44, %v1607_v41 }
 0xe04   :  { %v1615_v47 = vadd.f32 %v7644_v46, %v1611_v43  ;;  %6752 = vtanh.f32 %v1614_v45  ;;  %v1944_v43 = vadd.f32 %v7314_v51, %v7622_v23  ;;  %v7673_v45 = vpop.f32.mrf.mxu0 }
 0xe06   :  { %6754 = vtanh.f32 %v1615_v47  ;;  %v6262_v47 = vpop.f32.mrf.mxu0 }
 0xe11   :  { %v6753_v48 = vpop.eup %6752 }
 0xe12   :  { %v1618_v7 = vmul.f32 %v7650_v13, %v6753_v48 }
 0xe13   :  { %v6755_v19 = vpop.eup %6754 }
 0xe14   :  { %v1620_v8 = vsel %vm94_vm1, %v1618_v7, 0.0  ;;  %v1619_v12 = vmul.f32 %v7650_v13, %v6755_v19 }
 0xe15   :  { %1621 = vadd.xlane.f32.xlu1 %v1620_v8 }
 0xe16   :  { %v1623_v20 = vsel %vm94_vm1, %v1619_v12, 0.0 }
 0xe17   :  { %1624 = vadd.xlane.f32.xlu0 %v1623_v20 }
 0xe9e   :  { %v1622_v2 = vpop.xlane.xlu1 %1621 }
 0xe9f   :  { %v1626_v25 = vadd.f32 %v1622_v2, %v7112_v39 }
 0xea0   :  { %v1625_v26 = vpop.xlane.xlu0 %1624 }
 0xea1   :  { %v1627_v24 = vadd.f32 %v1625_v26, %v7115_v42  ;;  %1631 = vperm.xlu1 %6715, %v1626_v25  }
 0xea3   :  { %1634 = vperm.xlu0 %6714, %v1627_v24  }
 0xf1c   :  { %v1632_v21 = vpop.permute.xlu1 %1631 }
 0xf1d   :  { %v1639_v22 = vrot.slane %v1632_v21, %v7073_v9 }
 0xf1e   :  { %v1635_v49 = vpop.permute.xlu0 %1634 }
 0xf1f   :  { %v1643_v56 = vrot.slane %v1635_v49, %v7073_v9 }
 0xf21   :  { %v1644_v61 = vsel %vm256_vm2, %v1643_v56, %v1639_v22 }
 0xf22   :  { %v1646_v3 = vsel %vm259_vm3, %v1644_v61, -inf }
 0xf23   :  { %1647 = vmax.xlane.f32.xlu1 %v1646_v3 }
 0xfac   :  { %v1648_v32 = vpop.xlane.xlu1 %1647 }
 0xfad   :  { %v1653_v27 = vrot.slane %v1648_v32, %v7075_v10  ;;  %v1657_v5 = vrot.slane %v1648_v32, %v7077_v11  ;;  %v7695_v32 = vld [vmem:[%s8813_s7] sm:$0xff] }
 0xfaf   :  { %v1660_v60 = vsub.f32 %v1626_v25, %v1653_v27  ;;  %v1661_v14 = vsub.f32 %v1627_v24, %v1657_v5 }
 0xfb1   :  { %v1662_v62 = vmul.f32 1.442695, %v1660_v60  ;;  %v1664_v31 = vmul.f32 1.442695, %v1661_v14 }
 0xfb3   :  { %6756 = vpow2.f32 %v1662_v62 }
 0xfb4   :  { %6758 = vpow2.f32 %v1664_v31 }
 0xfc0   :  { %v6757_v63 = vpop.eup %6756 }
 0xfc1   :  { %1669 = vperm.xlu0 %6714, %v6757_v63   ;;  %v6759_v16 = vpop.eup %6758 }
 0xfc5   :  { %1672 = vperm.xlu0 %6714, %v6759_v16  }
0x103c   :  { %v1670_v6 = vpop.permute.xlu0 %1669 }
0x103d   :  { %v1677_v28 = vrot.slane %v1670_v6, %v7073_v9 }
0x1040   :  { %v1673_v4 = vpop.permute.xlu0 %1672 }
0x1041   :  { %v1681_v29 = vrot.slane %v1673_v4, %v7073_v9 }
0x1043   :  { %v1682_v30 = vsel %vm256_vm2, %v1681_v29, %v1677_v28  ;;  %v7729_v29 = vld [vmem:[%s8815_s9 + $0x10] sm:$0xff] }
0x1044   :  { %v1684_v33 = vsel %vm259_vm3, %v1682_v30, 0.0  ;;  %v7736_v30 = vld [vmem:[%s8815_s9 + $0x8] sm:$0xff] }
0x1045   :  { %1685 = vadd.xlane.f32.xlu0 %v1684_v33 }
0x10ce   :  { %v1686_v34 = vpop.xlane.xlu0 %1685 }
0x10cf   :  { %v1691_v35 = vrot.slane %v1686_v34, %v7075_v10  ;;  %v1695_v36 = vrot.slane %v1686_v34, %v7077_v11  ;;  %v7743_v34 = vld [vmem:[%s8815_s9] sm:$0xff] }
0x10d1   :  { %6760 = vrcp.f32 %v1691_v35 }
0x10d2   :  { %6762 = vrcp.f32 %v1695_v36 }
0x10de   :  { %v6761_v37 = vpop.eup %6760 }
0x10df   :  { %v6763_v38 = vpop.eup %6762  ;;  %v1699_v40 = vmul.f32 %v6761_v37, %v6757_v63 }
0x10e0   :  { %v1701_v41 = vmul.f32 %v6763_v38, %v6759_v16 }
0x10e1   :  { %1704 = vperm.xlu1 %6715, %v1699_v40  }
0x10e2   :  { %1709 = vperm.xlu0 %6714, %v1701_v41  }
0x10e5   :  { %1955 = vrot.lane.b32.xlu1 %v1944_v43, %s6942_s28 }
0x115c   :  { %v1705_v48 = vpop.permute.xlu1 %1704 }
0x115d   :  { %v1710_v7 = vpop.permute.xlu0 %1709  ;;  %v1712_v19 = vmul.f32 %v1705_v48, %v7321_v55  ;;  %v7773_v48 = vld [vmem:[%s8816_s12 + $0x8] sm:$0xff] }
0x115e   :  { %v1713_v8 = vmul.f32 %v1710_v7, %v7327_v58  ;;  %v7685_v58 = vld [vmem:[%s8813_s7 + $0x8] sm:$0xff]  ;;  %v7782_v7 = vld [vmem:[%s8816_s12] sm:$0xff] }
0x115f   :  { %v1714_v12 = vsel %vm328_vm5, %v1712_v19, 0.0  ;;  %v7793_v19 = vld [vmem:[%s8827_s23] sm:$0xff] }
0x1160   :  { %v1721_v20 = vsel %vm328_vm5, %v1713_v8, 0.0  ;;  %v1715_v2 = vrot.slane %v1714_v12, 4  ;;  %v1956_v6 = vpop.permute.xlu1 %1955  ;;  %v7802_v8 = vld [vmem:[%s8817_s8 + $0x38] sm:$0xff] }
0x1161   :  { %v1722_v25 = vrot.slane %v1721_v20, 4 }
0x1162   :  { %v1716_v26 = vadd.f32 %v1715_v2, %v1714_v12  ;;  %v7808_v12 = vld [vmem:[%s8818_s14 + $0x38] sm:$0xff]  ;;  %v7822_v2 = vld [vmem:[%s8818_s14 + $0x30] sm:$0xff] }
0x1163   :  { %v1723_v24 = vadd.f32 %v1722_v25, %v1721_v20  ;;  %v7816_v20 = vld [vmem:[%s8817_s8 + $0x30] sm:$0xff]  ;;  %v7830_v25 = vld [vmem:[%s8817_s8 + $0x28] sm:$0xff] }
0x1164   :  { %v1717_v51 = vrot.slane %v1716_v26, 2 }
0x1165   :  { %v1724_v23 = vrot.slane %v1723_v24, 2 }
0x1166   :  { %v1718_v21 = vadd.f32 %v1717_v51, %v1716_v26  ;;  %v7836_v26 = vld [vmem:[%s8818_s14 + $0x28] sm:$0xff]  ;;  %v7850_v51 = vld [vmem:[%s8818_s14 + $0x20] sm:$0xff] }
0x1167   :  { %v1725_v49 = vadd.f32 %v1724_v23, %v1723_v24  ;;  %v7844_v24 = vld [vmem:[%s8817_s8 + $0x20] sm:$0xff]  ;;  %v7858_v23 = vld [vmem:[%s8817_s8 + $0x18] sm:$0xff] }
0x1168   :  { %v1719_v22 = vrot.slane %v1718_v21, 1 }
0x1169   :  { %v1726_v56 = vrot.slane %v1725_v49, 1 }
0x116a   :  { %v1720_v61 = vadd.f32 %v1719_v22, %v1718_v21  ;;  %v7864_v21 = vld [vmem:[%s8818_s14 + $0x18] sm:$0xff]  ;;  %v7878_v22 = vld [vmem:[%s8818_s14 + $0x10] sm:$0xff] }
0x116b   :  { %v1727_v3 = vadd.f32 %v1726_v56, %v1725_v49  ;;  %v7872_v49 = vld [vmem:[%s8817_s8 + $0x10] sm:$0xff]  ;;  %v7886_v56 = vld [vmem:[%s8817_s8 + $0x8] sm:$0xff] }
0x116d   :  { %v1730_v55 = vsel %vm256_vm2, %v1727_v3, %v1720_v61  ;;  %v7892_v61 = vld [vmem:[%s8818_s14 + $0x8] sm:$0xff]  ;;  %v7900_v3 = vld [vmem:[%s8817_s8] sm:$0xff] }
0x116e   :  { %6225 = vmatmul.mubr.msk.f32.vlgmr.msra.gmra.mxu1 %vm328_vm5, %v1730_v55  ;;  %6280 = vmatmul.mubr.msk.f32.vlgmr.msra.gmra.mxu0 %vm328_vm5, %v1730_v55  ;;  %v7908_v55 = vld [vmem:[%s8818_s14] sm:$0xff] }
0x116f   :  { %6313 = vmatpush3.msra.mxu0 %v7685_v58  ;;  %6246 = vmatpush3.msra.mxu1 %v7360_v53 }
0x1170   :  { %6314 = vmatprep.subr.mxu0 %v6938_v0  ;;  %6316 = vmatprep.mubr.msk.f32.mxu0 %vm6939_vm0, %v6938_v0 }
0x1171   :  { %6315 = vmatpush3.msra.mxu0 %v7695_v32  ;;  %6247 = vmatprep.subr.mxu1 %v6938_v0 }
0x1172   :  { %6319 = vmatprep.subr.mxu0 %v6938_v0  ;;  %6248 = vmatpush3.msra.mxu1 %v7366_v50 }
0x1173   :  { %6249 = vmatprep.subr.mxu1 %v6938_v0  ;;  %6253 = vmatprep.mubr.msk.f32.mxu1 %vm6939_vm0, %v6938_v0 }
0x1174   :  { %6250 = vmatpush3.msra.mxu1 %v7375_v52 }
0x1175   :  { %6251 = vmatprep.subr.mxu1 %v6938_v0 }
0x1176   :  { %6252 = vmatpush3.msra.mxu1 %v7384_v59 }
0x1177   :  { %6282 = vmatprep.subr.mxu1 %v6938_v0 }
0x122e   :  { %v1799_v53 = vpop.f32.mrf.mxu1  ;;  %v7708_v27 = vpop.f32.mrf.mxu0 }
0x122f   :  { %v1873_v5 = vadd.f32 %v7550_v15, %v1799_v53  ;;  %v5660_v15 = vld [vmem:[%s8814_s0 + $0x6] sm:$0x3] }
0x1230   :  { %v6226_v60 = vpop.f32.mrf.mxu1  ;;  %v6281_v50 = vpop.f32.mrf.mxu0  ;;  %6317 = vmatmul.mubr.msk.f32.vlgmr.msra.gmra.mxu0 %vm418_vm4, %v5660_v15 }
0x1231   :  { %v1876_v14 = vadd.f32 %v7348_v57, %v1873_v5  ;;  %v7720_v57 = vld [vmem:[%s8815_s9 + $0x18] sm:$0xff]  ;;  %6327 = vmatprep.mubr.msk.f32.mxu0 %vm6939_vm0, %v6938_v0 }
0x1232   :  { %6320 = vmatpush3.msra.mxu0 %v7720_v57 }
0x1233   :  { %v1947_v62 = vadd.f32 %v1944_v43, %v1876_v14  ;;  %6321 = vmatprep.subr.mxu0 %v6938_v0 }
0x1234   :  { %6322 = vmatpush3.msra.mxu0 %v7729_v29 }
0x1235   :  { %v5654_v31 = vmul.f32 -1.442695, %v1947_v62  ;;  %6323 = vmatprep.subr.mxu0 %v6938_v0 }
0x1236   :  { %6324 = vmatpush3.msra.mxu0 %v7736_v30 }
0x1237   :  { %6764 = vpow2.f32 %v5654_v31  ;;  %6325 = vmatprep.subr.mxu0 %v6938_v0 }
0x1238   :  { %6326 = vmatpush3.msra.mxu0 %v7743_v34 }
0x1239   :  { %6341 = vmatprep.subr.mxu0 %v6938_v0 }
0x1244   :  { %v6765_v63 = vpop.eup %6764 }
0x1245   :  { %v1951_v52 = vadd.f32 1.0, %v6765_v63 }
0x1247   :  { %6766 = vrcp.f32 %v1951_v52 }
0x1254   :  { %v6767_v16 = vpop.eup %6766 }
0x1255   :  { %v1958_v59 = vmul.f32 %v6767_v16, %v1956_v6  ;;  %v1965_v35 = vsub.f32 1.0, %v6767_v16  ;;  %v1971_v37 = vmul.f32 %v6767_v16, %v7546_v54  ;;  %v7764_v54 = vld [vmem:[%s8827_s23 + $0x18] sm:$0xff] }
0x1257   :  { %1960 = vrot.lane.b32.xlu1 %v1958_v59, %s6942_s28 }
0x12c9   :  { %v1961_v4 = vpop.permute.xlu1 %1960 }
0x12ca   :  { %v1963_v28 = vadd.f32 %v1961_v4, %v1876_v14 }
0x12cc   :  { %6768 = vtanh.f32 %v1963_v28 }
0x12d9   :  { %v6769_v33 = vpop.eup %6768 }
0x12da   :  { %1967 = vrot.lane.b32.xlu1 %v6769_v33, %s6943_s27 }
0x12f0   :  { %v7753_v41 = vpop.f32.mrf.mxu0 }
0x12f2   :  { %v6318_v43 = vpop.f32.mrf.mxu0 }
0x134c   :  { %v1968_v36 = vpop.permute.xlu1 %1967 }
0x134d   :  { %v1970_v38 = vmul.f32 %v1968_v36, %v1965_v35 }
0x134f   :  { %v7749_v40 = vadd.f32 %v1971_v37, %v1970_v38 }
0x1351   :  { %1974 = vrot.lane.b32.xlu1 %v7749_v40, %s6943_s27 }
0x13c3   :  { %v1975_v47 = vpop.permute.xlu1 %1974 }
0x13c4   :  { %5658 = vst.msk [vmem:[%s8823_s15 + $0x4] sm:$0x3] %vm821_vm6, %v1975_v47  ;;  %6254 = vmatmul.mubr.msk.f32.vlgmr.msra.gmra.mxu1 %vm94_vm1, %v1975_v47  ;;  %6328 = vmatmul.mubr.msk.f32.vlgmr.msra.gmra.mxu0 %vm94_vm1, %v1975_v47 }
0x13c5   :  { %6283 = vmatpush3.msra.mxu1 %v7764_v54  ;;  %6290 = vmatprep.mubr.msk.f32.mxu1 %vm6939_vm0, %v6938_v0 }
0x13c6   :  { %6284 = vmatprep.subr.mxu1 %v6938_v0  ;;  %6342 = vmatpush3.msra.mxu0 %v7773_v48 }
0x13c7   :  { %6285 = vmatpush3.msra.mxu1 %v7566_v17  ;;  %6343 = vmatprep.subr.mxu0 %v6938_v0 }
0x13c8   :  { %6286 = vmatprep.subr.mxu1 %v6938_v0  ;;  %6344 = vmatpush3.msra.mxu0 %v7782_v7 }
0x13c9   :  { %6287 = vmatpush3.msra.mxu1 %v7575_v1  ;;  %6345 = vmatprep.mubr.msk.f32.mxu0 %vm6939_vm0, %v6938_v0 }
0x13ca   :  { %6288 = vmatprep.subr.mxu1 %v6938_v0  ;;  %6348 = vmatprep.subr.mxu0 %v6938_v0 }
0x13cb   :  { %6289 = vmatpush3.msra.mxu1 %v7793_v19  ;;  %6346 = vmatmul.mubr.msk.f32.vlgmr.msra.gmra.mxu0 %vm418_vm4, %v5660_v15 }
0x13cc   :  { %6291 = vmatmul.mubr.msk.f32.vlgmr.msra.gmra.mxu1 %vm94_vm1, %v1975_v47  ;;  %6293 = vmatprep.subr.mxu1 %v6938_v0 }
0x13cd   :  { %6294 = vmatpush3.msra.mxu1 %v7802_v8  ;;  %6349 = vmatpush3.msra.mxu0 %v7808_v12 }
0x13ce   :  { %6295 = vmatprep.subr.mxu1 %v6938_v0  ;;  %6350 = vmatprep.subr.mxu0 %v6938_v0 }
0x13cf   :  { %6296 = vmatpush3.msra.mxu1 %v7816_v20  ;;  %6351 = vmatpush3.msra.mxu0 %v7822_v2 }
0x13d0   :  { %6297 = vmatprep.subr.mxu1 %v6938_v0  ;;  %6352 = vmatprep.subr.mxu0 %v6938_v0 }
0x13d1   :  { %6298 = vmatpush3.msra.mxu1 %v7830_v25  ;;  %6353 = vmatpush3.msra.mxu0 %v7836_v26 }
0x13d2   :  { %6299 = vmatprep.subr.mxu1 %v6938_v0  ;;  %6354 = vmatprep.subr.mxu0 %v6938_v0 }
0x13d3   :  { %6300 = vmatpush3.msra.mxu1 %v7844_v24  ;;  %6355 = vmatpush3.msra.mxu0 %v7850_v51 }
0x13d4   :  { %6301 = vmatprep.subr.mxu1 %v6938_v0  ;;  %6356 = vmatprep.subr.mxu0 %v6938_v0 }
0x13d5   :  { %6302 = vmatpush3.msra.mxu1 %v7858_v23  ;;  %6357 = vmatpush3.msra.mxu0 %v7864_v21 }
0x13d6   :  { %6303 = vmatprep.subr.mxu1 %v6938_v0  ;;  %6358 = vmatprep.subr.mxu0 %v6938_v0 }
0x13d7   :  { %6304 = vmatpush3.msra.mxu1 %v7872_v49  ;;  %6359 = vmatpush3.msra.mxu0 %v7878_v22 }
0x13d8   :  { %6305 = vmatprep.subr.mxu1 %v6938_v0  ;;  %6360 = vmatprep.subr.mxu0 %v6938_v0 }
0x13d9   :  { %6306 = vmatpush3.msra.mxu1 %v7886_v56  ;;  %6361 = vmatpush3.msra.mxu0 %v7892_v61 }
0x13da   :  { %6307 = vmatprep.subr.mxu1 %v6938_v0  ;;  %6362 = vmatprep.subr.mxu0 %v6938_v0 }
0x13db   :  { %6308 = vmatpush3.msra.mxu1 %v7900_v3  ;;  %6309 = vmatprep.mubr.msk.f32.mxu1 %vm6939_vm0, %v6938_v0 }
0x13dc   :  { %6363 = vmatpush3.msra.mxu0 %v7908_v55  ;;  %6364 = vmatprep.mubr.msk.f32.mxu0 %vm6939_vm0, %v6938_v0 }
0x13dd   :  { %6397 = vmatprep.subr.mxu0 %v6938_v0  ;;  %6330 = vmatprep.subr.mxu1 %v6938_v0 }
0x1484   :  { %v2044_v53 = vpop.f32.mrf.mxu1  ;;  %v7915_v5 = vpop.f32.mrf.mxu0 }
0x1485   :  { %v2115_v60 = vadd.f32 %v7673_v45, %v2044_v53 }
0x1486   :  { %v6255_v50 = vpop.f32.mrf.mxu1  ;;  %v6329_v14 = vpop.f32.mrf.mxu0 }
0x1487   :  { %v2188_v62 = vadd.f32 %v7708_v27, %v2115_v60 }
0x1489   :  { %5659 = vst.msk [vmem:[%s8824_s16 + $0x4] sm:$0x3] %vm821_vm6, %v2188_v62 }
0x148c   :  { %v2262_v31 = vpop.f32.mrf.mxu1 }
0x148d   :  { %v2273_v63 = vrot.slane %v2262_v31, %v7084_v18 }
0x148e   :  { %v6292_v52 = vpop.f32.mrf.mxu1 }
0x148f   :  { %v2274_v16 = vcombine.high %v2273_v63, %v2273_v63  ;;  %v2281_v6 = vrot.slane %v2273_v63, %v7084_v18 }
0x1491   :  { %v2288_v59 = vrot.slane %v2274_v16, %v7084_v18  ;;  %v2292_v45 = vrot.slane %v2281_v6, %v7075_v10 }
0x1493   :  { %v2296_v4 = vrot.slane %v2288_v59, %v7075_v10  ;;  %v2299_v27 = vadd.f32 %v7638_v44, %v2292_v45 }
0x1495   :  { %v2300_v28 = vadd.f32 %v7644_v46, %v2296_v4  ;;  %6770 = vtanh.f32 %v2299_v27 }
0x1497   :  { %6772 = vtanh.f32 %v2300_v28 }
0x14a2   :  { %v6771_v15 = vpop.eup %6770 }
0x14a3   :  { %v2303_v33 = vmul.f32 %v7650_v13, %v6771_v15 }
0x14a4   :  { %v6773_v35 = vpop.eup %6772 }
0x14a5   :  { %v2305_v36 = vsel %vm94_vm1, %v2303_v33, 0.0  ;;  %v2304_v37 = vmul.f32 %v7650_v13, %v6773_v35 }
0x14a6   :  { %2306 = vadd.xlane.f32.xlu1 %v2305_v36 }
0x14a7   :  { %v2308_v38 = vsel %vm94_vm1, %v2304_v37, 0.0 }
0x14a8   :  { %2309 = vadd.xlane.f32.xlu0 %v2308_v38 }
0x152f   :  { %v2307_v43 = vpop.xlane.xlu1 %2306 }
0x1530   :  { %v2311_v47 = vadd.f32 %v2307_v43, %v7112_v39 }
0x1531   :  { %v2310_v53 = vpop.xlane.xlu0 %2309 }
0x1532   :  { %v2312_v60 = vadd.f32 %v2310_v53, %v7115_v42  ;;  %2316 = vperm.xlu0 %6714, %v2311_v47  }
0x1534   :  { %2319 = vperm.xlu1 %6715, %v2312_v60  }
0x15ad   :  { %v2317_v50 = vpop.permute.xlu0 %2316 }
0x15ae   :  { %v2324_v62 = vrot.slane %v2317_v50, %v7073_v9 }
0x15af   :  { %v2320_v14 = vpop.permute.xlu1 %2319 }
0x15b0   :  { %v2328_v31 = vrot.slane %v2320_v14, %v7073_v9 }
0x15b2   :  { %v2329_v63 = vsel %vm256_vm2, %v2328_v31, %v2324_v62 }
0x15b3   :  { %v2331_v52 = vsel %vm259_vm3, %v2329_v63, -inf }
0x15b4   :  { %2332 = vmax.xlane.f32.xlu1 %v2331_v52  ;;  %v7951_v52 = vld [vmem:[%s8819_s11] ss:$0 sm:$0xff] }
0x163d   :  { %v2333_v16 = vpop.xlane.xlu1 %2332 }
0x163e   :  { %v2338_v6 = vrot.slane %v2333_v16, %v7075_v10  ;;  %v2342_v59 = vrot.slane %v2333_v16, %v7077_v11  ;;  %v2629_v16 = vadd.f32 %v7951_v52, %v7915_v5 }
0x1640   :  { %v2345_v45 = vsub.f32 %v2311_v47, %v2338_v6  ;;  %v2346_v4 = vsub.f32 %v2312_v60, %v2342_v59  ;;  %v7956_v6 = vpop.f32.mrf.mxu0 }
0x1642   :  { %v2347_v27 = vmul.f32 1.442695, %v2345_v45  ;;  %v2349_v28 = vmul.f32 1.442695, %v2346_v4  ;;  %v6347_v59 = vpop.f32.mrf.mxu0 }
0x1644   :  { %6774 = vpow2.f32 %v2347_v27  ;;  %v7961_v27 = vld [vmem:[%s8820_s1] sm:$0xff] }
0x1645   :  { %6776 = vpow2.f32 %v2349_v28 }
0x1651   :  { %v6775_v15 = vpop.eup %6774 }
0x1652   :  { %2354 = vperm.xlu0 %6714, %v6775_v15   ;;  %v6777_v33 = vpop.eup %6776 }
0x1656   :  { %2357 = vperm.xlu0 %6714, %v6777_v33  }
0x16cd   :  { %v2355_v35 = vpop.permute.xlu0 %2354 }
0x16ce   :  { %v2362_v37 = vrot.slane %v2355_v35, %v7073_v9 }
0x16d1   :  { %v2358_v36 = vpop.permute.xlu0 %2357 }
0x16d2   :  { %v2366_v38 = vrot.slane %v2358_v36, %v7073_v9 }
0x16d4   :  { %v2367_v43 = vsel %vm256_vm2, %v2366_v38, %v2362_v37 }
0x16d5   :  { %v2369_v53 = vsel %vm259_vm3, %v2367_v43, 0.0 }
0x16d6   :  { %2370 = vadd.xlane.f32.xlu0 %v2369_v53 }
0x175f   :  { %v2371_v47 = vpop.xlane.xlu0 %2370 }
0x1760   :  { %v2376_v60 = vrot.slane %v2371_v47, %v7075_v10  ;;  %v2380_v50 = vrot.slane %v2371_v47, %v7077_v11 }
0x1762   :  { %6778 = vrcp.f32 %v2376_v60 }
0x1763   :  { %6780 = vrcp.f32 %v2380_v50 }
0x176f   :  { %v6779_v14 = vpop.eup %6778 }
0x1770   :  { %v6781_v62 = vpop.eup %6780  ;;  %v2384_v31 = vmul.f32 %v6779_v14, %v6775_v15  ;;  %v7967_v15 = vld [vmem:[%s8820_s1 + $0x8] sm:$0xff] }
0x1771   :  { %v2386_v63 = vmul.f32 %v6781_v62, %v6777_v33 }
0x1772   :  { %2389 = vperm.xlu1 %6715, %v2384_v31  }
0x1773   :  { %2394 = vperm.xlu0 %6714, %v2386_v63  }
0x1776   :  { %2640 = vrot.lane.b32.xlu1 %v2629_v16, %s6942_s28 }
0x17ed   :  { %v2390_v45 = vpop.permute.xlu1 %2389 }
0x17ee   :  { %v2395_v4 = vpop.permute.xlu0 %2394  ;;  %v2397_v28 = vmul.f32 %v7961_v27, %v2390_v45  ;;  %v7979_v45 = vld [vmem:[%s8822_s13 + $0x18] sm:$0xff] }
0x17ef   :  { %v2398_v5 = vmul.f32 %v7967_v15, %v2395_v4  ;;  %v7991_v4 = vld [vmem:[%s8822_s13 + $0x10] sm:$0xff] }
0x17f0   :  { %v2399_v33 = vsel %vm328_vm5, %v2397_v28, 0.0  ;;  %v8000_v28 = vld [vmem:[%s8822_s13 + $0x8] sm:$0xff] }
0x17f1   :  { %v2406_v35 = vsel %vm328_vm5, %v2398_v5, 0.0  ;;  %v2400_v36 = vrot.slane %v2399_v33, 4  ;;  %v8007_v5 = vld [vmem:[%s8822_s13] sm:$0xff] }
0x17f2   :  { %v2407_v37 = vrot.slane %v2406_v35, 4 }
0x17f3   :  { %v2401_v38 = vadd.f32 %v2400_v36, %v2399_v33 }
0x17f4   :  { %v2408_v43 = vadd.f32 %v2407_v37, %v2406_v35 }
0x17f5   :  { %v2402_v53 = vrot.slane %v2401_v38, 2 }
0x17f6   :  { %v2409_v47 = vrot.slane %v2408_v43, 2 }
0x17f7   :  { %v2403_v60 = vadd.f32 %v2402_v53, %v2401_v38 }
0x17f8   :  { %v2410_v50 = vadd.f32 %v2409_v47, %v2408_v43  ;;  %v8017_v43 = vld [vmem:[%s8821_s10] ss:$0 sm:$0xff] }
0x17f9   :  { %v2404_v14 = vrot.slane %v2403_v60, 1 }
0x17fa   :  { %v2411_v62 = vrot.slane %v2410_v50, 1 }
0x17fb   :  { %v2405_v31 = vadd.f32 %v2404_v14, %v2403_v60 }
0x17fc   :  { %v2412_v63 = vadd.f32 %v2411_v62, %v2410_v50 }
0x17fe   :  { %v2415_v59 = vsel %vm256_vm2, %v2412_v63, %v2405_v31  ;;  %v2641_v31 = vpop.permute.xlu1 %2640 }
0x17ff   :  { %6310 = vmatmul.mubr.msk.f32.vlgmr.msra.gmra.mxu1 %vm328_vm5, %v2415_v59  ;;  %6365 = vmatmul.mubr.msk.f32.vlgmr.msra.gmra.mxu0 %vm328_vm5, %v2415_v59 }
0x1800   :  { %6398 = vmatpush3.msra.mxu0 %v7685_v58  ;;  %6331 = vmatpush3.msra.mxu1 %v7979_v45 }
0x1801   :  { %6399 = vmatprep.subr.mxu0 %v6938_v0  ;;  %6401 = vmatprep.mubr.msk.f32.mxu0 %vm6939_vm0, %v6938_v0 }
0x1802   :  { %6400 = vmatpush3.msra.mxu0 %v7695_v32  ;;  %6332 = vmatprep.subr.mxu1 %v6938_v0 }
0x1803   :  { %6404 = vmatprep.subr.mxu0 %v6938_v0  ;;  %6333 = vmatpush3.msra.mxu1 %v7991_v4 }
0x1804   :  { %6334 = vmatprep.subr.mxu1 %v6938_v0  ;;  %6338 = vmatprep.mubr.msk.f32.mxu1 %vm6939_vm0, %v6938_v0 }
0x1805   :  { %6335 = vmatpush3.msra.mxu1 %v8000_v28 }
0x1806   :  { %6336 = vmatprep.subr.mxu1 %v6938_v0 }
0x1807   :  { %6337 = vmatpush3.msra.mxu1 %v8007_v5 }
0x1808   :  { %6367 = vmatprep.subr.mxu1 %v6938_v0 }
0x18bf   :  { %v2484_v33 = vpop.f32.mrf.mxu1  ;;  %v8011_v35 = vpop.f32.mrf.mxu0 }
0x18c0   :  { %v2558_v36 = vadd.f32 %v7753_v41, %v2484_v33  ;;  %v5671_v33 = vld [vmem:[%s8814_s0 + $0x8] sm:$0x3] }
0x18c1   :  { %v6311_v37 = vpop.f32.mrf.mxu1  ;;  %v6366_v38 = vpop.f32.mrf.mxu0  ;;  %6402 = vmatmul.mubr.msk.f32.vlgmr.msra.gmra.mxu0 %vm418_vm4, %v5671_v33 }
0x18c2   :  { %v2561_v53 = vadd.f32 %v8017_v43, %v2558_v36  ;;  %6405 = vmatpush3.msra.mxu0 %v7720_v57  ;;  %6412 = vmatprep.mubr.msk.f32.mxu0 %vm6939_vm0, %v6938_v0 }
0x18c3   :  { %6406 = vmatprep.subr.mxu0 %v6938_v0 }
0x18c4   :  { %v2632_v47 = vadd.f32 %v2629_v16, %v2561_v53  ;;  %6407 = vmatpush3.msra.mxu0 %v7729_v29 }
0x18c5   :  { %6408 = vmatprep.subr.mxu0 %v6938_v0 }
0x18c6   :  { %v5665_v60 = vmul.f32 -1.442695, %v2632_v47  ;;  %6409 = vmatpush3.msra.mxu0 %v7736_v30 }
0x18c7   :  { %6410 = vmatprep.subr.mxu0 %v6938_v0 }
0x18c8   :  { %6782 = vpow2.f32 %v5665_v60  ;;  %6411 = vmatpush3.msra.mxu0 %v7743_v34 }
0x18c9   :  { %6426 = vmatprep.subr.mxu0 %v6938_v0 }
0x18d5   :  { %v6783_v50 = vpop.eup %6782 }
0x18d6   :  { %v2636_v14 = vadd.f32 1.0, %v6783_v50 }
0x18d8   :  { %6784 = vrcp.f32 %v2636_v14 }
0x18e5   :  { %v6785_v62 = vpop.eup %6784 }
0x18e6   :  { %v2643_v63 = vmul.f32 %v6785_v62, %v2641_v31  ;;  %v2650_v36 = vsub.f32 1.0, %v6785_v62  ;;  %v2656_v38 = vmul.f32 %v6785_v62, %v7749_v40 }
0x18e8   :  { %2645 = vrot.lane.b32.xlu1 %v2643_v63, %s6942_s28 }
0x195a   :  { %v2646_v41 = vpop.permute.xlu1 %2645 }
0x195b   :  { %v2648_v59 = vadd.f32 %v2646_v41, %v2561_v53 }
0x195d   :  { %6786 = vtanh.f32 %v2648_v59 }
0x196a   :  { %v6787_v16 = vpop.eup %6786 }
0x196b   :  { %2652 = vrot.lane.b32.xlu1 %v6787_v16, %s6943_s27 }
0x1981   :  { %v8041_v60 = vpop.f32.mrf.mxu0 }
0x1983   :  { %v6403_v50 = vpop.f32.mrf.mxu0 }
0x19dd   :  { %v2653_v37 = vpop.permute.xlu1 %2652 }
0x19de   :  { %v2655_v53 = vmul.f32 %v2653_v37, %v2650_v36 }
0x19e0   :  { %v8037_v47 = vadd.f32 %v2656_v38, %v2655_v53 }
0x19e2   :  { %2659 = vrot.lane.b32.xlu0 %v8037_v47, %s6943_s27 }
0x1a54   :  { %v2660_v14 = vpop.permute.xlu0 %2659 }
0x1a55   :  { %5669 = vst.msk [vmem:[%s8823_s15 + $0x6] sm:$0x3] %vm821_vm6, %v2660_v14  ;;  %6339 = vmatmul.mubr.msk.f32.vlgmr.msra.gmra.mxu1 %vm94_vm1, %v2660_v14  ;;  %6413 = vmatmul.mubr.msk.f32.vlgmr.msra.gmra.mxu0 %vm94_vm1, %v2660_v14 }
0x1a56   :  { %6368 = vmatpush3.msra.mxu1 %v7764_v54  ;;  %6375 = vmatprep.mubr.msk.f32.mxu1 %vm6939_vm0, %v6938_v0 }
0x1a57   :  { %6369 = vmatprep.subr.mxu1 %v6938_v0  ;;  %6427 = vmatpush3.msra.mxu0 %v7773_v48 }
0x1a58   :  { %6370 = vmatpush3.msra.mxu1 %v7566_v17  ;;  %6428 = vmatprep.subr.mxu0 %v6938_v0 }
0x1a59   :  { %6371 = vmatprep.subr.mxu1 %v6938_v0  ;;  %6429 = vmatpush3.msra.mxu0 %v7782_v7 }
0x1a5a   :  { %6372 = vmatpush3.msra.mxu1 %v7575_v1  ;;  %6430 = vmatprep.mubr.msk.f32.mxu0 %vm6939_vm0, %v6938_v0 }
0x1a5b   :  { %6373 = vmatprep.subr.mxu1 %v6938_v0  ;;  %6433 = vmatprep.subr.mxu0 %v6938_v0 }
0x1a5c   :  { %6374 = vmatpush3.msra.mxu1 %v7793_v19  ;;  %6431 = vmatmul.mubr.msk.f32.vlgmr.msra.gmra.mxu0 %vm418_vm4, %v5671_v33 }
0x1a5d   :  { %6376 = vmatmul.mubr.msk.f32.vlgmr.msra.gmra.mxu1 %vm94_vm1, %v2660_v14  ;;  %6378 = vmatprep.subr.mxu1 %v6938_v0 }
0x1a5e   :  { %6379 = vmatpush3.msra.mxu1 %v7802_v8  ;;  %6434 = vmatpush3.msra.mxu0 %v7808_v12 }
0x1a5f   :  { %6380 = vmatprep.subr.mxu1 %v6938_v0  ;;  %6435 = vmatprep.subr.mxu0 %v6938_v0 }
0x1a60   :  { %6381 = vmatpush3.msra.mxu1 %v7816_v20  ;;  %6436 = vmatpush3.msra.mxu0 %v7822_v2 }
0x1a61   :  { %6382 = vmatprep.subr.mxu1 %v6938_v0  ;;  %6437 = vmatprep.subr.mxu0 %v6938_v0 }
0x1a62   :  { %6383 = vmatpush3.msra.mxu1 %v7830_v25  ;;  %6438 = vmatpush3.msra.mxu0 %v7836_v26 }
0x1a63   :  { %6384 = vmatprep.subr.mxu1 %v6938_v0  ;;  %6439 = vmatprep.subr.mxu0 %v6938_v0 }
0x1a64   :  { %6385 = vmatpush3.msra.mxu1 %v7844_v24  ;;  %6440 = vmatpush3.msra.mxu0 %v7850_v51 }
0x1a65   :  { %6386 = vmatprep.subr.mxu1 %v6938_v0  ;;  %6441 = vmatprep.subr.mxu0 %v6938_v0 }
0x1a66   :  { %6387 = vmatpush3.msra.mxu1 %v7858_v23  ;;  %6442 = vmatpush3.msra.mxu0 %v7864_v21 }
0x1a67   :  { %6388 = vmatprep.subr.mxu1 %v6938_v0  ;;  %6443 = vmatprep.subr.mxu0 %v6938_v0 }
0x1a68   :  { %6389 = vmatpush3.msra.mxu1 %v7872_v49  ;;  %6444 = vmatpush3.msra.mxu0 %v7878_v22 }
0x1a69   :  { %6390 = vmatprep.subr.mxu1 %v6938_v0  ;;  %6445 = vmatprep.subr.mxu0 %v6938_v0 }
0x1a6a   :  { %6391 = vmatpush3.msra.mxu1 %v7886_v56  ;;  %6446 = vmatpush3.msra.mxu0 %v7892_v61 }
0x1a6b   :  { %6392 = vmatprep.subr.mxu1 %v6938_v0  ;;  %6447 = vmatprep.subr.mxu0 %v6938_v0 }
0x1a6c   :  { %6393 = vmatpush3.msra.mxu1 %v7900_v3  ;;  %6394 = vmatprep.mubr.msk.f32.mxu1 %vm6939_vm0, %v6938_v0 }
0x1a6d   :  { %6448 = vmatpush3.msra.mxu0 %v7908_v55  ;;  %6449 = vmatprep.mubr.msk.f32.mxu0 %vm6939_vm0, %v6938_v0 }
0x1a6e   :  { %6482 = vmatprep.subr.mxu0 %v6938_v0  ;;  %6415 = vmatprep.subr.mxu1 %v6938_v0 }
0x1b15   :  { %v2729_v17 = vpop.f32.mrf.mxu1  ;;  %v8103_v1 = vpop.f32.mrf.mxu0 }
0x1b16   :  { %v2800_v40 = vadd.f32 %v7956_v6, %v2729_v17 }
0x1b17   :  { %v6340_v62 = vpop.f32.mrf.mxu1  ;;  %v6414_v31 = vpop.f32.mrf.mxu0 }
0x1b18   :  { %v2873_v63 = vadd.f32 %v8011_v35, %v2800_v40 }
0x1b1a   :  { %5670 = vst.msk [vmem:[%s8824_s16 + $0x6] sm:$0x3] %vm821_vm6, %v2873_v63 }
0x1b1d   :  { %v2947_v41 = vpop.f32.mrf.mxu1 }
0x1b1e   :  { %v2958_v59 = vrot.slane %v2947_v41, %v7084_v18 }
0x1b1f   :  { %v6377_v33 = vpop.f32.mrf.mxu1 }
0x1b20   :  { %v2959_v16 = vcombine.high %v2958_v59, %v2958_v59  ;;  %v2966_v36 = vrot.slane %v2958_v59, %v7084_v18 }
0x1b22   :  { %v2973_v37 = vrot.slane %v2959_v16, %v7084_v18  ;;  %v2977_v6 = vrot.slane %v2966_v36, %v7075_v10 }
0x1b24   :  { %v2981_v38 = vrot.slane %v2973_v37, %v7075_v10  ;;  %v2984_v35 = vadd.f32 %v7638_v44, %v2977_v6 }
0x1b26   :  { %v2985_v53 = vadd.f32 %v7644_v46, %v2981_v38  ;;  %6788 = vtanh.f32 %v2984_v35 }
0x1b28   :  { %6790 = vtanh.f32 %v2985_v53 }
0x1b33   :  { %v6789_v50 = vpop.eup %6788 }
0x1b34   :  { %v2988_v14 = vmul.f32 %v7650_v13, %v6789_v50 }
0x1b35   :  { %v6791_v17 = vpop.eup %6790 }
0x1b36   :  { %v2990_v40 = vsel %vm94_vm1, %v2988_v14, 0.0  ;;  %v2989_v62 = vmul.f32 %v7650_v13, %v6791_v17 }
0x1b37   :  { %2991 = vadd.xlane.f32.xlu1 %v2990_v40 }
0x1b38   :  { %v2993_v31 = vsel %vm94_vm1, %v2989_v62, 0.0 }
0x1b39   :  { %2994 = vadd.xlane.f32.xlu0 %v2993_v31 }
0x1bc0   :  { %v2992_v63 = vpop.xlane.xlu1 %2991 }
0x1bc1   :  { %v2996_v41 = vadd.f32 %v2992_v63, %v7112_v39 }
0x1bc2   :  { %v2995_v44 = vpop.xlane.xlu0 %2994 }
0x1bc3   :  { %v2997_v46 = vadd.f32 %v2995_v44, %v7115_v42  ;;  %3001 = vperm.xlu0 %6714, %v2996_v41  }
0x1bc5   :  { %3004 = vperm.xlu1 %6715, %v2997_v46  }
0x1c3e   :  { %v3002_v59 = vpop.permute.xlu0 %3001 }
0x1c3f   :  { %v3009_v16 = vrot.slane %v3002_v59, %v7073_v9 }
0x1c40   :  { %v3005_v33 = vpop.permute.xlu1 %3004 }
0x1c41   :  { %v3013_v36 = vrot.slane %v3005_v33, %v7073_v9 }
0x1c43   :  { %v3014_v13 = vsel %vm256_vm2, %v3013_v36, %v3009_v16 }
0x1c44   :  { %v3016_v37 = vsel %vm259_vm3, %v3014_v13, -inf }
0x1c45   :  { %3017 = vmax.xlane.f32.xlu1 %v3016_v37 }
0x1cce   :  { %v3018_v6 = vpop.xlane.xlu1 %3017 }
0x1ccf   :  { %v3023_v38 = vrot.slane %v3018_v6, %v7075_v10  ;;  %v3027_v35 = vrot.slane %v3018_v6, %v7077_v11 }
0x1cd1   :  { %v3030_v53 = vsub.f32 %v2996_v41, %v3023_v38  ;;  %v3031_v50 = vsub.f32 %v2997_v46, %v3027_v35  ;;  %v3314_v35 = vadd.f32 %v7951_v52, %v8103_v1 }
0x1cd3   :  { %v3032_v14 = vmul.f32 1.442695, %v3030_v53  ;;  %v3034_v17 = vmul.f32 1.442695, %v3031_v50  ;;  %v8139_v53 = vpop.f32.mrf.mxu0 }
0x1cd5   :  { %6792 = vpow2.f32 %v3032_v14  ;;  %v6432_v50 = vpop.f32.mrf.mxu0 }
0x1cd6   :  { %6794 = vpow2.f32 %v3034_v17 }
0x1ce2   :  { %v6793_v40 = vpop.eup %6792 }
0x1ce3   :  { %3039 = vperm.xlu0 %6714, %v6793_v40   ;;  %v6795_v62 = vpop.eup %6794 }
0x1ce7   :  { %3042 = vperm.xlu0 %6714, %v6795_v62  }
0x1d5e   :  { %v3040_v31 = vpop.permute.xlu0 %3039 }
0x1d5f   :  { %v3047_v44 = vrot.slane %v3040_v31, %v7073_v9 }
0x1d62   :  { %v3043_v63 = vpop.permute.xlu0 %3042 }
0x1d63   :  { %v3051_v59 = vrot.slane %v3043_v63, %v7073_v9 }
0x1d65   :  { %v3052_v33 = vsel %vm256_vm2, %v3051_v59, %v3047_v44 }
0x1d66   :  { %v3054_v16 = vsel %vm259_vm3, %v3052_v33, 0.0 }
0x1d67   :  { %3055 = vadd.xlane.f32.xlu0 %v3054_v16 }
0x1df0   :  { %v3056_v41 = vpop.xlane.xlu0 %3055 }
0x1df1   :  { %v3061_v46 = vrot.slane %v3056_v41, %v7075_v10  ;;  %v3065_v36 = vrot.slane %v3056_v41, %v7077_v11 }
0x1df3   :  { %6796 = vrcp.f32 %v3061_v46 }
0x1df4   :  { %6798 = vrcp.f32 %v3065_v36 }
0x1e00   :  { %v6797_v13 = vpop.eup %6796 }
0x1e01   :  { %v6799_v37 = vpop.eup %6798  ;;  %v3069_v6 = vmul.f32 %v6797_v13, %v6793_v40 }
0x1e02   :  { %v3071_v38 = vmul.f32 %v6799_v37, %v6795_v62 }
0x1e03   :  { %3074 = vperm.xlu1 %6715, %v3069_v6  }
0x1e04   :  { %3079 = vperm.xlu0 %6714, %v3071_v38  }
0x1e07   :  { %3325 = vrot.lane.b32.xlu1 %v3314_v35, %s6942_s28 }
0x1e7e   :  { %v3075_v14 = vpop.permute.xlu1 %3074 }
0x1e7f   :  { %v3080_v17 = vpop.permute.xlu0 %3079  ;;  %v3082_v31 = vmul.f32 %v7961_v27, %v3075_v14 }
0x1e80   :  { %v3083_v63 = vmul.f32 %v7967_v15, %v3080_v17 }
0x1e81   :  { %v3084_v44 = vsel %vm328_vm5, %v3082_v31, 0.0 }
0x1e82   :  { %v3091_v40 = vsel %vm328_vm5, %v3083_v63, 0.0  ;;  %v3085_v62 = vrot.slane %v3084_v44, 4 }
0x1e83   :  { %v3092_v59 = vrot.slane %v3091_v40, 4 }
0x1e84   :  { %v3086_v33 = vadd.f32 %v3085_v62, %v3084_v44 }
0x1e85   :  { %v3093_v16 = vadd.f32 %v3092_v59, %v3091_v40 }
0x1e86   :  { %v3087_v1 = vrot.slane %v3086_v33, 2 }
0x1e87   :  { %v3094_v41 = vrot.slane %v3093_v16, 2 }
0x1e88   :  { %v3088_v46 = vadd.f32 %v3087_v1, %v3086_v33 }
0x1e89   :  { %v3095_v36 = vadd.f32 %v3094_v41, %v3093_v16  ;;  %v3326_v16 = vpop.permute.xlu1 %3325 }
0x1e8a   :  { %v3089_v13 = vrot.slane %v3088_v46, 1 }
0x1e8b   :  { %v3096_v37 = vrot.slane %v3095_v36, 1 }
0x1e8c   :  { %v3090_v6 = vadd.f32 %v3089_v13, %v3088_v46 }
0x1e8d   :  { %v3097_v38 = vadd.f32 %v3096_v37, %v3095_v36 }
0x1e8f   :  { %v3100_v50 = vsel %vm256_vm2, %v3097_v38, %v3090_v6 }
0x1e90   :  { %6395 = vmatmul.mubr.msk.f32.vlgmr.msra.gmra.mxu1 %vm328_vm5, %v3100_v50  ;;  %6450 = vmatmul.mubr.msk.f32.vlgmr.msra.gmra.mxu0 %vm328_vm5, %v3100_v50 }
0x1e91   :  { %6483 = vmatpush3.msra.mxu0 %v7685_v58  ;;  %6416 = vmatpush3.msra.mxu1 %v7979_v45 }
0x1e92   :  { %6484 = vmatprep.subr.mxu0 %v6938_v0  ;;  %6486 = vmatprep.mubr.msk.f32.mxu0 %vm6939_vm0, %v6938_v0 }
0x1e93   :  { %6485 = vmatpush3.msra.mxu0 %v7695_v32  ;;  %6417 = vmatprep.subr.mxu1 %v6938_v0 }
0x1e94   :  { %6489 = vmatprep.subr.mxu0 %v6938_v0  ;;  %6418 = vmatpush3.msra.mxu1 %v7991_v4 }
0x1e95   :  { %6419 = vmatprep.subr.mxu1 %v6938_v0  ;;  %6423 = vmatprep.mubr.msk.f32.mxu1 %vm6939_vm0, %v6938_v0 }
0x1e96   :  { %6420 = vmatpush3.msra.mxu1 %v8000_v28 }
0x1e97   :  { %6421 = vmatprep.subr.mxu1 %v6938_v0 }
0x1e98   :  { %6422 = vmatpush3.msra.mxu1 %v8007_v5 }
0x1e99   :  { %6452 = vmatprep.subr.mxu1 %v6938_v0 }
0x1f50   :  { %v3169_v58 = vpop.f32.mrf.mxu1  ;;  %v8164_v32 = vpop.f32.mrf.mxu0 }
0x1f51   :  { %v3243_v14 = vadd.f32 %v8041_v60, %v3169_v58  ;;  %v5682_v60 = vld [vmem:[%s8814_s0 + $0xa] sm:$0x3] }
0x1f52   :  { %v6396_v17 = vpop.f32.mrf.mxu1  ;;  %v6451_v31 = vpop.f32.mrf.mxu0  ;;  %6487 = vmatmul.mubr.msk.f32.vlgmr.msra.gmra.mxu0 %vm418_vm4, %v5682_v60 }
0x1f53   :  { %v3246_v63 = vadd.f32 %v8017_v43, %v3243_v14  ;;  %6490 = vmatpush3.msra.mxu0 %v7720_v57  ;;  %6497 = vmatprep.mubr.msk.f32.mxu0 %vm6939_vm0, %v6938_v0 }
0x1f54   :  { %6491 = vmatprep.subr.mxu0 %v6938_v0 }
0x1f55   :  { %v3317_v44 = vadd.f32 %v3314_v35, %v3246_v63  ;;  %6492 = vmatpush3.msra.mxu0 %v7729_v29 }
0x1f56   :  { %6493 = vmatprep.subr.mxu0 %v6938_v0 }
0x1f57   :  { %v5676_v40 = vmul.f32 -1.442695, %v3317_v44  ;;  %6494 = vmatpush3.msra.mxu0 %v7736_v30 }
0x1f58   :  { %6495 = vmatprep.subr.mxu0 %v6938_v0 }
0x1f59   :  { %6800 = vpow2.f32 %v5676_v40  ;;  %6496 = vmatpush3.msra.mxu0 %v7743_v34  ;;  %v8205_v34 = vld [vmem:[%s8827_s23 + $0x10] sm:$0xff] }
0x1f5a   :  { %6511 = vmatprep.subr.mxu0 %v6938_v0 }
0x1f66   :  { %v6801_v62 = vpop.eup %6800 }
0x1f67   :  { %v3321_v59 = vadd.f32 1.0, %v6801_v62 }
0x1f69   :  { %6802 = vrcp.f32 %v3321_v59 }
0x1f76   :  { %v6803_v33 = vpop.eup %6802 }
0x1f77   :  { %v3328_v1 = vmul.f32 %v6803_v33, %v3326_v16  ;;  %v3335_v57 = vsub.f32 1.0, %v6803_v33  ;;  %v3341_v13 = vmul.f32 %v6803_v33, %v8037_v47  ;;  %v8289_v47 = vld [vmem:[%s8812_s6] ss:$0 sm:$0xff] }
0x1f79   :  { %3330 = vrot.lane.b32.xlu1 %v3328_v1, %s6942_s28 }
0x1feb   :  { %v3331_v41 = vpop.permute.xlu1 %3330 }
0x1fec   :  { %v3333_v46 = vadd.f32 %v3331_v41, %v3246_v63 }
0x1fee   :  { %6804 = vtanh.f32 %v3333_v46 }
0x1ffb   :  { %v6805_v35 = vpop.eup %6804 }
0x1ffc   :  { %3337 = vrot.lane.b32.xlu1 %v6805_v35, %s6943_s27 }
0x2012   :  { %v8189_v29 = vpop.f32.mrf.mxu0 }
0x2014   :  { %v6488_v30 = vpop.f32.mrf.mxu0 }
0x206e   :  { %v3338_v36 = vpop.permute.xlu1 %3337 }
0x206f   :  { %v3340_v37 = vmul.f32 %v3338_v36, %v3335_v57 }
0x2071   :  { %v8185_v6 = vadd.f32 %v3341_v13, %v3340_v37 }
0x2073   :  { %3344 = vrot.lane.b32.xlu0 %v8185_v6, %s6943_s27 }
0x20e5   :  { %v3345_v38 = vpop.permute.xlu0 %3344 }
0x20e6   :  { %5680 = vst.msk [vmem:[%s8823_s15 + $0x8] sm:$0x3] %vm821_vm6, %v3345_v38  ;;  %6424 = vmatmul.mubr.msk.f32.vlgmr.msra.gmra.mxu1 %vm94_vm1, %v3345_v38  ;;  %6498 = vmatmul.mubr.msk.f32.vlgmr.msra.gmra.mxu0 %vm94_vm1, %v3345_v38 }
0x20e7   :  { %6453 = vmatpush3.msra.mxu1 %v7764_v54  ;;  %6460 = vmatprep.mubr.msk.f32.mxu1 %vm6939_vm0, %v6938_v0  ;;  %v8214_v54 = vld [vmem:[%s8827_s23 + $0x8] sm:$0xff] }
0x20e8   :  { %6454 = vmatprep.subr.mxu1 %v6938_v0  ;;  %6512 = vmatpush3.msra.mxu0 %v7773_v48 }
0x20e9   :  { %6455 = vmatpush3.msra.mxu1 %v8205_v34  ;;  %6513 = vmatprep.subr.mxu0 %v6938_v0 }
0x20ea   :  { %6456 = vmatprep.subr.mxu1 %v6938_v0  ;;  %6514 = vmatpush3.msra.mxu0 %v7782_v7 }
0x20eb   :  { %6457 = vmatpush3.msra.mxu1 %v8214_v54  ;;  %6515 = vmatprep.mubr.msk.f32.mxu0 %vm6939_vm0, %v6938_v0 }
0x20ec   :  { %6458 = vmatprep.subr.mxu1 %v6938_v0  ;;  %6518 = vmatprep.subr.mxu0 %v6938_v0 }
0x20ed   :  { %6459 = vmatpush3.msra.mxu1 %v7793_v19  ;;  %6516 = vmatmul.mubr.msk.f32.vlgmr.msra.gmra.mxu0 %vm418_vm4, %v5682_v60 }
0x20ee   :  { %6461 = vmatmul.mubr.msk.f32.vlgmr.msra.gmra.mxu1 %vm94_vm1, %v3345_v38  ;;  %6463 = vmatprep.subr.mxu1 %v6938_v0 }
0x20ef   :  { %6464 = vmatpush3.msra.mxu1 %v7802_v8  ;;  %6519 = vmatpush3.msra.mxu0 %v7808_v12 }
0x20f0   :  { %6465 = vmatprep.subr.mxu1 %v6938_v0  ;;  %6520 = vmatprep.subr.mxu0 %v6938_v0 }
0x20f1   :  { %6466 = vmatpush3.msra.mxu1 %v7816_v20  ;;  %6521 = vmatpush3.msra.mxu0 %v7822_v2 }
0x20f2   :  { %6467 = vmatprep.subr.mxu1 %v6938_v0  ;;  %6522 = vmatprep.subr.mxu0 %v6938_v0 }
0x20f3   :  { %6468 = vmatpush3.msra.mxu1 %v7830_v25  ;;  %6523 = vmatpush3.msra.mxu0 %v7836_v26 }
0x20f4   :  { %6469 = vmatprep.subr.mxu1 %v6938_v0  ;;  %6524 = vmatprep.subr.mxu0 %v6938_v0 }
0x20f5   :  { %6470 = vmatpush3.msra.mxu1 %v7844_v24  ;;  %6525 = vmatpush3.msra.mxu0 %v7850_v51 }
0x20f6   :  { %6471 = vmatprep.subr.mxu1 %v6938_v0  ;;  %6526 = vmatprep.subr.mxu0 %v6938_v0 }
0x20f7   :  { %6472 = vmatpush3.msra.mxu1 %v7858_v23  ;;  %6527 = vmatpush3.msra.mxu0 %v7864_v21 }
0x20f8   :  { %6473 = vmatprep.subr.mxu1 %v6938_v0  ;;  %6528 = vmatprep.subr.mxu0 %v6938_v0 }
0x20f9   :  { %6474 = vmatpush3.msra.mxu1 %v7872_v49  ;;  %6529 = vmatpush3.msra.mxu0 %v7878_v22  ;;  %v8277_v22 = vld [vmem:[%s8811_s2] sm:$0xff] }
0x20fa   :  { %6475 = vmatprep.subr.mxu1 %v6938_v0  ;;  %6530 = vmatprep.subr.mxu0 %v6938_v0 }
0x20fb   :  { %6476 = vmatpush3.msra.mxu1 %v7886_v56  ;;  %6531 = vmatpush3.msra.mxu0 %v7892_v61  ;;  %v8283_v61 = vld [vmem:[%s8811_s2 + $0x8] sm:$0xff] }
0x20fc   :  { %6477 = vmatprep.subr.mxu1 %v6938_v0  ;;  %6532 = vmatprep.subr.mxu0 %v6938_v0 }
0x20fd   :  { %6478 = vmatpush3.msra.mxu1 %v7900_v3  ;;  %6479 = vmatprep.mubr.msk.f32.mxu1 %vm6939_vm0, %v6938_v0 }
0x20fe   :  { %6533 = vmatpush3.msra.mxu0 %v7908_v55  ;;  %6534 = vmatprep.mubr.msk.f32.mxu0 %vm6939_vm0, %v6938_v0 }
0x20ff   :  { %6567 = vmatprep.subr.mxu0 %v6938_v0  ;;  %6500 = vmatprep.subr.mxu1 %v6938_v0 }
0x21a6   :  { %v3414_v48 = vpop.f32.mrf.mxu1  ;;  %v8261_v7 = vpop.f32.mrf.mxu0 }
0x21a7   :  { %v3485_v19 = vadd.f32 %v8139_v53, %v3414_v48 }
0x21a8   :  { %v6425_v8 = vpop.f32.mrf.mxu1  ;;  %v6499_v12 = vpop.f32.mrf.mxu0 }
0x21a9   :  { %v3558_v20 = vadd.f32 %v8164_v32, %v3485_v19 }
0x21ab   :  { %5681 = vst.msk [vmem:[%s8824_s16 + $0x8] sm:$0x3] %vm821_vm6, %v3558_v20 }
0x21ae   :  { %v3632_v2 = vpop.f32.mrf.mxu1 }
0x21af   :  { %v3643_v25 = vrot.slane %v3632_v2, %v7084_v18 }
0x21b0   :  { %v6462_v26 = vpop.f32.mrf.mxu1 }
0x21b1   :  { %v3644_v24 = vcombine.high %v3643_v25, %v3643_v25  ;;  %v3651_v51 = vrot.slane %v3643_v25, %v7084_v18 }
0x21b3   :  { %v3658_v23 = vrot.slane %v3644_v24, %v7084_v18  ;;  %v3662_v21 = vrot.slane %v3651_v51, %v7075_v10 }
0x21b5   :  { %v3666_v49 = vrot.slane %v3658_v23, %v7075_v10  ;;  %v3669_v56 = vadd.f32 %v8277_v22, %v3662_v21 }
0x21b7   :  { %v3670_v3 = vadd.f32 %v8283_v61, %v3666_v49  ;;  %6806 = vtanh.f32 %v3669_v56  ;;  %v3999_v49 = vadd.f32 %v7951_v52, %v8261_v7  ;;  %v8312_v56 = vpop.f32.mrf.mxu0 }
0x21b9   :  { %6808 = vtanh.f32 %v3670_v3  ;;  %v6517_v3 = vpop.f32.mrf.mxu0 }
0x21c4   :  { %v6807_v55 = vpop.eup %6806 }
0x21c5   :  { %v3673_v53 = vmul.f32 %v8289_v47, %v6807_v55 }
0x21c6   :  { %v6809_v50 = vpop.eup %6808 }
0x21c7   :  { %v3675_v58 = vsel %vm94_vm1, %v3673_v53, 0.0  ;;  %v3674_v32 = vmul.f32 %v8289_v47, %v6809_v50 }
0x21c8   :  { %3676 = vadd.xlane.f32.xlu1 %v3675_v58 }
0x21c9   :  { %v3678_v14 = vsel %vm94_vm1, %v3674_v32, 0.0 }
0x21ca   :  { %3679 = vadd.xlane.f32.xlu0 %v3678_v14 }
0x2251   :  { %v3677_v17 = vpop.xlane.xlu1 %3676 }
0x2252   :  { %v3681_v31 = vadd.f32 %v3677_v17, %v7112_v39 }
0x2253   :  { %v3680_v63 = vpop.xlane.xlu0 %3679 }
0x2254   :  { %v3682_v44 = vadd.f32 %v3680_v63, %v7115_v42  ;;  %3686 = vperm.xlu0 %6714, %v3681_v31  }
0x2256   :  { %3689 = vperm.xlu1 %6715, %v3682_v44  }
0x22cf   :  { %v3687_v40 = vpop.permute.xlu0 %3686 }
0x22d0   :  { %v3694_v59 = vrot.slane %v3687_v40, %v7073_v9 }
0x22d1   :  { %v3690_v62 = vpop.permute.xlu1 %3689 }
0x22d2   :  { %v3698_v33 = vrot.slane %v3690_v62, %v7073_v9 }
0x22d4   :  { %v3699_v16 = vsel %vm256_vm2, %v3698_v33, %v3694_v59 }
0x22d5   :  { %v3701_v1 = vsel %vm259_vm3, %v3699_v16, -inf }
0x22d6   :  { %3702 = vmax.xlane.f32.xlu1 %v3701_v1 }
0x235f   :  { %v3703_v41 = vpop.xlane.xlu1 %3702 }
0x2360   :  { %v3708_v46 = vrot.slane %v3703_v41, %v7075_v10  ;;  %v3712_v60 = vrot.slane %v3703_v41, %v7077_v11  ;;  %v8334_v41 = vld [vmem:[%s8813_s7] sm:$0xff] }
0x2362   :  { %v3715_v35 = vsub.f32 %v3681_v31, %v3708_v46  ;;  %v3716_v57 = vsub.f32 %v3682_v44, %v3712_v60 }
0x2364   :  { %v3717_v36 = vmul.f32 1.442695, %v3715_v35  ;;  %v3719_v13 = vmul.f32 1.442695, %v3716_v57 }
0x2366   :  { %6810 = vpow2.f32 %v3717_v36 }
0x2367   :  { %6812 = vpow2.f32 %v3719_v13 }
0x2373   :  { %v6811_v37 = vpop.eup %6810 }
0x2374   :  { %3724 = vperm.xlu0 %6714, %v6811_v37   ;;  %v6813_v30 = vpop.eup %6812 }
0x2378   :  { %3727 = vperm.xlu0 %6714, %v6813_v30  }
0x23ef   :  { %v3725_v38 = vpop.permute.xlu0 %3724 }
0x23f0   :  { %v3732_v19 = vrot.slane %v3725_v38, %v7073_v9 }
0x23f3   :  { %v3728_v48 = vpop.permute.xlu0 %3727 }
0x23f4   :  { %v3736_v8 = vrot.slane %v3728_v48, %v7073_v9 }
0x23f6   :  { %v3737_v12 = vsel %vm256_vm2, %v3736_v8, %v3732_v19  ;;  %v8368_v8 = vld [vmem:[%s8815_s9 + $0x10] sm:$0xff] }
0x23f7   :  { %v3739_v20 = vsel %vm259_vm3, %v3737_v12, 0.0  ;;  %v8375_v12 = vld [vmem:[%s8815_s9 + $0x8] sm:$0xff] }
0x23f8   :  { %3740 = vadd.xlane.f32.xlu0 %v3739_v20 }
0x2481   :  { %v3741_v2 = vpop.xlane.xlu0 %3740 }
0x2482   :  { %v3746_v25 = vrot.slane %v3741_v2, %v7075_v10  ;;  %v3750_v26 = vrot.slane %v3741_v2, %v7077_v11  ;;  %v8382_v2 = vld [vmem:[%s8815_s9] sm:$0xff] }
0x2484   :  { %6814 = vrcp.f32 %v3746_v25 }
0x2485   :  { %6816 = vrcp.f32 %v3750_v26 }
0x2491   :  { %v6815_v24 = vpop.eup %6814 }
0x2492   :  { %v6817_v51 = vpop.eup %6816  ;;  %v3754_v23 = vmul.f32 %v6815_v24, %v6811_v37 }
0x2493   :  { %v3756_v21 = vmul.f32 %v6817_v51, %v6813_v30 }
0x2494   :  { %3759 = vperm.xlu1 %6715, %v3754_v23  }
0x2495   :  { %3764 = vperm.xlu0 %6714, %v3756_v21  }
0x2498   :  { %4010 = vrot.lane.b32.xlu1 %v3999_v49, %s6942_s28 }
0x250f   :  { %v3760_v55 = vpop.permute.xlu1 %3759 }
0x2510   :  { %v3765_v53 = vpop.permute.xlu0 %3764  ;;  %v3767_v50 = vmul.f32 %v7961_v27, %v3760_v55  ;;  %v8412_v55 = vld [vmem:[%s8816_s12 + $0x8] sm:$0xff] }
0x2511   :  { %v3768_v58 = vmul.f32 %v7967_v15, %v3765_v53  ;;  %v8324_v15 = vld [vmem:[%s8813_s7 + $0x8] sm:$0xff]  ;;  %v8421_v53 = vld [vmem:[%s8816_s12] sm:$0xff] }
0x2512   :  { %v3769_v32 = vsel %vm328_vm5, %v3767_v50, 0.0  ;;  %v8432_v50 = vld [vmem:[%s8827_s23] sm:$0xff] }
0x2513   :  { %v3776_v14 = vsel %vm328_vm5, %v3768_v58, 0.0  ;;  %v3770_v17 = vrot.slane %v3769_v32, 4  ;;  %v4011_v38 = vpop.permute.xlu1 %4010  ;;  %v8441_v58 = vld [vmem:[%s8817_s8 + $0x38] sm:$0xff] }
0x2514   :  { %v3777_v31 = vrot.slane %v3776_v14, 4 }
0x2515   :  { %v3771_v63 = vadd.f32 %v3770_v17, %v3769_v32  ;;  %v8447_v32 = vld [vmem:[%s8818_s14 + $0x38] sm:$0xff]  ;;  %v8461_v17 = vld [vmem:[%s8818_s14 + $0x30] sm:$0xff] }
0x2516   :  { %v3778_v44 = vadd.f32 %v3777_v31, %v3776_v14  ;;  %v8455_v14 = vld [vmem:[%s8817_s8 + $0x30] sm:$0xff]  ;;  %v8469_v31 = vld [vmem:[%s8817_s8 + $0x28] sm:$0xff] }
0x2517   :  { %v3772_v52 = vrot.slane %v3771_v63, 2 }
0x2518   :  { %v3779_v7 = vrot.slane %v3778_v44, 2 }
0x2519   :  { %v3773_v40 = vadd.f32 %v3772_v52, %v3771_v63  ;;  %v8475_v63 = vld [vmem:[%s8818_s14 + $0x28] sm:$0xff]  ;;  %v8489_v52 = vld [vmem:[%s8818_s14 + $0x20] sm:$0xff] }
0x251a   :  { %v3780_v62 = vadd.f32 %v3779_v7, %v3778_v44  ;;  %v8483_v44 = vld [vmem:[%s8817_s8 + $0x20] sm:$0xff]  ;;  %v8497_v7 = vld [vmem:[%s8817_s8 + $0x18] sm:$0xff] }
0x251b   :  { %v3774_v59 = vrot.slane %v3773_v40, 1 }
0x251c   :  { %v3781_v33 = vrot.slane %v3780_v62, 1 }
0x251d   :  { %v3775_v16 = vadd.f32 %v3774_v59, %v3773_v40  ;;  %v8503_v40 = vld [vmem:[%s8818_s14 + $0x18] sm:$0xff]  ;;  %v8517_v59 = vld [vmem:[%s8818_s14 + $0x10] sm:$0xff] }
0x251e   :  { %v3782_v1 = vadd.f32 %v3781_v33, %v3780_v62  ;;  %v8511_v62 = vld [vmem:[%s8817_s8 + $0x10] sm:$0xff]  ;;  %v8525_v33 = vld [vmem:[%s8817_s8 + $0x8] sm:$0xff] }
0x2520   :  { %v3785_v27 = vsel %vm256_vm2, %v3782_v1, %v3775_v16  ;;  %v8531_v16 = vld [vmem:[%s8818_s14 + $0x8] sm:$0xff]  ;;  %v8539_v1 = vld [vmem:[%s8817_s8] sm:$0xff] }
0x2521   :  { %6480 = vmatmul.mubr.msk.f32.vlgmr.msra.gmra.mxu1 %vm328_vm5, %v3785_v27  ;;  %6535 = vmatmul.mubr.msk.f32.vlgmr.msra.gmra.mxu0 %vm328_vm5, %v3785_v27  ;;  %v8547_v27 = vld [vmem:[%s8818_s14] sm:$0xff] }
0x2522   :  { %6568 = vmatpush3.msra.mxu0 %v8324_v15  ;;  %6501 = vmatpush3.msra.mxu1 %v7979_v45 }
0x2523   :  { %6569 = vmatprep.subr.mxu0 %v6938_v0  ;;  %6571 = vmatprep.mubr.msk.f32.mxu0 %vm6939_vm0, %v6938_v0 }
0x2524   :  { %6570 = vmatpush3.msra.mxu0 %v8334_v41  ;;  %6502 = vmatprep.subr.mxu1 %v6938_v0 }
0x2525   :  { %6574 = vmatprep.subr.mxu0 %v6938_v0  ;;  %6503 = vmatpush3.msra.mxu1 %v7991_v4 }
0x2526   :  { %6504 = vmatprep.subr.mxu1 %v6938_v0  ;;  %6508 = vmatprep.mubr.msk.f32.mxu1 %vm6939_vm0, %v6938_v0 }
0x2527   :  { %6505 = vmatpush3.msra.mxu1 %v8000_v28 }
0x2528   :  { %6506 = vmatprep.subr.mxu1 %v6938_v0 }
0x2529   :  { %6507 = vmatpush3.msra.mxu1 %v8007_v5 }
0x252a   :  { %6537 = vmatprep.subr.mxu1 %v6938_v0 }
0x25e1   :  { %v3854_v45 = vpop.f32.mrf.mxu1  ;;  %v8347_v46 = vpop.f32.mrf.mxu0 }
0x25e2   :  { %v3928_v60 = vadd.f32 %v8189_v29, %v3854_v45  ;;  %v5693_v29 = vld [vmem:[%s8814_s0 + $0xc] sm:$0x3] }
0x25e3   :  { %v6481_v35 = vpop.f32.mrf.mxu1  ;;  %v6536_v4 = vpop.f32.mrf.mxu0  ;;  %6572 = vmatmul.mubr.msk.f32.vlgmr.msra.gmra.mxu0 %vm418_vm4, %v5693_v29 }
0x25e4   :  { %v3931_v57 = vadd.f32 %v8017_v43, %v3928_v60  ;;  %v8359_v43 = vld [vmem:[%s8815_s9 + $0x18] sm:$0xff]  ;;  %6582 = vmatprep.mubr.msk.f32.mxu0 %vm6939_vm0, %v6938_v0 }
0x25e5   :  { %6575 = vmatpush3.msra.mxu0 %v8359_v43 }
0x25e6   :  { %v4002_v36 = vadd.f32 %v3999_v49, %v3931_v57  ;;  %6576 = vmatprep.subr.mxu0 %v6938_v0 }
0x25e7   :  { %6577 = vmatpush3.msra.mxu0 %v8368_v8 }
0x25e8   :  { %v5687_v13 = vmul.f32 -1.442695, %v4002_v36  ;;  %6578 = vmatprep.subr.mxu0 %v6938_v0 }
0x25e9   :  { %6579 = vmatpush3.msra.mxu0 %v8375_v12 }
0x25ea   :  { %6818 = vpow2.f32 %v5687_v13  ;;  %6580 = vmatprep.subr.mxu0 %v6938_v0 }
0x25eb   :  { %6581 = vmatpush3.msra.mxu0 %v8382_v2 }
0x25ec   :  { %6596 = vmatprep.subr.mxu0 %v6938_v0 }
0x25f7   :  { %v6819_v37 = vpop.eup %6818 }
0x25f8   :  { %v4006_v28 = vadd.f32 1.0, %v6819_v37 }
0x25fa   :  { %6820 = vrcp.f32 %v4006_v28 }
0x2607   :  { %v6821_v30 = vpop.eup %6820 }
0x2608   :  { %v4013_v5 = vmul.f32 %v6821_v30, %v4011_v38  ;;  %v4020_v25 = vsub.f32 1.0, %v6821_v30  ;;  %v4026_v24 = vmul.f32 %v6821_v30, %v8185_v6  ;;  %v8403_v6 = vld [vmem:[%s8827_s23 + $0x18] sm:$0xff] }
0x260a   :  { %4015 = vrot.lane.b32.xlu1 %v4013_v5, %s6942_s28 }
0x267c   :  { %v4016_v48 = vpop.permute.xlu1 %4015 }
0x267d   :  { %v4018_v19 = vadd.f32 %v4016_v48, %v3931_v57 }
0x267f   :  { %6822 = vtanh.f32 %v4018_v19 }
0x268c   :  { %v6823_v20 = vpop.eup %6822 }
0x268d   :  { %4022 = vrot.lane.b32.xlu1 %v6823_v20, %s6943_s27 }
0x26a3   :  { %v8392_v21 = vpop.f32.mrf.mxu0 }
0x26a5   :  { %v6573_v49 = vpop.f32.mrf.mxu0 }
0x26ff   :  { %v4023_v26 = vpop.permute.xlu1 %4022 }
0x2700   :  { %v4025_v51 = vmul.f32 %v4023_v26, %v4020_v25 }
0x2702   :  { %v8388_v23 = vadd.f32 %v4026_v24, %v4025_v51 }
0x2704   :  { %4029 = vrot.lane.b32.xlu0 %v8388_v23, %s6943_s27 }
0x2776   :  { %v4030_v3 = vpop.permute.xlu0 %4029 }
0x2777   :  { %5691 = vst.msk [vmem:[%s8823_s15 + $0xa] sm:$0x3] %vm821_vm6, %v4030_v3  ;;  %6509 = vmatmul.mubr.msk.f32.vlgmr.msra.gmra.mxu1 %vm94_vm1, %v4030_v3  ;;  %6583 = vmatmul.mubr.msk.f32.vlgmr.msra.gmra.mxu0 %vm94_vm1, %v4030_v3 }
0x2778   :  { %6538 = vmatpush3.msra.mxu1 %v8403_v6  ;;  %6545 = vmatprep.mubr.msk.f32.mxu1 %vm6939_vm0, %v6938_v0 }
0x2779   :  { %6539 = vmatprep.subr.mxu1 %v6938_v0  ;;  %6597 = vmatpush3.msra.mxu0 %v8412_v55 }
0x277a   :  { %6540 = vmatpush3.msra.mxu1 %v8205_v34  ;;  %6598 = vmatprep.subr.mxu0 %v6938_v0 }
0x277b   :  { %6541 = vmatprep.subr.mxu1 %v6938_v0  ;;  %6599 = vmatpush3.msra.mxu0 %v8421_v53 }
0x277c   :  { %6542 = vmatpush3.msra.mxu1 %v8214_v54  ;;  %6600 = vmatprep.mubr.msk.f32.mxu0 %vm6939_vm0, %v6938_v0 }
0x277d   :  { %6543 = vmatprep.subr.mxu1 %v6938_v0  ;;  %6603 = vmatprep.subr.mxu0 %v6938_v0 }
0x277e   :  { %6544 = vmatpush3.msra.mxu1 %v8432_v50  ;;  %6601 = vmatmul.mubr.msk.f32.vlgmr.msra.gmra.mxu0 %vm418_vm4, %v5693_v29 }
0x277f   :  { %6546 = vmatmul.mubr.msk.f32.vlgmr.msra.gmra.mxu1 %vm94_vm1, %v4030_v3  ;;  %6548 = vmatprep.subr.mxu1 %v6938_v0 }
0x2780   :  { %6549 = vmatpush3.msra.mxu1 %v8441_v58  ;;  %6604 = vmatpush3.msra.mxu0 %v8447_v32 }
0x2781   :  { %6550 = vmatprep.subr.mxu1 %v6938_v0  ;;  %6605 = vmatprep.subr.mxu0 %v6938_v0 }
0x2782   :  { %6551 = vmatpush3.msra.mxu1 %v8455_v14  ;;  %6606 = vmatpush3.msra.mxu0 %v8461_v17 }
0x2783   :  { %6552 = vmatprep.subr.mxu1 %v6938_v0  ;;  %6607 = vmatprep.subr.mxu0 %v6938_v0 }
0x2784   :  { %6553 = vmatpush3.msra.mxu1 %v8469_v31  ;;  %6608 = vmatpush3.msra.mxu0 %v8475_v63 }
0x2785   :  { %6554 = vmatprep.subr.mxu1 %v6938_v0  ;;  %6609 = vmatprep.subr.mxu0 %v6938_v0 }
0x2786   :  { %6555 = vmatpush3.msra.mxu1 %v8483_v44  ;;  %6610 = vmatpush3.msra.mxu0 %v8489_v52 }
0x2787   :  { %6556 = vmatprep.subr.mxu1 %v6938_v0  ;;  %6611 = vmatprep.subr.mxu0 %v6938_v0 }
0x2788   :  { %6557 = vmatpush3.msra.mxu1 %v8497_v7  ;;  %6612 = vmatpush3.msra.mxu0 %v8503_v40 }
0x2789   :  { %6558 = vmatprep.subr.mxu1 %v6938_v0  ;;  %6613 = vmatprep.subr.mxu0 %v6938_v0 }
0x278a   :  { %6559 = vmatpush3.msra.mxu1 %v8511_v62  ;;  %6614 = vmatpush3.msra.mxu0 %v8517_v59 }
0x278b   :  { %6560 = vmatprep.subr.mxu1 %v6938_v0  ;;  %6615 = vmatprep.subr.mxu0 %v6938_v0 }
0x278c   :  { %6561 = vmatpush3.msra.mxu1 %v8525_v33  ;;  %6616 = vmatpush3.msra.mxu0 %v8531_v16 }
0x278d   :  { %6562 = vmatprep.subr.mxu1 %v6938_v0  ;;  %6617 = vmatprep.subr.mxu0 %v6938_v0 }
0x278e   :  { %6563 = vmatpush3.msra.mxu1 %v8539_v1  ;;  %6564 = vmatprep.mubr.msk.f32.mxu1 %vm6939_vm0, %v6938_v0 }
0x278f   :  { %6618 = vmatpush3.msra.mxu0 %v8547_v27  ;;  %6619 = vmatprep.mubr.msk.f32.mxu0 %vm6939_vm0, %v6938_v0 }
0x2790   :  { %6652 = vmatprep.subr.mxu0 %v6938_v0  ;;  %6585 = vmatprep.subr.mxu1 %v6938_v0 }
0x2837   :  { %v4099_v45 = vpop.f32.mrf.mxu1  ;;  %v8554_v60 = vpop.f32.mrf.mxu0 }
0x2838   :  { %v4170_v35 = vadd.f32 %v8312_v56, %v4099_v45 }
0x2839   :  { %v6510_v4 = vpop.f32.mrf.mxu1  ;;  %v6584_v57 = vpop.f32.mrf.mxu0 }
0x283a   :  { %v4243_v36 = vadd.f32 %v8347_v46, %v4170_v35 }
0x283c   :  { %5692 = vst.msk [vmem:[%s8824_s16 + $0xa] sm:$0x3] %vm821_vm6, %v4243_v36 }
0x283f   :  { %v4317_v13 = vpop.f32.mrf.mxu1 }
0x2840   :  { %v4328_v37 = vrot.slane %v4317_v13, %v7084_v18 }
0x2841   :  { %v6547_v28 = vpop.f32.mrf.mxu1 }
0x2842   :  { %v4329_v30 = vcombine.high %v4328_v37, %v4328_v37  ;;  %v4336_v38 = vrot.slane %v4328_v37, %v7084_v18 }
0x2844   :  { %v4343_v5 = vrot.slane %v4329_v30, %v7084_v18  ;;  %v4347_v56 = vrot.slane %v4336_v38, %v7075_v10 }
0x2846   :  { %v4351_v48 = vrot.slane %v4343_v5, %v7075_v10  ;;  %v4354_v46 = vadd.f32 %v8277_v22, %v4347_v56 }
0x2848   :  { %v4355_v19 = vadd.f32 %v8283_v61, %v4351_v48  ;;  %6824 = vtanh.f32 %v4354_v46 }
0x284a   :  { %6826 = vtanh.f32 %v4355_v19 }
0x2855   :  { %v6825_v29 = vpop.eup %6824 }
0x2856   :  { %v4358_v20 = vmul.f32 %v8289_v47, %v6825_v29 }
0x2857   :  { %v6827_v25 = vpop.eup %6826 }
0x2858   :  { %v4360_v26 = vsel %vm94_vm1, %v4358_v20, 0.0  ;;  %v4359_v24 = vmul.f32 %v8289_v47, %v6827_v25 }
0x2859   :  { %4361 = vadd.xlane.f32.xlu1 %v4360_v26 }
0x285a   :  { %v4363_v51 = vsel %vm94_vm1, %v4359_v24, 0.0 }
0x285b   :  { %4364 = vadd.xlane.f32.xlu0 %v4363_v51 }
0x28e2   :  { %v4362_v49 = vpop.xlane.xlu1 %4361 }
0x28e3   :  { %v4366_v3 = vadd.f32 %v4362_v49, %v7112_v39 }
0x28e4   :  { %v4365_v45 = vpop.xlane.xlu0 %4364 }
0x28e5   :  { %v4367_v35 = vadd.f32 %v4365_v45, %v7115_v42  ;;  %4371 = vperm.xlu0 %6714, %v4366_v3  }
0x28e7   :  { %4374 = vperm.xlu1 %6715, %v4367_v35  }
0x2960   :  { %v4372_v4 = vpop.permute.xlu0 %4371 }
0x2961   :  { %v4379_v36 = vrot.slane %v4372_v4, %v7073_v9 }
0x2962   :  { %v4375_v57 = vpop.permute.xlu1 %4374 }
0x2963   :  { %v4383_v13 = vrot.slane %v4375_v57, %v7073_v9 }
0x2965   :  { %v4384_v37 = vsel %vm256_vm2, %v4383_v13, %v4379_v36 }
0x2966   :  { %v4386_v28 = vsel %vm259_vm3, %v4384_v37, -inf }
0x2967   :  { %4387 = vmax.xlane.f32.xlu1 %v4386_v28  ;;  %v8590_v28 = vld [vmem:[%s8819_s11] ss:$0 sm:$0xff] }
0x29f0   :  { %v4388_v30 = vpop.xlane.xlu1 %4387 }
0x29f1   :  { %v4393_v38 = vrot.slane %v4388_v30, %v7075_v10  ;;  %v4397_v5 = vrot.slane %v4388_v30, %v7077_v11  ;;  %v4684_v30 = vadd.f32 %v8590_v28, %v8554_v60 }
0x29f3   :  { %v4400_v56 = vsub.f32 %v4366_v3, %v4393_v38  ;;  %v4401_v48 = vsub.f32 %v4367_v35, %v4397_v5  ;;  %v8595_v38 = vpop.f32.mrf.mxu0 }
0x29f5   :  { %v4402_v46 = vmul.f32 1.442695, %v4400_v56  ;;  %v4404_v19 = vmul.f32 1.442695, %v4401_v48  ;;  %v6602_v5 = vpop.f32.mrf.mxu0 }
0x29f7   :  { %6828 = vpow2.f32 %v4402_v46  ;;  %v8600_v46 = vld [vmem:[%s8820_s1] sm:$0xff] }
0x29f8   :  { %6830 = vpow2.f32 %v4404_v19 }
0x2a04   :  { %v6829_v29 = vpop.eup %6828 }
0x2a05   :  { %4409 = vperm.xlu0 %6714, %v6829_v29   ;;  %v6831_v20 = vpop.eup %6830 }
0x2a09   :  { %4412 = vperm.xlu0 %6714, %v6831_v20  }
0x2a80   :  { %v4410_v25 = vpop.permute.xlu0 %4409 }
0x2a81   :  { %v4417_v24 = vrot.slane %v4410_v25, %v7073_v9 }
0x2a84   :  { %v4413_v26 = vpop.permute.xlu0 %4412 }
0x2a85   :  { %v4421_v51 = vrot.slane %v4413_v26, %v7073_v9 }
0x2a87   :  { %v4422_v49 = vsel %vm256_vm2, %v4421_v51, %v4417_v24 }
0x2a88   :  { %v4424_v45 = vsel %vm259_vm3, %v4422_v49, 0.0 }
0x2a89   :  { %4425 = vadd.xlane.f32.xlu0 %v4424_v45 }
0x2b12   :  { %v4426_v3 = vpop.xlane.xlu0 %4425 }
0x2b13   :  { %v4431_v35 = vrot.slane %v4426_v3, %v7075_v10  ;;  %v4435_v4 = vrot.slane %v4426_v3, %v7077_v11 }
0x2b15   :  { %6832 = vrcp.f32 %v4431_v35 }
0x2b16   :  { %6834 = vrcp.f32 %v4435_v4 }
0x2b22   :  { %v6833_v57 = vpop.eup %6832 }
0x2b23   :  { %v6835_v36 = vpop.eup %6834  ;;  %v4439_v13 = vmul.f32 %v6833_v57, %v6829_v29  ;;  %v8606_v29 = vld [vmem:[%s8820_s1 + $0x8] sm:$0xff] }
0x2b24   :  { %v4441_v37 = vmul.f32 %v6835_v36, %v6831_v20 }
0x2b25   :  { %4444 = vperm.xlu1 %6715, %v4439_v13  }
0x2b26   :  { %4449 = vperm.xlu0 %6714, %v4441_v37  }
0x2b29   :  { %4695 = vrot.lane.b32.xlu1 %v4684_v30, %s6942_s28 }
0x2ba0   :  { %v4445_v56 = vpop.permute.xlu1 %4444 }
0x2ba1   :  { %v4450_v48 = vpop.permute.xlu0 %4449  ;;  %v4452_v19 = vmul.f32 %v8600_v46, %v4445_v56  ;;  %v8618_v56 = vld [vmem:[%s8822_s13 + $0x18] sm:$0xff] }
0x2ba2   :  { %v4453_v60 = vmul.f32 %v8606_v29, %v4450_v48  ;;  %v8646_v48 = vld [vmem:[%s8822_s13] sm:$0xff] }
0x2ba3   :  { %v4454_v20 = vsel %vm328_vm5, %v4452_v19, 0.0 }
0x2ba4   :  { %v4461_v25 = vsel %vm328_vm5, %v4453_v60, 0.0  ;;  %v4455_v26 = vrot.slane %v4454_v20, 4 }
0x2ba5   :  { %v4462_v24 = vrot.slane %v4461_v25, 4 }
0x2ba6   :  { %v4456_v51 = vadd.f32 %v4455_v26, %v4454_v20 }
0x2ba7   :  { %v4463_v49 = vadd.f32 %v4462_v24, %v4461_v25  ;;  %v8656_v24 = vld [vmem:[%s8821_s10] ss:$0 sm:$0xff] }
0x2ba8   :  { %v4457_v45 = vrot.slane %v4456_v51, 2 }
0x2ba9   :  { %v4464_v3 = vrot.slane %v4463_v49, 2 }
0x2baa   :  { %v4458_v35 = vadd.f32 %v4457_v45, %v4456_v51 }
0x2bab   :  { %v4465_v4 = vadd.f32 %v4464_v3, %v4463_v49 }
0x2bac   :  { %v4459_v57 = vrot.slane %v4458_v35, 1 }
0x2bad   :  { %v4466_v36 = vrot.slane %v4465_v4, 1 }
0x2bae   :  { %v4460_v13 = vadd.f32 %v4459_v57, %v4458_v35  ;;  %v4696_v57 = vpop.permute.xlu1 %4695 }
0x2baf   :  { %v4467_v37 = vadd.f32 %v4466_v36, %v4465_v4 }
0x2bb1   :  { %v4470_v5 = vsel %vm256_vm2, %v4467_v37, %v4460_v13  ;;  %v5704_v37 = vld [vmem:[%s8814_s0 + $0xe] sm:$0x3] }
0x2bb2   :  { %6565 = vmatmul.mubr.msk.f32.vlgmr.msra.gmra.mxu1 %vm328_vm5, %v4470_v5  ;;  %6620 = vmatmul.mubr.msk.f32.vlgmr.msra.gmra.mxu0 %vm328_vm5, %v4470_v5 }
0x2bb3   :  { %6653 = vmatpush3.msra.mxu0 %v8324_v15  ;;  %6586 = vmatpush3.msra.mxu1 %v8618_v56  ;;  %v8630_v15 = vld [vmem:[%s8822_s13 + $0x10] sm:$0xff] }
0x2bb4   :  { %6654 = vmatprep.subr.mxu0 %v6938_v0  ;;  %6656 = vmatprep.mubr.msk.f32.mxu0 %vm6939_vm0, %v6938_v0 }
0x2bb5   :  { %6655 = vmatpush3.msra.mxu0 %v8334_v41  ;;  %6587 = vmatprep.subr.mxu1 %v6938_v0  ;;  %v8639_v41 = vld [vmem:[%s8822_s13 + $0x8] sm:$0xff] }
0x2bb6   :  { %6659 = vmatprep.subr.mxu0 %v6938_v0  ;;  %6588 = vmatpush3.msra.mxu1 %v8630_v15 }
0x2bb7   :  { %6589 = vmatprep.subr.mxu1 %v6938_v0  ;;  %6593 = vmatprep.mubr.msk.f32.mxu1 %vm6939_vm0, %v6938_v0 }
0x2bb8   :  { %6590 = vmatpush3.msra.mxu1 %v8639_v41  ;;  %6657 = vmatmul.mubr.msk.f32.vlgmr.msra.gmra.mxu0 %vm418_vm4, %v5704_v37 }
0x2bb9   :  { %6591 = vmatprep.subr.mxu1 %v6938_v0  ;;  %6660 = vmatpush3.msra.mxu0 %v8359_v43 }
0x2bba   :  { %6592 = vmatpush3.msra.mxu1 %v8646_v48  ;;  %6667 = vmatprep.mubr.msk.f32.mxu0 %vm6939_vm0, %v6938_v0 }
0x2bbb   :  { %6622 = vmatprep.subr.mxu1 %v6938_v0  ;;  %6661 = vmatprep.subr.mxu0 %v6938_v0 }
0x2bbc   :  { %6662 = vmatpush3.msra.mxu0 %v8368_v8 }
0x2bbd   :  { %6663 = vmatprep.subr.mxu0 %v6938_v0 }
0x2bbe   :  { %6664 = vmatpush3.msra.mxu0 %v8375_v12 }
0x2bbf   :  { %6665 = vmatprep.subr.mxu0 %v6938_v0 }
0x2bc0   :  { %6666 = vmatpush3.msra.mxu0 %v8382_v2 }
0x2bc1   :  { %6681 = vmatprep.subr.mxu0 %v6938_v0 }
0x2c72   :  { %v4539_v19 = vpop.f32.mrf.mxu1  ;;  %v8650_v60 = vpop.f32.mrf.mxu0 }
0x2c73   :  { %v4613_v20 = vadd.f32 %v8392_v21, %v4539_v19 }
0x2c74   :  { %v6566_v25 = vpop.f32.mrf.mxu1  ;;  %v6621_v26 = vpop.f32.mrf.mxu0 }
0x2c75   :  { %v4616_v51 = vadd.f32 %v8656_v24, %v4613_v20 }
0x2c77   :  { %v4687_v49 = vadd.f32 %v4684_v30, %v4616_v51 }
0x2c78   :  { %v8680_v8 = vpop.f32.mrf.mxu0 }
0x2c79   :  { %v5698_v45 = vmul.f32 -1.442695, %v4687_v49 }
0x2c7a   :  { %v6658_v12 = vpop.f32.mrf.mxu0 }
0x2c7b   :  { %6836 = vpow2.f32 %v5698_v45 }
0x2c88   :  { %v6837_v3 = vpop.eup %6836 }
0x2c89   :  { %v4691_v35 = vadd.f32 1.0, %v6837_v3 }
0x2c8b   :  { %6838 = vrcp.f32 %v4691_v35 }
0x2c98   :  { %v6839_v4 = vpop.eup %6838 }
0x2c99   :  { %v4698_v36 = vmul.f32 %v6839_v4, %v4696_v57  ;;  %v4705_v43 = vsub.f32 1.0, %v6839_v4  ;;  %v4711_v19 = vmul.f32 %v6839_v4, %v8388_v23 }
0x2c9b   :  { %4700 = vrot.lane.b32.xlu1 %v4698_v36, %s6942_s28 }
0x2d0d   :  { %v4701_v21 = vpop.permute.xlu1 %4700 }
0x2d0e   :  { %v4703_v13 = vadd.f32 %v4701_v21, %v4616_v51 }
0x2d10   :  { %6840 = vtanh.f32 %v4703_v13 }
0x2d1d   :  { %v6841_v30 = vpop.eup %6840 }
0x2d1e   :  { %4707 = vrot.lane.b32.xlu1 %v6841_v30, %s6943_s27 }
0x2d90   :  { %v4708_v5 = vpop.permute.xlu1 %4707 }
0x2d91   :  { %v4710_v20 = vmul.f32 %v4708_v5, %v4705_v43 }
0x2d93   :  { %v8676_v25 = vadd.f32 %v4711_v19, %v4710_v20 }
0x2d95   :  { %4714 = vrot.lane.b32.xlu0 %v8676_v25, %s6943_s27 }
0x2e07   :  { %v4715_v26 = vpop.permute.xlu0 %4714 }
0x2e08   :  { %5702 = vst.msk [vmem:[%s8823_s15 + $0xc] sm:$0x3] %vm821_vm6, %v4715_v26  ;;  %6594 = vmatmul.mubr.msk.f32.vlgmr.msra.gmra.mxu1 %vm94_vm1, %v4715_v26  ;;  %6668 = vmatmul.mubr.msk.f32.vlgmr.msra.gmra.mxu0 %vm94_vm1, %v4715_v26 }
0x2e09   :  { %6623 = vmatpush3.msra.mxu1 %v8403_v6  ;;  %6630 = vmatprep.mubr.msk.f32.mxu1 %vm6939_vm0, %v6938_v0 }
0x2e0a   :  { %6624 = vmatprep.subr.mxu1 %v6938_v0  ;;  %6682 = vmatpush3.msra.mxu0 %v8412_v55 }
0x2e0b   :  { %6625 = vmatpush3.msra.mxu1 %v8205_v34  ;;  %6683 = vmatprep.subr.mxu0 %v6938_v0 }
0x2e0c   :  { %6626 = vmatprep.subr.mxu1 %v6938_v0  ;;  %6684 = vmatpush3.msra.mxu0 %v8421_v53 }
0x2e0d   :  { %6627 = vmatpush3.msra.mxu1 %v8214_v54  ;;  %6685 = vmatprep.mubr.msk.f32.mxu0 %vm6939_vm0, %v6938_v0 }
0x2e0e   :  { %6628 = vmatprep.subr.mxu1 %v6938_v0  ;;  %6688 = vmatprep.subr.mxu0 %v6938_v0 }
0x2e0f   :  { %6629 = vmatpush3.msra.mxu1 %v8432_v50  ;;  %6686 = vmatmul.mubr.msk.f32.vlgmr.msra.gmra.mxu0 %vm418_vm4, %v5704_v37 }
0x2e10   :  { %6631 = vmatmul.mubr.msk.f32.vlgmr.msra.gmra.mxu1 %vm94_vm1, %v4715_v26  ;;  %6633 = vmatprep.subr.mxu1 %v6938_v0 }
0x2e11   :  { %6634 = vmatpush3.msra.mxu1 %v8441_v58  ;;  %6689 = vmatpush3.msra.mxu0 %v8447_v32 }
0x2e12   :  { %6635 = vmatprep.subr.mxu1 %v6938_v0  ;;  %6690 = vmatprep.subr.mxu0 %v6938_v0 }
0x2e13   :  { %6636 = vmatpush3.msra.mxu1 %v8455_v14  ;;  %6691 = vmatpush3.msra.mxu0 %v8461_v17 }
0x2e14   :  { %6637 = vmatprep.subr.mxu1 %v6938_v0  ;;  %6692 = vmatprep.subr.mxu0 %v6938_v0 }
0x2e15   :  { %6638 = vmatpush3.msra.mxu1 %v8469_v31  ;;  %6693 = vmatpush3.msra.mxu0 %v8475_v63 }
0x2e16   :  { %6639 = vmatprep.subr.mxu1 %v6938_v0  ;;  %6694 = vmatprep.subr.mxu0 %v6938_v0 }
0x2e17   :  { %6640 = vmatpush3.msra.mxu1 %v8483_v44  ;;  %6695 = vmatpush3.msra.mxu0 %v8489_v52 }
0x2e18   :  { %6641 = vmatprep.subr.mxu1 %v6938_v0  ;;  %6696 = vmatprep.subr.mxu0 %v6938_v0 }
0x2e19   :  { %6642 = vmatpush3.msra.mxu1 %v8497_v7  ;;  %6697 = vmatpush3.msra.mxu0 %v8503_v40 }
0x2e1a   :  { %6643 = vmatprep.subr.mxu1 %v6938_v0  ;;  %6698 = vmatprep.subr.mxu0 %v6938_v0 }
0x2e1b   :  { %6644 = vmatpush3.msra.mxu1 %v8511_v62  ;;  %6699 = vmatpush3.msra.mxu0 %v8517_v59 }
0x2e1c   :  { %6645 = vmatprep.subr.mxu1 %v6938_v0  ;;  %6700 = vmatprep.subr.mxu0 %v6938_v0 }
0x2e1d   :  { %6646 = vmatpush3.msra.mxu1 %v8525_v33  ;;  %6701 = vmatpush3.msra.mxu0 %v8531_v16 }
0x2e1e   :  { %6647 = vmatprep.subr.mxu1 %v6938_v0  ;;  %6702 = vmatprep.subr.mxu0 %v6938_v0 }
0x2e1f   :  { %6648 = vmatpush3.msra.mxu1 %v8539_v1  ;;  %6649 = vmatprep.mubr.msk.f32.mxu1 %vm6939_vm0, %v6938_v0 }
0x2e20   :  { %6703 = vmatpush3.msra.mxu0 %v8547_v27  ;;  %6704 = vmatprep.mubr.msk.f32.mxu0 %vm6939_vm0, %v6938_v0 }
0x2e21   :  { %6670 = vmatprep.subr.mxu1 %v6938_v0 }
0x2ec8   :  { %v4784_v34 = vpop.f32.mrf.mxu1  ;;  %v8741_v54 = vpop.f32.mrf.mxu0 }
0x2ec9   :  { %v4855_v2 = vadd.f32 %v8595_v38, %v4784_v34 }
0x2eca   :  { %v6595_v23 = vpop.f32.mrf.mxu1  ;;  %v6669_v6 = vpop.f32.mrf.mxu0 }
0x2ecb   :  { %v4928_v55 = vadd.f32 %v8650_v60, %v4855_v2 }
0x2ecd   :  { %5703 = vst.msk [vmem:[%s8824_s16 + $0xc] sm:$0x3] %vm821_vm6, %v4928_v55 }
0x2ecf   :  { %v5539_v55 = vpop.f32.mrf.mxu0 }
0x2ed0   :  { %v5002_v53 = vpop.f32.mrf.mxu1 }
0x2ed1   :  { %v5013_v50 = vrot.slane %v5002_v53, %v7084_v18  ;;  %v6687_v53 = vpop.f32.mrf.mxu0 }
0x2ed2   :  { %v6632_v58 = vpop.f32.mrf.mxu1 }
0x2ed3   :  { %v5014_v32 = vcombine.high %v5013_v50, %v5013_v50  ;;  %v5021_v14 = vrot.slane %v5013_v50, %v7084_v18 }
0x2ed5   :  { %v5028_v17 = vrot.slane %v5014_v32, %v7084_v18  ;;  %v5032_v31 = vrot.slane %v5021_v14, %v7075_v10 }
0x2ed7   :  { %v5036_v63 = vrot.slane %v5028_v17, %v7075_v10  ;;  %v5039_v44 = vadd.f32 %v8277_v22, %v5032_v31 }
0x2ed9   :  { %v5040_v52 = vadd.f32 %v8283_v61, %v5036_v63  ;;  %6842 = vtanh.f32 %v5039_v44 }
0x2edb   :  { %6844 = vtanh.f32 %v5040_v52 }
0x2ee6   :  { %v6843_v7 = vpop.eup %6842 }
0x2ee7   :  { %v5043_v40 = vmul.f32 %v8289_v47, %v6843_v7 }
0x2ee8   :  { %v6845_v62 = vpop.eup %6844 }
0x2ee9   :  { %v5045_v59 = vsel %vm94_vm1, %v5043_v40, 0.0  ;;  %v5044_v33 = vmul.f32 %v8289_v47, %v6845_v62 }
0x2eea   :  { %5046 = vadd.xlane.f32.xlu1 %v5045_v59 }
0x2eeb   :  { %v5048_v18 = vsel %vm94_vm1, %v5044_v33, 0.0 }
0x2eec   :  { %5049 = vadd.xlane.f32.xlu0 %v5048_v18 }
0x2f73   :  { %v5047_v16 = vpop.xlane.xlu1 %5046 }
0x2f74   :  { %v5051_v1 = vadd.f32 %v5047_v16, %v7112_v39 }
0x2f75   :  { %v5050_v22 = vpop.xlane.xlu0 %5049 }
0x2f76   :  { %v5052_v61 = vadd.f32 %v5050_v22, %v7115_v42  ;;  %5056 = vperm.xlu0 %6714, %v5051_v1  }
0x2f78   :  { %5059 = vperm.xlu1 %6715, %v5052_v61  }
0x2ff1   :  { %v5057_v27 = vpop.permute.xlu0 %5056 }
0x2ff2   :  { %v5064_v60 = vrot.slane %v5057_v27, %v7073_v9 }
0x2ff3   :  { %v5060_v38 = vpop.permute.xlu1 %5059 }
0x2ff4   :  { %v5068_v51 = vrot.slane %v5060_v38, %v7073_v9 }
0x2ff6   :  { %v5069_v47 = vsel %vm256_vm2, %v5068_v51, %v5064_v60 }
0x2ff7   :  { %v5071_v49 = vsel %vm259_vm3, %v5069_v47, -inf }
0x2ff8   :  { %5072 = vmax.xlane.f32.xlu1 %v5071_v49 }
0x3081   :  { %v5073_v45 = vpop.xlane.xlu1 %5072 }
0x3082   :  { %v5078_v3 = vrot.slane %v5073_v45, %v7075_v10  ;;  %v5082_v39 = vrot.slane %v5073_v45, %v7077_v11 }
0x3084   :  { %v5085_v35 = vsub.f32 %v5051_v1, %v5078_v3  ;;  %v5086_v42 = vsub.f32 %v5052_v61, %v5082_v39 }
0x3086   :  { %v5087_v4 = vmul.f32 1.442695, %v5085_v35  ;;  %v5089_v57 = vmul.f32 1.442695, %v5086_v42 }
0x3088   :  { %6846 = vpow2.f32 %v5087_v4 }
0x3089   :  { %6848 = vpow2.f32 %v5089_v57 }
0x3095   :  { %v6847_v36 = vpop.eup %6846 }
0x3096   :  { %5094 = vperm.xlu0 %6714, %v6847_v36   ;;  %v6849_v21 = vpop.eup %6848 }
0x309a   :  { %5097 = vperm.xlu0 %6714, %v6849_v21  }
0x3111   :  { %v5095_v13 = vpop.permute.xlu0 %5094 }
0x3112   :  { %v5102_v30 = vrot.slane %v5095_v13, %v7073_v9 }
0x3115   :  { %v5098_v37 = vpop.permute.xlu0 %5097 }
0x3116   :  { %v5106_v43 = vrot.slane %v5098_v37, %v7073_v9  ;;  %v5369_v9 = vadd.f32 %v8590_v28, %v8741_v54 }
0x3118   :  { %v5107_v5 = vsel %vm256_vm2, %v5106_v43, %v5102_v30 }
0x3119   :  { %v5109_v19 = vsel %vm259_vm3, %v5107_v5, 0.0 }
0x311a   :  { %5110 = vadd.xlane.f32.xlu0 %v5109_v19 }
0x31a3   :  { %v5111_v20 = vpop.xlane.xlu0 %5110 }
0x31a4   :  { %v5116_v12 = vrot.slane %v5111_v20, %v7075_v10  ;;  %v5120_v26 = vrot.slane %v5111_v20, %v7077_v11 }
0x31a6   :  { %6850 = vrcp.f32 %v5116_v12 }
0x31a7   :  { %6852 = vrcp.f32 %v5120_v26 }
0x31b3   :  { %v6851_v34 = vpop.eup %6850 }
0x31b4   :  { %v6853_v2 = vpop.eup %6852  ;;  %v5124_v23 = vmul.f32 %v6851_v34, %v6847_v36 }
0x31b5   :  { %v5126_v6 = vmul.f32 %v6853_v2, %v6849_v21 }
0x31b6   :  { %5129 = vperm.xlu1 %6715, %v5124_v23  }
0x31b7   :  { %5134 = vperm.xlu0 %6714, %v5126_v6  }
0x31ba   :  { %5380 = vrot.lane.b32.xlu1 %v5369_v9, %s6942_s28 }
0x3231   :  { %v5130_v50 = vpop.permute.xlu1 %5129 }
0x3232   :  { %v5135_v58 = vpop.permute.xlu0 %5134  ;;  %v5137_v10 = vmul.f32 %v8600_v46, %v5130_v50 }
0x3233   :  { %v5138_v11 = vmul.f32 %v8606_v29, %v5135_v58 }
0x3234   :  { %v5139_v32 = vsel %vm328_vm5, %v5137_v10, 0.0 }
0x3235   :  { %v5146_v14 = vsel %vm328_vm5, %v5138_v11, 0.0  ;;  %v5140_v17 = vrot.slane %v5139_v32, 4 }
0x3236   :  { %v5147_v31 = vrot.slane %v5146_v14, 4 }
0x3237   :  { %v5141_v63 = vadd.f32 %v5140_v17, %v5139_v32 }
0x3238   :  { %v5148_v44 = vadd.f32 %v5147_v31, %v5146_v14 }
0x3239   :  { %v5142_v52 = vrot.slane %v5141_v63, 2 }
0x323a   :  { %v5149_v28 = vrot.slane %v5148_v44, 2 }
0x323b   :  { %v5143_v54 = vadd.f32 %v5142_v52, %v5141_v63 }
0x323c   :  { %v5150_v7 = vadd.f32 %v5149_v28, %v5148_v44 }
0x323d   :  { %v5144_v40 = vrot.slane %v5143_v54, 1 }
0x323e   :  { %v5151_v62 = vrot.slane %v5150_v7, 1 }
0x323f   :  { %v5145_v59 = vadd.f32 %v5144_v40, %v5143_v54 }
0x3240   :  { %v5152_v33 = vadd.f32 %v5151_v62, %v5150_v7 }
0x3242   :  { %v5155_v46 = vsel %vm256_vm2, %v5152_v33, %v5145_v59 }
0x3243   :  { %6650 = vmatmul.mubr.msk.f32.vlgmr.msra.gmra.mxu1 %vm328_vm5, %v5155_v46  ;;  %6705 = vmatmul.mubr.msk.f32.vlgmr.msra.gmra.mxu0 %vm328_vm5, %v5155_v46 }
0x3244   :  { %6671 = vmatpush3.msra.mxu1 %v8618_v56  ;;  %6678 = vmatprep.mubr.msk.f32.mxu1 %vm6939_vm0, %v6938_v0 }
0x3245   :  { %6672 = vmatprep.subr.mxu1 %v6938_v0 }
0x3246   :  { %6673 = vmatpush3.msra.mxu1 %v8630_v15 }
0x3247   :  { %6674 = vmatprep.subr.mxu1 %v6938_v0 }
0x3248   :  { %6675 = vmatpush3.msra.mxu1 %v8639_v41  ;;  %v5381_v41 = vpop.permute.xlu1 %5380 }
0x3249   :  { %6676 = vmatprep.subr.mxu1 %v6938_v0 }
0x324a   :  { %6677 = vmatpush3.msra.mxu1 %v8646_v48 }
0x3303   :  { %v5224_v29 = vpop.f32.mrf.mxu1  ;;  %v5609_v18 = vpop.f32.mrf.mxu0 }
0x3304   :  { %v5298_v16 = vadd.f32 %v8680_v8, %v5224_v29 }
0x3305   :  { %v6651_v56 = vpop.f32.mrf.mxu1  ;;  %v6706_v1 = vpop.f32.mrf.mxu0 }
0x3306   :  { %v5301_v22 = vadd.f32 %v8656_v24, %v5298_v16 }
0x3308   :  { %v5372_v61 = vadd.f32 %v5369_v9, %v5301_v22 }
0x330a   :  { %v5709_v27 = vmul.f32 -1.442695, %v5372_v61 }
0x330c   :  { %6854 = vpow2.f32 %v5709_v27 }
0x3319   :  { %v6855_v15 = vpop.eup %6854 }
0x331a   :  { %v5376_v38 = vadd.f32 1.0, %v6855_v15 }
0x331c   :  { %6856 = vrcp.f32 %v5376_v38 }
0x3329   :  { %v6857_v60 = vpop.eup %6856 }
0x332a   :  { %v5383_v51 = vmul.f32 %v6857_v60, %v5381_v41  ;;  %v5390_v8 = vsub.f32 1.0, %v6857_v60  ;;  %v5396_v24 = vmul.f32 %v6857_v60, %v8676_v25 }
0x332c   :  { %5385 = vrot.lane.b32.xlu1 %v5383_v51, %s6942_s28 }
0x339e   :  { %v5386_v0 = vpop.permute.xlu1 %5385 }
0x339f   :  { %v5388_v48 = vadd.f32 %v5386_v0, %v5301_v22 }
0x33a1   :  { %6858 = vtanh.f32 %v5388_v48 }
0x33ae   :  { %v6859_v47 = vpop.eup %6858 }
0x33af   :  { %5392 = vrot.lane.b32.xlu1 %v6859_v47, %s6943_s27 }
0x3421   :  { %v5393_v49 = vpop.permute.xlu1 %5392 }
0x3422   :  { %v5395_v45 = vmul.f32 %v5393_v49, %v5390_v8 }
0x3424   :  { %v5397_v3 = vadd.f32 %v5396_v24, %v5395_v45 }
0x3426   :  { %5399 = vrot.lane.b32.xlu0 %v5397_v3, %s6943_s27 }
0x3498   :  { %v5400_v39 = vpop.permute.xlu0 %5399 }
0x3499   :  { %5713 = vst.msk [vmem:[%s8823_s15 + $0xe] sm:$0x3] %vm821_vm6, %v5400_v39  ;;  %6679 = vmatmul.mubr.msk.f32.vlgmr.msra.gmra.mxu1 %vm94_vm1, %v5400_v39 }
0x3559   :  { %v5469_v35 = vpop.f32.mrf.mxu1 }
0x355a   :  { %v5540_v42 = vadd.f32 %v5539_v55, %v5469_v35 }
0x355b   :  { %v6680_v4 = vpop.f32.mrf.mxu1 }
0x355c   :  { %v5613_v57 = vadd.f32 %v5609_v18, %v5540_v42 }
0x355e   :  { %5714 = vst.msk [vmem:[%s8824_s16 + $0xe] sm:$0x3] %vm821_vm6, %v5613_v57 }

</bundles_post_ra>
